<compile_context>
chip_gen: v7x
topology: tpu7x:2x2x1
jax: 0.10.0
libtpu: 0.0.40
codegen_flags: <defaults>
</compile_context>

<pallas_src>
import math
from functools import partial

import jax
import jax.numpy as jnp
from jax.experimental import pallas as pl
from jax.experimental.pallas import tpu as pltpu

NORMALIZE_OUTPUT = False  # module default (normalize_output=False)


def _round_up(x, m):
    return (x + m - 1) // m * m


# ----------------------------- Pallas kernels ------------------------------

def _matmul_bias_act_kernel(a_ref, w_ref, b_ref, o_ref, *, relu):
    # (TM, Kp) bf16 @ (Kp, OC) bf16 on the MXU, f32 accumulation, with the
    # bias-add (+ optional ReLU) epilogue fused before the single store.
    acc = jnp.dot(a_ref[...], w_ref[...], preferred_element_type=jnp.float32)
    acc = acc + b_ref[...]
    if relu:
        acc = jnp.maximum(acc, 0.0)
    o_ref[...] = acc.astype(o_ref.dtype)


def _input_norm_kernel(x_ref, o_ref):
    # Per-sample normalization over the flattened sample:
    #   (x - mean) / (std_unbiased + 1e-7)      [torch.std uses ddof=1]
    # One-pass stats (sum and sum-of-squares), per the perf review.
    x = x_ref[...]
    d = x.shape[1]
    s = jnp.sum(x, axis=1, keepdims=True)
    ss = jnp.sum(x * x, axis=1, keepdims=True)
    mean = s * (1.0 / d)
    var = jnp.maximum((ss - d * mean * mean) / (d - 1), 0.0)
    std = jnp.sqrt(var) + 1e-7
    o_ref[...] = (x - mean) / std


# ------------------------------ Pallas wrappers -----------------------------

def matmul_bias_act(a, w_packed, bias, *, relu, out_dtype=jnp.float32):
    """a: (M, K) @ w_packed: (Kp, OC) [pre-padded bf16] + bias (1, OC), opt. ReLU."""
    M, K = a.shape
    Kp, OC = w_packed.shape
    TM = 512 if M > 512 else _round_up(M, 8)
    Mp = _round_up(M, TM)

    a_p = a.astype(jnp.bfloat16)
    if (Mp, Kp) != (M, K):
        a_p = jnp.pad(a_p, ((0, Mp - M), (0, Kp - K)))

    out = pl.pallas_call(
        partial(_matmul_bias_act_kernel, relu=relu),
        out_shape=jax.ShapeDtypeStruct((Mp, OC), out_dtype),
        grid=(Mp // TM,),
        in_specs=[
            pl.BlockSpec((TM, Kp), lambda i: (i, 0)),
            pl.BlockSpec((Kp, OC), lambda i: (0, 0)),
            pl.BlockSpec((1, OC), lambda i: (0, 0)),
        ],
        out_specs=pl.BlockSpec((TM, OC), lambda i: (i, 0)),
        compiler_params=pltpu.CompilerParams(
            dimension_semantics=("parallel",)),
    )(a_p, w_packed, bias)
    return out[:M]


def conv2d_relu(x, w_packed, bias, *, stride, ksize=3, relu=True):
    """'valid' conv (padding=0, dilation=1) on NHWC input, bias + ReLU fused.

    w_packed is the pre-packed (Kp, OC) bf16 weight matrix (rows ordered as
    (kh*KW + kw)*IC + ic, zero-padded to a lane multiple along K).
    """
    N, H, W, C = x.shape
    KH = KW = ksize
    OH = (H - KH) // stride + 1
    OW = (W - KW) // stride + 1
    taps = []
    for i in range(KH):
        for j in range(KW):
            taps.append(
                jax.lax.slice(
                    x,
                    (0, i, j, 0),
                    (N, i + stride * (OH - 1) + 1, j + stride * (OW - 1) + 1, C),
                    (1, stride, stride, 1)))
    patches = jnp.concatenate(taps, axis=-1).reshape(N * OH * OW, KH * KW * C)
    out = matmul_bias_act(patches, w_packed, bias, relu=relu)
    return out.reshape(N, OH, OW, w_packed.shape[1])


def input_norm(x_nhwc):
    # Per-sample scalar mean/std -> layout independent, so NHWC is fine here.
    N = x_nhwc.shape[0]
    flat = x_nhwc.reshape(N, -1)
    out = pl.pallas_call(
        _input_norm_kernel,
        out_shape=jax.ShapeDtypeStruct(flat.shape, jnp.float32),
    )(flat)
    return out.reshape(x_nhwc.shape)


# ------------------------------ parameters ----------------------------------

def _uniform(key, shape, bound):
    return jax.random.uniform(key, shape, jnp.float32, -bound, bound)


def _pack_conv_weight(w_oihw):
    """PyTorch (OC, IC, KH, KW) -> lane-padded (Kp, OC) bf16 matmul operand."""
    oc, ic, kh, kw = w_oihw.shape
    k = kh * kw * ic
    w_mat = jnp.transpose(w_oihw, (2, 3, 1, 0)).reshape(k, oc)
    kp = _round_up(k, 128)
    return jnp.pad(w_mat, ((0, kp - k), (0, 0))).astype(jnp.bfloat16)


def init_params(key):
    # (name, out_channels, in_channels) for the five 3x3 / stride-2 convs:
    # branch1.conv1..conv4 then the shared head conv1.
    specs = [('c1', 16, 3), ('c2', 32, 16), ('c3', 64, 32), ('c4', 128, 64),
             ('s1', 128, 128)]
    keys = jax.random.split(key, 2 * len(specs) + 2)
    params = {}
    for idx, (name, oc, ic) in enumerate(specs):
        fan_in = ic * 3 * 3
        bound = 1.0 / math.sqrt(fan_in)          # ~ PyTorch default conv init
        w = _uniform(keys[2 * idx], (oc, ic, 3, 3), bound)   # OIHW
        b = _uniform(keys[2 * idx + 1], (oc,), bound)
        params[name + '_w'] = _pack_conv_weight(w)           # (Kp, OC) bf16
        params[name + '_b'] = b.reshape(1, oc)               # (1, OC) f32
    bound = 1.0 / math.sqrt(128)
    fc_w = _uniform(keys[-2], (128, 128), bound)             # PyTorch (out, in)
    params['fc_w'] = jnp.transpose(fc_w).astype(jnp.bfloat16)  # (in, out)
    params['fc_b'] = _uniform(keys[-1], (1, 128), bound)
    return params


# ------------------------------ forward pass ---------------------------------

def forward(params, x_nchw):
    # ---- branch1 (SimplePatchNet5l) ----
    x = jnp.transpose(x_nchw, (0, 2, 3, 1)).astype(jnp.float32)   # NCHW -> NHWC
    x = input_norm(x)
    x = conv2d_relu(x, params['c1_w'], params['c1_b'], stride=2)
    x = conv2d_relu(x, params['c2_w'], params['c2_b'], stride=2)
    x = conv2d_relu(x, params['c3_w'], params['c3_b'], stride=2)
    x = conv2d_relu(x, params['c4_w'], params['c4_b'], stride=2)
    # ---- shared head: relu(conv1) -> flatten -> Linear(128, 128) ----
    x = conv2d_relu(x, params['s1_w'], params['s1_b'], stride=2)
    # Spatial is 1x1 here, so NHWC flatten matches PyTorch's NCHW reshape.
    x = x.reshape(x.shape[0], -1)                                  # (N, 128)
    x = matmul_bias_act(x, params['fc_w'], params['fc_b'], relu=False)
    if NORMALIZE_OUTPUT:
        x = x / (jnp.sqrt(jnp.sum(x * x, axis=1, keepdims=True)) + 1e-10)
    return x


# ----------------------------------- main ------------------------------------

if __name__ == "__main__":
    key = jax.random.PRNGKey(0)
    k_params, k_x = jax.random.split(key)
    params = init_params(k_params)

    # Five 3x3/stride-2 'valid' convs must reduce the map to 1x1 before the
    # Linear(128, 128), which requires >= 63x63 input; use the standard 64x64.
    B, C, H, W = 2, 3, 64, 64
    x = jax.random.normal(k_x, (B, C, H, W), jnp.float32)

    fwd = jax.jit(forward)
    out = fwd(params, x)
    jax.block_until_ready(out)

    assert out.shape == (B, 128), out.shape
    assert bool(jnp.all(jnp.isfinite(out)))
    print("KERNEL_OK")
</pallas_src>

<mosaic_0001>
module attributes {stable_mosaic.version = 11 : i64} {
  func.func @_input_norm_kernel(%arg0: memref<2x12288xf32, #tpu.memory_space<vmem>>, %arg1: memref<2x12288xf32, #tpu.memory_space<vmem>>) attributes {dimension_semantics = [], scalar_prefetch = 0 : i64, scratch_operands = 0 : i64, tpu.core_type = #tpu.core_type<tc>} {
    %c0 = arith.constant 0 : index
    %c0_0 = arith.constant 0 : index
    %0 = vector.load %arg0[%c0, %c0_0] : memref<2x12288xf32, #tpu.memory_space<vmem>>, vector<2x12288xf32>
    %cst = arith.constant dense<0.000000e+00> : vector<2xf32>
    %1 = vector.multi_reduction <add>, %0, %cst [1] : vector<2x12288xf32> to vector<2xf32>
    %2 = vector.shape_cast %1 : vector<2xf32> to vector<2x1xf32>
    %3 = arith.mulf %0, %0 : vector<2x12288xf32>
    %cst_1 = arith.constant dense<0.000000e+00> : vector<2xf32>
    %4 = vector.multi_reduction <add>, %3, %cst_1 [1] : vector<2x12288xf32> to vector<2xf32>
    %5 = vector.shape_cast %4 : vector<2xf32> to vector<2x1xf32>
    %cst_2 = arith.constant 8.13802107E-5 : f32
    %6 = vector.broadcast %cst_2 : f32 to vector<2x1xf32>
    %7 = arith.mulf %2, %6 : vector<2x1xf32>
    %cst_3 = arith.constant 1.228800e+04 : f32
    %8 = vector.broadcast %cst_3 : f32 to vector<2x1xf32>
    %9 = arith.mulf %8, %7 : vector<2x1xf32>
    %10 = arith.mulf %9, %7 : vector<2x1xf32>
    %11 = arith.subf %5, %10 : vector<2x1xf32>
    %cst_4 = arith.constant 1.228700e+04 : f32
    %12 = vector.broadcast %cst_4 : f32 to vector<2x1xf32>
    %13 = arith.divf %11, %12 : vector<2x1xf32>
    %cst_5 = arith.constant 0.000000e+00 : f32
    %14 = vector.broadcast %cst_5 : f32 to vector<2x1xf32>
    %15 = arith.maximumf %13, %14 : vector<2x1xf32>
    %16 = math.sqrt %15 : vector<2x1xf32>
    %cst_6 = arith.constant 1.000000e-07 : f32
    %17 = vector.broadcast %cst_6 : f32 to vector<2x1xf32>
    %18 = arith.addf %16, %17 : vector<2x1xf32>
    %19 = vector.broadcast %7 : vector<2x1xf32> to vector<2x12288xf32>
    %20 = arith.subf %0, %19 : vector<2x12288xf32>
    %21 = vector.broadcast %18 : vector<2x1xf32> to vector<2x12288xf32>
    %22 = arith.divf %20, %21 : vector<2x12288xf32>
    %c0_7 = arith.constant 0 : index
    %c0_8 = arith.constant 0 : index
    %23 = vector.load %arg1[%c0_7, %c0_8] : memref<2x12288xf32, #tpu.memory_space<vmem>>, vector<2x12288xf32>
    tpu.vector_store %arg1[%c0_7, %c0_8], %22 {strides = array<i32>} : memref<2x12288xf32, #tpu.memory_space<vmem>>, vector<2x12288xf32>,
    return
  }
}

module attributes {stable_mosaic.version = 11 : i64} {
  func.func @_matmul_bias_act_kernel(%arg0: i32, %arg1: memref<512x128xbf16, #tpu.memory_space<vmem>>, %arg2: memref<128x16xbf16, #tpu.memory_space<vmem>>, %arg3: memref<1x16xf32, #tpu.memory_space<vmem>>, %arg4: memref<512x16xf32, #tpu.memory_space<vmem>>) attributes {dimension_semantics = [#tpu.dimension_semantics<parallel>], iteration_bounds = array<i64: 4>, scalar_prefetch = 0 : i64, scratch_operands = 0 : i64, tpu.core_type = #tpu.core_type<tc>, window_params = [{transform_indices = @transform_0, window_bounds = array<i64: 512, 128>}, {pipeline_mode = #tpu.pipeline_mode<synchronous>, transform_indices = @transform_1, window_bounds = array<i64: 128, 16>}, {pipeline_mode = #tpu.pipeline_mode<synchronous>, transform_indices = @transform_2, window_bounds = array<i64: 1, 16>}, {transform_indices = @transform_3, window_bounds = array<i64: 512, 16>}]} {
    %c0 = arith.constant 0 : index
    %c0_0 = arith.constant 0 : index
    %0 = vector.load %arg1[%c0, %c0_0] : memref<512x128xbf16, #tpu.memory_space<vmem>>, vector<512x128xbf16>
    %c0_1 = arith.constant 0 : index
    %c0_2 = arith.constant 0 : index
    %1 = vector.load %arg2[%c0_1, %c0_2] : memref<128x16xbf16, #tpu.memory_space<vmem>>, vector<128x16xbf16>
    %cst = arith.constant dense<0.000000e+00> : vector<512x16xf32>
    %2 = tpu.matmul %0, %1, %cst {dimension_numbers = #tpu.dot_dimension_numbers<[1], [0], [0], [1], [0, 0, 1, 1], [], []>} : vector<512x128xbf16>, vector<128x16xbf16>, vector<512x16xf32> -> vector<512x16xf32>
    %c0_3 = arith.constant 0 : index
    %c0_4 = arith.constant 0 : index
    %3 = vector.load %arg3[%c0_3, %c0_4] : memref<1x16xf32, #tpu.memory_space<vmem>>, vector<1x16xf32>
    %4 = vector.broadcast %3 : vector<1x16xf32> to vector<512x16xf32>
    %5 = arith.addf %2, %4 : vector<512x16xf32>
    %cst_5 = arith.constant 0.000000e+00 : f32
    %6 = vector.broadcast %cst_5 : f32 to vector<512x16xf32>
    %7 = arith.maximumf %5, %6 : vector<512x16xf32>
    %c0_6 = arith.constant 0 : index
    %c0_7 = arith.constant 0 : index
    %8 = vector.load %arg4[%c0_6, %c0_7] : memref<512x16xf32, #tpu.memory_space<vmem>>, vector<512x16xf32>
    tpu.vector_store %arg4[%c0_6, %c0_7], %7 {strides = array<i32>} : memref<512x16xf32, #tpu.memory_space<vmem>>, vector<512x16xf32>,
    return
  }
  func.func @transform_0(%arg0: i32) -> (i32, i32) {
    %c0_i32 = arith.constant 0 : i32
    %c0_i32_0 = arith.constant 0 : i32
    return %arg0, %c0_i32 : i32, i32
  }
  func.func @transform_1(%arg0: i32) -> (i32, i32) {
    %c0_i32 = arith.constant 0 : i32
    %c0_i32_0 = arith.constant 0 : i32
    %c0_i32_1 = arith.constant 0 : i32
    return %c0_i32, %c0_i32_0 : i32, i32
  }
  func.func @transform_2(%arg0: i32) -> (i32, i32) {
    %c0_i32 = arith.constant 0 : i32
    %c0_i32_0 = arith.constant 0 : i32
    %c0_i32_1 = arith.constant 0 : i32
    return %c0_i32, %c0_i32_0 : i32, i32
  }
  func.func @transform_3(%arg0: i32) -> (i32, i32) {
    %c0_i32 = arith.constant 0 : i32
    %c0_i32_0 = arith.constant 0 : i32
    return %arg0, %c0_i32 : i32, i32
  }
}

module attributes {stable_mosaic.version = 11 : i64} {
  func.func @_matmul_bias_act_kernel(%arg0: i32, %arg1: memref<456x256xbf16, #tpu.memory_space<vmem>>, %arg2: memref<256x32xbf16, #tpu.memory_space<vmem>>, %arg3: memref<1x32xf32, #tpu.memory_space<vmem>>, %arg4: memref<456x32xf32, #tpu.memory_space<vmem>>) attributes {dimension_semantics = [#tpu.dimension_semantics<parallel>], iteration_bounds = array<i64: 1>, scalar_prefetch = 0 : i64, scratch_operands = 0 : i64, tpu.core_type = #tpu.core_type<tc>, window_params = [{transform_indices = @transform_0, window_bounds = array<i64: 456, 256>}, {pipeline_mode = #tpu.pipeline_mode<synchronous>, transform_indices = @transform_1, window_bounds = array<i64: 256, 32>}, {pipeline_mode = #tpu.pipeline_mode<synchronous>, transform_indices = @transform_2, window_bounds = array<i64: 1, 32>}, {transform_indices = @transform_3, window_bounds = array<i64: 456, 32>}]} {
    %c0 = arith.constant 0 : index
    %c0_0 = arith.constant 0 : index
    %0 = vector.load %arg1[%c0, %c0_0] : memref<456x256xbf16, #tpu.memory_space<vmem>>, vector<456x256xbf16>
    %c0_1 = arith.constant 0 : index
    %c0_2 = arith.constant 0 : index
    %1 = vector.load %arg2[%c0_1, %c0_2] : memref<256x32xbf16, #tpu.memory_space<vmem>>, vector<256x32xbf16>
    %cst = arith.constant dense<0.000000e+00> : vector<456x32xf32>
    %2 = tpu.matmul %0, %1, %cst {dimension_numbers = #tpu.dot_dimension_numbers<[1], [0], [0], [1], [0, 0, 1, 1], [], []>} : vector<456x256xbf16>, vector<256x32xbf16>, vector<456x32xf32> -> vector<456x32xf32>
    %c0_3 = arith.constant 0 : index
    %c0_4 = arith.constant 0 : index
    %3 = vector.load %arg3[%c0_3, %c0_4] : memref<1x32xf32, #tpu.memory_space<vmem>>, vector<1x32xf32>
    %4 = vector.broadcast %3 : vector<1x32xf32> to vector<456x32xf32>
    %5 = arith.addf %2, %4 : vector<456x32xf32>
    %cst_5 = arith.constant 0.000000e+00 : f32
    %6 = vector.broadcast %cst_5 : f32 to vector<456x32xf32>
    %7 = arith.maximumf %5, %6 : vector<456x32xf32>
    %c0_6 = arith.constant 0 : index
    %c0_7 = arith.constant 0 : index
    %8 = vector.load %arg4[%c0_6, %c0_7] : memref<456x32xf32, #tpu.memory_space<vmem>>, vector<456x32xf32>
    tpu.vector_store %arg4[%c0_6, %c0_7], %7 {strides = array<i32>} : memref<456x32xf32, #tpu.memory_space<vmem>>, vector<456x32xf32>,
    return
  }
  func.func @transform_0(%arg0: i32) -> (i32, i32) {
    %c0_i32 = arith.constant 0 : i32
    %c0_i32_0 = arith.constant 0 : i32
    return %arg0, %c0_i32 : i32, i32
  }
  func.func @transform_1(%arg0: i32) -> (i32, i32) {
    %c0_i32 = arith.constant 0 : i32
    %c0_i32_0 = arith.constant 0 : i32
    %c0_i32_1 = arith.constant 0 : i32
    return %c0_i32, %c0_i32_0 : i32, i32
  }
  func.func @transform_2(%arg0: i32) -> (i32, i32) {
    %c0_i32 = arith.constant 0 : i32
    %c0_i32_0 = arith.constant 0 : i32
    %c0_i32_1 = arith.constant 0 : i32
    return %c0_i32, %c0_i32_0 : i32, i32
  }
  func.func @transform_3(%arg0: i32) -> (i32, i32) {
    %c0_i32 = arith.constant 0 : i32
    %c0_i32_0 = arith.constant 0 : i32
    return %arg0, %c0_i32 : i32, i32
  }
}

module attributes {stable_mosaic.version = 11 : i64} {
  func.func @_matmul_bias_act_kernel(%arg0: i32, %arg1: memref<104x384xbf16, #tpu.memory_space<vmem>>, %arg2: memref<384x64xbf16, #tpu.memory_space<vmem>>, %arg3: memref<1x64xf32, #tpu.memory_space<vmem>>, %arg4: memref<104x64xf32, #tpu.memory_space<vmem>>) attributes {dimension_semantics = [#tpu.dimension_semantics<parallel>], iteration_bounds = array<i64: 1>, scalar_prefetch = 0 : i64, scratch_operands = 0 : i64, tpu.core_type = #tpu.core_type<tc>, window_params = [{transform_indices = @transform_0, window_bounds = array<i64: 104, 384>}, {pipeline_mode = #tpu.pipeline_mode<synchronous>, transform_indices = @transform_1, window_bounds = array<i64: 384, 64>}, {pipeline_mode = #tpu.pipeline_mode<synchronous>, transform_indices = @transform_2, window_bounds = array<i64: 1, 64>}, {transform_indices = @transform_3, window_bounds = array<i64: 104, 64>}]} {
    %c0 = arith.constant 0 : index
    %c0_0 = arith.constant 0 : index
    %0 = vector.load %arg1[%c0, %c0_0] : memref<104x384xbf16, #tpu.memory_space<vmem>>, vector<104x384xbf16>
    %c0_1 = arith.constant 0 : index
    %c0_2 = arith.constant 0 : index
    %1 = vector.load %arg2[%c0_1, %c0_2] : memref<384x64xbf16, #tpu.memory_space<vmem>>, vector<384x64xbf16>
    %cst = arith.constant dense<0.000000e+00> : vector<104x64xf32>
    %2 = tpu.matmul %0, %1, %cst {dimension_numbers = #tpu.dot_dimension_numbers<[1], [0], [0], [1], [0, 0, 1, 1], [], []>} : vector<104x384xbf16>, vector<384x64xbf16>, vector<104x64xf32> -> vector<104x64xf32>
    %c0_3 = arith.constant 0 : index
    %c0_4 = arith.constant 0 : index
    %3 = vector.load %arg3[%c0_3, %c0_4] : memref<1x64xf32, #tpu.memory_space<vmem>>, vector<1x64xf32>
    %4 = vector.broadcast %3 : vector<1x64xf32> to vector<104x64xf32>
    %5 = arith.addf %2, %4 : vector<104x64xf32>
    %cst_5 = arith.constant 0.000000e+00 : f32
    %6 = vector.broadcast %cst_5 : f32 to vector<104x64xf32>
    %7 = arith.maximumf %5, %6 : vector<104x64xf32>
    %c0_6 = arith.constant 0 : index
    %c0_7 = arith.constant 0 : index
    %8 = vector.load %arg4[%c0_6, %c0_7] : memref<104x64xf32, #tpu.memory_space<vmem>>, vector<104x64xf32>
    tpu.vector_store %arg4[%c0_6, %c0_7], %7 {strides = array<i32>} : memref<104x64xf32, #tpu.memory_space<vmem>>, vector<104x64xf32>,
    return
  }
  func.func @transform_0(%arg0: i32) -> (i32, i32) {
    %c0_i32 = arith.constant 0 : i32
    %c0_i32_0 = arith.constant 0 : i32
    return %arg0, %c0_i32 : i32, i32
  }
  func.func @transform_1(%arg0: i32) -> (i32, i32) {
    %c0_i32 = arith.constant 0 : i32
    %c0_i32_0 = arith.constant 0 : i32
    %c0_i32_1 = arith.constant 0 : i32
    return %c0_i32, %c0_i32_0 : i32, i32
  }
  func.func @transform_2(%arg0: i32) -> (i32, i32) {
    %c0_i32 = arith.constant 0 : i32
    %c0_i32_0 = arith.constant 0 : i32
    %c0_i32_1 = arith.constant 0 : i32
    return %c0_i32, %c0_i32_0 : i32, i32
  }
  func.func @transform_3(%arg0: i32) -> (i32, i32) {
    %c0_i32 = arith.constant 0 : i32
    %c0_i32_0 = arith.constant 0 : i32
    return %arg0, %c0_i32 : i32, i32
  }
}

module attributes {stable_mosaic.version = 11 : i64} {
  func.func @_matmul_bias_act_kernel(%arg0: i32, %arg1: memref<24x640xbf16, #tpu.memory_space<vmem>>, %arg2: memref<640x128xbf16, #tpu.memory_space<vmem>>, %arg3: memref<1x128xf32, #tpu.memory_space<vmem>>, %arg4: memref<24x128xf32, #tpu.memory_space<vmem>>) attributes {dimension_semantics = [#tpu.dimension_semantics<parallel>], iteration_bounds = array<i64: 1>, scalar_prefetch = 0 : i64, scratch_operands = 0 : i64, tpu.core_type = #tpu.core_type<tc>, window_params = [{transform_indices = @transform_0, window_bounds = array<i64: 24, 640>}, {pipeline_mode = #tpu.pipeline_mode<synchronous>, transform_indices = @transform_1, window_bounds = array<i64: 640, 128>}, {pipeline_mode = #tpu.pipeline_mode<synchronous>, transform_indices = @transform_2, window_bounds = array<i64: 1, 128>}, {transform_indices = @transform_3, window_bounds = array<i64: 24, 128>}]} {
    %c0 = arith.constant 0 : index
    %c0_0 = arith.constant 0 : index
    %0 = vector.load %arg1[%c0, %c0_0] : memref<24x640xbf16, #tpu.memory_space<vmem>>, vector<24x640xbf16>
    %c0_1 = arith.constant 0 : index
    %c0_2 = arith.constant 0 : index
    %1 = vector.load %arg2[%c0_1, %c0_2] : memref<640x128xbf16, #tpu.memory_space<vmem>>, vector<640x128xbf16>
    %cst = arith.constant dense<0.000000e+00> : vector<24x128xf32>
    %2 = tpu.matmul %0, %1, %cst {dimension_numbers = #tpu.dot_dimension_numbers<[1], [0], [0], [1], [0, 0, 1, 1], [], []>} : vector<24x640xbf16>, vector<640x128xbf16>, vector<24x128xf32> -> vector<24x128xf32>
    %c0_3 = arith.constant 0 : index
    %c0_4 = arith.constant 0 : index
    %3 = vector.load %arg3[%c0_3, %c0_4] : memref<1x128xf32, #tpu.memory_space<vmem>>, vector<1x128xf32>
    %4 = vector.broadcast %3 : vector<1x128xf32> to vector<24x128xf32>
    %5 = arith.addf %2, %4 : vector<24x128xf32>
    %cst_5 = arith.constant 0.000000e+00 : f32
    %6 = vector.broadcast %cst_5 : f32 to vector<24x128xf32>
    %7 = arith.maximumf %5, %6 : vector<24x128xf32>
    %c0_6 = arith.constant 0 : index
    %c0_7 = arith.constant 0 : index
    %8 = vector.load %arg4[%c0_6, %c0_7] : memref<24x128xf32, #tpu.memory_space<vmem>>, vector<24x128xf32>
    tpu.vector_store %arg4[%c0_6, %c0_7], %7 {strides = array<i32>} : memref<24x128xf32, #tpu.memory_space<vmem>>, vector<24x128xf32>,
    return
  }
  func.func @transform_0(%arg0: i32) -> (i32, i32) {
    %c0_i32 = arith.constant 0 : i32
    %c0_i32_0 = arith.constant 0 : i32
    return %arg0, %c0_i32 : i32, i32
  }
  func.func @transform_1(%arg0: i32) -> (i32, i32) {
    %c0_i32 = arith.constant 0 : i32
    %c0_i32_0 = arith.constant 0 : i32
    %c0_i32_1 = arith.constant 0 : i32
    return %c0_i32, %c0_i32_0 : i32, i32
  }
  func.func @transform_2(%arg0: i32) -> (i32, i32) {
    %c0_i32 = arith.constant 0 : i32
    %c0_i32_0 = arith.constant 0 : i32
    %c0_i32_1 = arith.constant 0 : i32
    return %c0_i32, %c0_i32_0 : i32, i32
  }
  func.func @transform_3(%arg0: i32) -> (i32, i32) {
    %c0_i32 = arith.constant 0 : i32
    %c0_i32_0 = arith.constant 0 : i32
    return %arg0, %c0_i32 : i32, i32
  }
}

module attributes {stable_mosaic.version = 11 : i64} {
  func.func @_matmul_bias_act_kernel(%arg0: i32, %arg1: memref<8x1152xbf16, #tpu.memory_space<vmem>>, %arg2: memref<1152x128xbf16, #tpu.memory_space<vmem>>, %arg3: memref<1x128xf32, #tpu.memory_space<vmem>>, %arg4: memref<8x128xf32, #tpu.memory_space<vmem>>) attributes {dimension_semantics = [#tpu.dimension_semantics<parallel>], iteration_bounds = array<i64: 1>, scalar_prefetch = 0 : i64, scratch_operands = 0 : i64, tpu.core_type = #tpu.core_type<tc>, window_params = [{transform_indices = @transform_0, window_bounds = array<i64: 8, 1152>}, {pipeline_mode = #tpu.pipeline_mode<synchronous>, transform_indices = @transform_1, window_bounds = array<i64: 1152, 128>}, {pipeline_mode = #tpu.pipeline_mode<synchronous>, transform_indices = @transform_2, window_bounds = array<i64: 1, 128>}, {transform_indices = @transform_3, window_bounds = array<i64: 8, 128>}]} {
    %c0 = arith.constant 0 : index
    %c0_0 = arith.constant 0 : index
    %0 = vector.load %arg1[%c0, %c0_0] : memref<8x1152xbf16, #tpu.memory_space<vmem>>, vector<8x1152xbf16>
    %c0_1 = arith.constant 0 : index
    %c0_2 = arith.constant 0 : index
    %1 = vector.load %arg2[%c0_1, %c0_2] : memref<1152x128xbf16, #tpu.memory_space<vmem>>, vector<1152x128xbf16>
    %cst = arith.constant dense<0.000000e+00> : vector<8x128xf32>
    %2 = tpu.matmul %0, %1, %cst {dimension_numbers = #tpu.dot_dimension_numbers<[1], [0], [0], [1], [0, 0, 1, 1], [], []>} : vector<8x1152xbf16>, vector<1152x128xbf16>, vector<8x128xf32> -> vector<8x128xf32>
    %c0_3 = arith.constant 0 : index
    %c0_4 = arith.constant 0 : index
    %3 = vector.load %arg3[%c0_3, %c0_4] : memref<1x128xf32, #tpu.memory_space<vmem>>, vector<1x128xf32>
    %4 = vector.broadcast %3 : vector<1x128xf32> to vector<8x128xf32>
    %5 = arith.addf %2, %4 : vector<8x128xf32>
    %cst_5 = arith.constant 0.000000e+00 : f32
    %6 = vector.broadcast %cst_5 : f32 to vector<8x128xf32>
    %7 = arith.maximumf %5, %6 : vector<8x128xf32>
    %c0_6 = arith.constant 0 : index
    %c0_7 = arith.constant 0 : index
    %8 = vector.load %arg4[%c0_6, %c0_7] : memref<8x128xf32, #tpu.memory_space<vmem>>, vector<8x128xf32>
    tpu.vector_store %arg4[%c0_6, %c0_7], %7 {strides = array<i32>} : memref<8x128xf32, #tpu.memory_space<vmem>>, vector<8x128xf32>,
    return
  }
  func.func @transform_0(%arg0: i32) -> (i32, i32) {
    %c0_i32 = arith.constant 0 : i32
    %c0_i32_0 = arith.constant 0 : i32
    return %arg0, %c0_i32 : i32, i32
  }
  func.func @transform_1(%arg0: i32) -> (i32, i32) {
    %c0_i32 = arith.constant 0 : i32
    %c0_i32_0 = arith.constant 0 : i32
    %c0_i32_1 = arith.constant 0 : i32
    return %c0_i32, %c0_i32_0 : i32, i32
  }
  func.func @transform_2(%arg0: i32) -> (i32, i32) {
    %c0_i32 = arith.constant 0 : i32
    %c0_i32_0 = arith.constant 0 : i32
    %c0_i32_1 = arith.constant 0 : i32
    return %c0_i32, %c0_i32_0 : i32, i32
  }
  func.func @transform_3(%arg0: i32) -> (i32, i32) {
    %c0_i32 = arith.constant 0 : i32
    %c0_i32_0 = arith.constant 0 : i32
    return %arg0, %c0_i32 : i32, i32
  }
}

module attributes {stable_mosaic.version = 11 : i64} {
  func.func @_matmul_bias_act_kernel(%arg0: i32, %arg1: memref<8x128xbf16, #tpu.memory_space<vmem>>, %arg2: memref<128x128xbf16, #tpu.memory_space<vmem>>, %arg3: memref<1x128xf32, #tpu.memory_space<vmem>>, %arg4: memref<8x128xf32, #tpu.memory_space<vmem>>) attributes {dimension_semantics = [#tpu.dimension_semantics<parallel>], iteration_bounds = array<i64: 1>, scalar_prefetch = 0 : i64, scratch_operands = 0 : i64, tpu.core_type = #tpu.core_type<tc>, window_params = [{transform_indices = @transform_0, window_bounds = array<i64: 8, 128>}, {pipeline_mode = #tpu.pipeline_mode<synchronous>, transform_indices = @transform_1, window_bounds = array<i64: 128, 128>}, {pipeline_mode = #tpu.pipeline_mode<synchronous>, transform_indices = @transform_2, window_bounds = array<i64: 1, 128>}, {transform_indices = @transform_3, window_bounds = array<i64: 8, 128>}]} {
    %c0 = arith.constant 0 : index
    %c0_0 = arith.constant 0 : index
    %0 = vector.load %arg1[%c0, %c0_0] : memref<8x128xbf16, #tpu.memory_space<vmem>>, vector<8x128xbf16>
    %c0_1 = arith.constant 0 : index
    %c0_2 = arith.constant 0 : index
    %1 = vector.load %arg2[%c0_1, %c0_2] : memref<128x128xbf16, #tpu.memory_space<vmem>>, vector<128x128xbf16>
    %cst = arith.constant dense<0.000000e+00> : vector<8x128xf32>
    %2 = tpu.matmul %0, %1, %cst {dimension_numbers = #tpu.dot_dimension_numbers<[1], [0], [0], [1], [0, 0, 1, 1], [], []>} : vector<8x128xbf16>, vector<128x128xbf16>, vector<8x128xf32> -> vector<8x128xf32>
    %c0_3 = arith.constant 0 : index
    %c0_4 = arith.constant 0 : index
    %3 = vector.load %arg3[%c0_3, %c0_4] : memref<1x128xf32, #tpu.memory_space<vmem>>, vector<1x128xf32>
    %4 = vector.broadcast %3 : vector<1x128xf32> to vector<8x128xf32>
    %5 = arith.addf %2, %4 : vector<8x128xf32>
    %c0_5 = arith.constant 0 : index
    %c0_6 = arith.constant 0 : index
    %6 = vector.load %arg4[%c0_5, %c0_6] : memref<8x128xf32, #tpu.memory_space<vmem>>, vector<8x128xf32>
    tpu.vector_store %arg4[%c0_5, %c0_6], %5 {strides = array<i32>} : memref<8x128xf32, #tpu.memory_space<vmem>>, vector<8x128xf32>,
    return
  }
  func.func @transform_0(%arg0: i32) -> (i32, i32) {
    %c0_i32 = arith.constant 0 : i32
    %c0_i32_0 = arith.constant 0 : i32
    return %arg0, %c0_i32 : i32, i32
  }
  func.func @transform_1(%arg0: i32) -> (i32, i32) {
    %c0_i32 = arith.constant 0 : i32
    %c0_i32_0 = arith.constant 0 : i32
    %c0_i32_1 = arith.constant 0 : i32
    return %c0_i32, %c0_i32_0 : i32, i32
  }
  func.func @transform_2(%arg0: i32) -> (i32, i32) {
    %c0_i32 = arith.constant 0 : i32
    %c0_i32_0 = arith.constant 0 : i32
    %c0_i32_1 = arith.constant 0 : i32
    return %c0_i32, %c0_i32_0 : i32, i32
  }
  func.func @transform_3(%arg0: i32) -> (i32, i32) {
    %c0_i32 = arith.constant 0 : i32
    %c0_i32_0 = arith.constant 0 : i32
    return %arg0, %c0_i32 : i32, i32
  }
}

</mosaic_0001>

<bundles_post_ra>
// kernel: forward.7
= control target key start
LH: loop header
LB: loop body
LE: loop exit
PB: predicated region body
PF: predicated region fallthrough
CT: control target
= control target key end

     0   :  { %v1652_v0 = vmov 1983009808   ;;  %v60_v2 = vlaneseq  ;;  %vm560_vm0 = vcmask 1041408   ;;  %s2346_s0 = inlined_call_operand.vmem [shape: f32[2,12288], index: 0, kind: input, shape index: {}]   ;;  %s2347_s1 = inlined_call_operand.vmem [shape: f32[2,12288], index: 1, kind: output, shape index: {}]  }
   0x1   :  { %v58_v1 = vunpack.c.l.s4 %v1652_v0  ;;  %v1672_v6 = vld [vmem:[%s2346_s0] sm:$0xff]  ;;  %v1682_v10 = vld [vmem:[%s2346_s0 + $0x8] sm:$0xff]  ;;  %v1696_v22 = vld [vmem:[%s2346_s0 + $0x10] sm:$0xff] }
   0x2   :  { %v1664_v4 = vshrl.u32 %v60_v2, 7  ;;  %v56_v7 = vcombine.high %v1672_v6, %v1672_v6  ;;  %v73_v13 = vcombine.high %v1682_v10, %v1682_v10  ;;  %v90_v27 = vcombine.high %v1696_v22, %v1696_v22  ;;  %v1710_v36 = vld [vmem:[%s2346_s0 + $0x18] sm:$0xff]  ;;  %v1724_v50 = vld [vmem:[%s2346_s0 + $0x20] sm:$0xff]  ;;  %v1738_v0 = vld [vmem:[%s2346_s0 + $0x28] sm:$0xff] }
   0x3   :  { %v59_v3 = vunpack.c.0.s8 %v58_v1  ;;  %v107_v41 = vcombine.high %v1710_v36, %v1710_v36  ;;  %v124_v55 = vcombine.high %v1724_v50, %v1724_v50 }
   0x5   :  { %v1667_v5 = vsub.s32 %v59_v3, %v1664_v4 }
   0x7   :  { %v63_v8 = vrot.slane %v1672_v6, %v1667_v5  ;;  %v70_v9 = vrot.slane %v56_v7, %v1667_v5  ;;  %v80_v14 = vrot.slane %v1682_v10, %v1667_v5  ;;  %v87_v19 = vrot.slane %v73_v13, %v1667_v5 }
   0x8   :  { %v97_v28 = vrot.slane %v1696_v22, %v1667_v5  ;;  %v104_v33 = vrot.slane %v90_v27, %v1667_v5  ;;  %v114_v42 = vrot.slane %v1710_v36, %v1667_v5  ;;  %v121_v47 = vrot.slane %v107_v41, %v1667_v5 }
   0x9   :  { %v71_v11 = vcombine.high %v63_v8, %v63_v8  ;;  %v72_v12 = vcombine.high %v70_v9, %v70_v9  ;;  %v561_v15 = vsel %vm560_vm0, %v63_v8, 0.0  ;;  %v564_v17 = vsel %vm560_vm0, %v70_v9, 0.0 }
   0xa   :  { %v88_v20 = vcombine.high %v80_v14, %v80_v14  ;;  %v568_v24 = vsel %vm560_vm0, %v80_v14, 0.0  ;;  %v89_v26 = vcombine.high %v87_v19, %v87_v19  ;;  %v572_v31 = vsel %vm560_vm0, %v87_v19, 0.0 }
   0xb   :  { %v562_v16 = vsel %vm560_vm0, %v71_v11, 0.0  ;;  %v566_v21 = vsel %vm560_vm0, %v72_v12, 0.0  ;;  %v105_v34 = vcombine.high %v97_v28, %v97_v28  ;;  %v576_v38 = vsel %vm560_vm0, %v97_v28, 0.0 }
   0xc   :  { %v563_v18 = vadd.f32 %v562_v16, %v561_v15  ;;  %v570_v29 = vsel %vm560_vm0, %v88_v20, 0.0  ;;  %v574_v35 = vsel %vm560_vm0, %v89_v26, 0.0  ;;  %v106_v40 = vcombine.high %v104_v33, %v104_v33 }
   0xd   :  { %v578_v43 = vsel %vm560_vm0, %v105_v34, 0.0  ;;  %v580_v45 = vsel %vm560_vm0, %v104_v33, 0.0  ;;  %v122_v48 = vcombine.high %v114_v42, %v114_v42  ;;  %v584_v52 = vsel %vm560_vm0, %v114_v42, 0.0  ;;  %v1766_v33 = vld [vmem:[%s2346_s0 + $0x38] sm:$0xff] }
   0xe   :  { %v565_v23 = vadd.f32 %v564_v17, %v563_v18  ;;  %v582_v49 = vsel %vm560_vm0, %v106_v40, 0.0  ;;  %v123_v54 = vcombine.high %v121_v47, %v121_v47  ;;  %v131_v56 = vrot.slane %v1724_v50, %v1667_v5  ;;  %v1752_v18 = vld [vmem:[%s2346_s0 + $0x30] sm:$0xff] }
   0xf   :  { %v586_v57 = vsel %vm560_vm0, %v122_v48, 0.0  ;;  %v588_v59 = vsel %vm560_vm0, %v121_v47, 0.0  ;;  %v138_v61 = vrot.slane %v124_v55, %v1667_v5  ;;  %v141_v8 = vcombine.high %v1738_v0, %v1738_v0  ;;  %v1780_v48 = vld [vmem:[%s2346_s0 + $0x40] sm:$0xff] }
  0x10   :  { %v567_v25 = vadd.f32 %v566_v21, %v565_v23  ;;  %v139_v62 = vcombine.high %v131_v56, %v131_v56  ;;  %v590_v63 = vsel %vm560_vm0, %v123_v54, 0.0  ;;  %v592_v2 = vsel %vm560_vm0, %v131_v56, 0.0 }
  0x11   :  { %v140_v7 = vcombine.high %v138_v61, %v138_v61  ;;  %v148_v9 = vrot.slane %v1738_v0, %v1667_v5  ;;  %v596_v13 = vsel %vm560_vm0, %v138_v61, 0.0  ;;  %v155_v15 = vrot.slane %v141_v8, %v1667_v5 }
  0x12   :  { %v569_v30 = vadd.f32 %v568_v24, %v567_v25  ;;  %v594_v11 = vsel %vm560_vm0, %v139_v62, 0.0  ;;  %v158_v24 = vcombine.high %v1752_v18, %v1752_v18  ;;  %v165_v25 = vrot.slane %v1752_v18, %v1667_v5  ;;  %v1795_v62 = vld [vmem:[%s2346_s0 + $0x48] sm:$0xff] }
  0x13   :  { %v156_v16 = vcombine.high %v148_v9, %v148_v9  ;;  %v598_v17 = vsel %vm560_vm0, %v140_v7, 0.0  ;;  %v600_v20 = vsel %vm560_vm0, %v148_v9, 0.0  ;;  %v157_v23 = vcombine.high %v155_v15, %v155_v15 }
  0x14   :  { %v571_v32 = vadd.f32 %v570_v29, %v569_v30  ;;  %v604_v28 = vsel %vm560_vm0, %v155_v15, 0.0  ;;  %v172_v30 = vrot.slane %v158_v24, %v1667_v5  ;;  %v182_v40 = vrot.slane %v1766_v33, %v1667_v5 }
  0x15   :  { %v602_v26 = vsel %vm560_vm0, %v156_v16, 0.0  ;;  %v199_v55 = vrot.slane %v1780_v48, %v1667_v5 }
  0x16   :  { %v573_v37 = vadd.f32 %v572_v31, %v571_v32  ;;  %v173_v31 = vcombine.high %v165_v25, %v165_v25  ;;  %v606_v32 = vsel %vm560_vm0, %v157_v23, 0.0 }
  0x17   :  { %v624_v7 = vsel %vm560_vm0, %v199_v55, 0.0 }
  0x18   :  { %v575_v39 = vadd.f32 %v574_v35, %v573_v37  ;;  %v608_v35 = vsel %vm560_vm0, %v165_v25, 0.0  ;;  %v610_v41 = vsel %vm560_vm0, %v173_v31, 0.0 }
  0x1a   :  { %v577_v44 = vadd.f32 %v576_v38, %v575_v39  ;;  %v174_v38 = vcombine.high %v172_v30, %v172_v30  ;;  %v175_v39 = vcombine.high %v1766_v33, %v1766_v33 }
  0x1c   :  { %v579_v46 = vadd.f32 %v578_v43, %v577_v44  ;;  %v612_v43 = vsel %vm560_vm0, %v172_v30, 0.0  ;;  %v614_v47 = vsel %vm560_vm0, %v174_v38, 0.0 }
  0x1e   :  { %v581_v51 = vadd.f32 %v580_v45, %v579_v46  ;;  %v189_v45 = vrot.slane %v175_v39, %v1667_v5  ;;  %v190_v46 = vcombine.high %v182_v40, %v182_v40 }
  0x20   :  { %v583_v53 = vadd.f32 %v582_v49, %v581_v51  ;;  %v616_v51 = vsel %vm560_vm0, %v182_v40, 0.0  ;;  %v191_v54 = vcombine.high %v189_v45, %v189_v45  ;;  %v618_v56 = vsel %vm560_vm0, %v190_v46, 0.0 }
  0x22   :  { %v585_v58 = vadd.f32 %v584_v52, %v583_v53  ;;  %v192_v52 = vcombine.high %v1780_v48, %v1780_v48 }
  0x24   :  { %v587_v60 = vadd.f32 %v586_v57, %v585_v58  ;;  %v620_v58 = vsel %vm560_vm0, %v189_v45, 0.0 }
  0x26   :  { %v589_v1 = vadd.f32 %v588_v59, %v587_v60  ;;  %v754_v59 = vmul.f32 %v1672_v6, %v1672_v6  ;;  %v206_v60 = vrot.slane %v192_v52, %v1667_v5  ;;  %v209_v6 = vcombine.high %v1795_v62, %v1795_v62  ;;  %v1836_v52 = vld [vmem:[%s2346_s0 + $0x58] sm:$0xff] }
  0x28   :  { %v591_v3 = vadd.f32 %v590_v63, %v589_v1  ;;  %v207_v63 = vcombine.high %v199_v55, %v199_v55  ;;  %v622_v1 = vsel %vm560_vm0, %v191_v54, 0.0  ;;  %v809_v8 = vrot.slane %v754_v59, %v1667_v5 }
  0x29   :  { %v208_v9 = vcombine.high %v206_v60, %v206_v60 }
  0x2a   :  { %v593_v12 = vadd.f32 %v592_v2, %v591_v3  ;;  %v802_v2 = vcombine.high %v754_v59, %v754_v59 }
  0x2b   :  { %v630_v25 = vsel %vm560_vm0, %v208_v9, 0.0 }
  0x2c   :  { %v595_v14 = vadd.f32 %v594_v11, %v593_v12  ;;  %v216_v11 = vrot.slane %v1795_v62, %v1667_v5  ;;  %v816_v15 = vrot.slane %v802_v2, %v1667_v5 }
  0x2e   :  { %v597_v19 = vadd.f32 %v596_v13, %v595_v14  ;;  %v626_v13 = vsel %vm560_vm0, %v207_v63, 0.0  ;;  %v755_v14 = vmul.f32 %v1682_v10, %v1682_v10  ;;  %v224_v23 = vcombine.high %v216_v11, %v216_v11 }
  0x2f   :  { %v243_v63 = vcombine.high %v1836_v52, %v1836_v52 }
  0x30   :  { %v599_v21 = vadd.f32 %v598_v17, %v597_v19  ;;  %v628_v17 = vsel %vm560_vm0, %v206_v60, 0.0  ;;  %v817_v19 = vcombine.high %v809_v8, %v809_v8  ;;  %v826_v10 = vrot.slane %v755_v14, %v1667_v5 }
  0x31   :  { %v634_v39 = vsel %vm560_vm0, %v224_v23, 0.0 }
  0x32   :  { %v601_v27 = vadd.f32 %v600_v20, %v599_v21  ;;  %v1812_v20 = vld [vmem:[%s2346_s0 + $0x50] sm:$0xff]  ;;  %v223_v21 = vrot.slane %v209_v6, %v1667_v5 }
  0x33   :  { %v233_v31 = vrot.slane %v1812_v20, %v1667_v5 }
  0x34   :  { %v603_v29 = vadd.f32 %v602_v26, %v601_v27  ;;  %v818_v26 = vcombine.high %v816_v15, %v816_v15  ;;  %v819_v27 = vcombine.high %v755_v14, %v755_v14 }
  0x35   :  { %v640_v2 = vsel %vm560_vm0, %v233_v31, 0.0 }
  0x36   :  { %v605_v34 = vadd.f32 %v604_v28, %v603_v29  ;;  %v1306_v28 = vsel %vm560_vm0, %v809_v8, 0.0  ;;  %v226_v29 = vcombine.high %v1812_v20, %v1812_v20 }
  0x38   :  { %v607_v37 = vadd.f32 %v606_v32, %v605_v34  ;;  %v632_v32 = vsel %vm560_vm0, %v216_v11, 0.0  ;;  %v1307_v34 = vsel %vm560_vm0, %v817_v19, 0.0  ;;  %v757_v11 = vmul.f32 %v1710_v36, %v1710_v36  ;;  %v1859_v36 = vld [vmem:[%s2346_s0 + $0x60] sm:$0xff] }
  0x39   :  { %v1308_v40 = vadd.f32 %v1307_v34, %v1306_v28  ;;  %v260_v34 = vcombine.high %v1859_v36, %v1859_v36 }
  0x3a   :  { %v609_v42 = vadd.f32 %v608_v35, %v607_v37  ;;  %v1309_v35 = vsel %vm560_vm0, %v816_v15, 0.0  ;;  %v225_v37 = vcombine.high %v223_v21, %v223_v21  ;;  %v860_v28 = vrot.slane %v757_v11, %v1667_v5 }
  0x3b   :  { %v1310_v46 = vadd.f32 %v1309_v35, %v1308_v40 }
  0x3c   :  { %v611_v44 = vadd.f32 %v610_v41, %v609_v42  ;;  %v756_v41 = vmul.f32 %v1696_v22, %v1696_v22  ;;  %v833_v42 = vrot.slane %v819_v27, %v1667_v5  ;;  %v638_v54 = vsel %vm560_vm0, %v225_v37, 0.0 }
  0x3e   :  { %v613_v49 = vadd.f32 %v612_v43, %v611_v44  ;;  %v834_v43 = vcombine.high %v826_v10, %v826_v10  ;;  %v1311_v44 = vsel %vm560_vm0, %v818_v26, 0.0 }
  0x3f   :  { %v1312_v55 = vadd.f32 %v1311_v44, %v1310_v46  ;;  %v868_v44 = vcombine.high %v860_v28, %v860_v28 }
  0x40   :  { %v615_v53 = vadd.f32 %v614_v47, %v613_v49  ;;  %v240_v47 = vrot.slane %v226_v29, %v1667_v5  ;;  %v636_v49 = vsel %vm560_vm0, %v223_v21, 0.0  ;;  %v1315_v59 = vsel %vm560_vm0, %v834_v43, 0.0 }
  0x42   :  { %v617_v57 = vadd.f32 %v616_v51, %v615_v53  ;;  %v1313_v51 = vsel %vm560_vm0, %v826_v10, 0.0  ;;  %v241_v53 = vcombine.high %v233_v31, %v233_v31  ;;  %v644_v19 = vsel %vm560_vm0, %v240_v47, 0.0 }
  0x43   :  { %v853_v10 = vcombine.high %v757_v11, %v757_v11 }
  0x44   :  { %v619_v61 = vadd.f32 %v618_v56, %v617_v57  ;;  %v835_v56 = vcombine.high %v833_v42, %v833_v42  ;;  %v836_v57 = vcombine.high %v756_v41, %v756_v41  ;;  %v642_v9 = vsel %vm560_vm0, %v241_v53, 0.0 }
  0x45   :  { %v867_v43 = vrot.slane %v853_v10, %v1667_v5  ;;  %v1329_v53 = vsel %vm560_vm0, %v860_v28, 0.0 }
  0x46   :  { %v621_v3 = vadd.f32 %v620_v58, %v619_v61  ;;  %v843_v58 = vrot.slane %v756_v41, %v1667_v5  ;;  %v1314_v61 = vadd.f32 %v1313_v51, %v1312_v55  ;;  %v1319_v14 = vsel %vm560_vm0, %v835_v56, 0.0 }
  0x48   :  { %v623_v12 = vadd.f32 %v622_v1, %v621_v3  ;;  %v250_v1 = vrot.slane %v1836_v52, %v1667_v5  ;;  %v1317_v3 = vsel %vm560_vm0, %v833_v42, 0.0  ;;  %v1316_v6 = vadd.f32 %v1315_v59, %v1314_v61 }
  0x49   :  { %v1321_v21 = vsel %vm560_vm0, %v843_v58, 0.0  ;;  %v758_v42 = vmul.f32 %v1724_v50, %v1724_v50 }
  0x4a   :  { %v625_v16 = vadd.f32 %v624_v7, %v623_v12  ;;  %v242_v7 = vcombine.high %v240_v47, %v240_v47  ;;  %v850_v12 = vrot.slane %v836_v57, %v1667_v5  ;;  %v258_v23 = vcombine.high %v250_v1, %v250_v1 }
  0x4b   :  { %v648_v35 = vsel %vm560_vm0, %v250_v1, 0.0  ;;  %v869_v57 = vcombine.high %v867_v43, %v867_v43  ;;  %v877_v59 = vrot.slane %v758_v42, %v1667_v5 }
  0x4c   :  { %v627_v24 = vadd.f32 %v626_v13, %v625_v16  ;;  %v851_v13 = vcombine.high %v843_v58, %v843_v58  ;;  %v1318_v16 = vadd.f32 %v1317_v3, %v1316_v6  ;;  %v852_v27 = vcombine.high %v850_v12, %v850_v12 }
  0x4d   :  { %v1325_v37 = vsel %vm560_vm0, %v850_v12, 0.0  ;;  %v650_v40 = vsel %vm560_vm0, %v258_v23, 0.0  ;;  %v870_v58 = vcombine.high %v758_v42, %v758_v42  ;;  %v759_v12 = vmul.f32 %v1738_v0, %v1738_v0 }
  0x4e   :  { %v629_v30 = vadd.f32 %v628_v17, %v627_v24  ;;  %v257_v17 = vrot.slane %v243_v63, %v1667_v5  ;;  %v1320_v26 = vadd.f32 %v1319_v14, %v1318_v16  ;;  %v1323_v29 = vsel %vm560_vm0, %v851_v13, 0.0 }
  0x4f   :  { %v884_v13 = vrot.slane %v870_v58, %v1667_v5  ;;  %v885_v14 = vcombine.high %v877_v59, %v877_v59  ;;  %v1337_v23 = vsel %vm560_vm0, %v877_v59, 0.0  ;;  %v887_v28 = vcombine.high %v759_v12, %v759_v12 }
  0x50   :  { %v631_v38 = vadd.f32 %v630_v25, %v629_v30  ;;  %v646_v25 = vsel %vm560_vm0, %v242_v7, 0.0  ;;  %v1322_v31 = vadd.f32 %v1321_v21, %v1320_v26  ;;  %v652_v51 = vsel %vm560_vm0, %v257_v17, 0.0 }
  0x51   :  { %v1333_v7 = vsel %vm560_vm0, %v867_v43, 0.0  ;;  %v886_v10 = vcombine.high %v884_v13, %v884_v13  ;;  %v760_v43 = vmul.f32 %v1752_v18, %v1752_v18 }
  0x52   :  { %v633_v45 = vadd.f32 %v632_v32, %v631_v38  ;;  %v259_v32 = vcombine.high %v257_v17, %v257_v17  ;;  %v267_v38 = vrot.slane %v1859_v36, %v1667_v5  ;;  %v1324_v41 = vadd.f32 %v1323_v29, %v1322_v31 }
  0x53   :  { %v894_v29 = vrot.slane %v759_v12, %v1667_v5  ;;  %v904_v59 = vcombine.high %v760_v43, %v760_v43 }
  0x54   :  { %v635_v22 = vadd.f32 %v634_v39, %v633_v45  ;;  %v1327_v45 = vsel %vm560_vm0, %v852_v27, 0.0  ;;  %v1326_v47 = vadd.f32 %v1325_v37, %v1324_v41  ;;  %v654_v55 = vsel %vm560_vm0, %v259_v32, 0.0 }
  0x55   :  { %v656_v3 = vsel %vm560_vm0, %v267_v38, 0.0 }
  0x56   :  { %v637_v60 = vadd.f32 %v636_v49, %v635_v22  ;;  %v274_v49 = vrot.slane %v260_v34, %v1667_v5  ;;  %v1880_v22 = vld [vmem:[%s2346_s0 + $0x68] sm:$0xff]  ;;  %v1328_v56 = vadd.f32 %v1327_v45, %v1326_v47  ;;  %v902_v45 = vcombine.high %v894_v29, %v894_v29 }
  0x57   :  { %v277_v1 = vcombine.high %v1880_v22, %v1880_v22 }
  0x58   :  { %v639_v8 = vadd.f32 %v638_v54, %v637_v60  ;;  %v275_v54 = vcombine.high %v267_v38, %v267_v38  ;;  %v1331_v60 = vsel %vm560_vm0, %v868_v44, 0.0  ;;  %v1330_v63 = vadd.f32 %v1329_v53, %v1328_v56 }
  0x59   :  { %v660_v21 = vsel %vm560_vm0, %v274_v49, 0.0  ;;  %v1341_v38 = vsel %vm560_vm0, %v884_v13, 0.0  ;;  %v901_v44 = vrot.slane %v887_v28, %v1667_v5  ;;  %v761_v13 = vmul.f32 %v1766_v33, %v1766_v33 }
  0x5a   :  { %v641_v15 = vadd.f32 %v640_v2, %v639_v8  ;;  %v284_v2 = vrot.slane %v1880_v22, %v1667_v5  ;;  %v276_v8 = vcombine.high %v274_v49, %v274_v49  ;;  %v658_v6 = vsel %vm560_vm0, %v275_v54, 0.0 }
  0x5b   :  { %v1332_v11 = vadd.f32 %v1331_v60, %v1330_v63  ;;  %v1345_v54 = vsel %vm560_vm0, %v894_v29, 0.0  ;;  %v903_v58 = vcombine.high %v901_v44, %v901_v44  ;;  %v911_v60 = vrot.slane %v760_v43, %v1667_v5 }
  0x5c   :  { %v643_v24 = vadd.f32 %v642_v9, %v641_v15  ;;  %v1335_v15 = vsel %vm560_vm0, %v869_v57, 0.0  ;;  %v662_v26 = vsel %vm560_vm0, %v276_v8, 0.0  ;;  %v664_v37 = vsel %vm560_vm0, %v284_v2, 0.0 }
  0x5d   :  { %v1334_v17 = vadd.f32 %v1333_v7, %v1332_v11  ;;  %v1349_v8 = vsel %vm560_vm0, %v901_v44, 0.0  ;;  %v921_v29 = vcombine.high %v761_v13, %v761_v13  ;;  %v762_v44 = vmul.f32 %v1780_v48, %v1780_v48 }
  0x5e   :  { %v645_v30 = vadd.f32 %v644_v19, %v643_v24  ;;  %v291_v19 = vrot.slane %v277_v1, %v1667_v5  ;;  %v1902_v24 = vld [vmem:[%s2346_s0 + $0x70] sm:$0xff] }
  0x5f   :  { %v1336_v27 = vadd.f32 %v1335_v15, %v1334_v17  ;;  %v294_v34 = vcombine.high %v1902_v24, %v1902_v24  ;;  %v919_v15 = vcombine.high %v911_v60, %v911_v60 }
  0x60   :  { %v647_v39 = vadd.f32 %v646_v25, %v645_v30  ;;  %v292_v25 = vcombine.high %v284_v2, %v284_v2  ;;  %v1339_v30 = vsel %vm560_vm0, %v885_v14, 0.0  ;;  %v668_v53 = vsel %vm560_vm0, %v291_v19, 0.0 }
  0x61   :  { %v1338_v32 = vadd.f32 %v1337_v23, %v1336_v27  ;;  %v918_v14 = vrot.slane %v904_v59, %v1667_v5 }
  0x62   :  { %v649_v46 = vadd.f32 %v648_v35, %v647_v39  ;;  %v301_v35 = vrot.slane %v1902_v24, %v1667_v5  ;;  %v293_v39 = vcombine.high %v291_v19, %v291_v19  ;;  %v666_v41 = vsel %vm560_vm0, %v292_v25, 0.0 }
  0x63   :  { %v1340_v42 = vadd.f32 %v1339_v30, %v1338_v32  ;;  %v1353_v25 = vsel %vm560_vm0, %v911_v60, 0.0  ;;  %v920_v28 = vcombine.high %v918_v14, %v918_v14  ;;  %v928_v30 = vrot.slane %v761_v13, %v1667_v5 }
  0x64   :  { %v651_v50 = vadd.f32 %v650_v40, %v649_v46  ;;  %v1343_v46 = vsel %vm560_vm0, %v886_v10, 0.0  ;;  %v670_v56 = vsel %vm560_vm0, %v293_v39, 0.0  ;;  %v672_v7 = vsel %vm560_vm0, %v301_v35, 0.0 }
  0x65   :  { %v1342_v49 = vadd.f32 %v1341_v38, %v1340_v42  ;;  %v1357_v39 = vsel %vm560_vm0, %v918_v14, 0.0  ;;  %v938_v60 = vcombine.high %v762_v44, %v762_v44  ;;  %v763_v14 = vmul.f32 %v1795_v62, %v1795_v62 }
  0x66   :  { %v653_v61 = vadd.f32 %v652_v51, %v651_v50  ;;  %v308_v51 = vrot.slane %v294_v34, %v1667_v5  ;;  %v1924_v50 = vld [vmem:[%s2346_s0 + $0x78] sm:$0xff] }
  0x67   :  { %v1344_v57 = vadd.f32 %v1343_v46, %v1342_v49  ;;  %v311_v2 = vcombine.high %v1924_v50, %v1924_v50  ;;  %v936_v46 = vcombine.high %v928_v30, %v928_v30 }
  0x68   :  { %v655_v9 = vadd.f32 %v654_v55, %v653_v61  ;;  %v309_v55 = vcombine.high %v301_v35, %v301_v35  ;;  %v1347_v61 = vsel %vm560_vm0, %v902_v45, 0.0  ;;  %v676_v23 = vsel %vm560_vm0, %v308_v51, 0.0 }
  0x69   :  { %v1346_v1 = vadd.f32 %v1345_v54, %v1344_v57  ;;  %v935_v45 = vrot.slane %v921_v29, %v1667_v5 }
  0x6a   :  { %v657_v16 = vadd.f32 %v656_v3, %v655_v9  ;;  %v318_v3 = vrot.slane %v1924_v50, %v1667_v5  ;;  %v310_v9 = vcombine.high %v308_v51, %v308_v51  ;;  %v674_v11 = vsel %vm560_vm0, %v309_v55, 0.0 }
  0x6b   :  { %v1348_v12 = vadd.f32 %v1347_v61, %v1346_v1  ;;  %v1361_v55 = vsel %vm560_vm0, %v928_v30, 0.0  ;;  %v937_v59 = vcombine.high %v935_v45, %v935_v45  ;;  %v945_v61 = vrot.slane %v762_v44, %v1667_v5 }
  0x6c   :  { %v659_v0 = vadd.f32 %v658_v6, %v657_v16  ;;  %v1351_v16 = vsel %vm560_vm0, %v903_v58, 0.0  ;;  %v678_v27 = vsel %vm560_vm0, %v310_v9, 0.0  ;;  %v680_v38 = vsel %vm560_vm0, %v318_v3, 0.0 }
  0x6d   :  { %v1350_v19 = vadd.f32 %v1349_v8, %v1348_v12  ;;  %v1365_v9 = vsel %vm560_vm0, %v935_v45, 0.0  ;;  %v955_v30 = vcombine.high %v763_v14, %v763_v14  ;;  %v764_v45 = vmul.f32 %v1812_v20, %v1812_v20 }
  0x6e   :  { %v661_v31 = vadd.f32 %v660_v21, %v659_v0  ;;  %v325_v21 = vrot.slane %v311_v2, %v1667_v5  ;;  %v1946_v0 = vld [vmem:[%s2346_s0 + $0x80] sm:$0xff] }
  0x6f   :  { %v1352_v10 = vadd.f32 %v1351_v16, %v1350_v19  ;;  %v328_v35 = vcombine.high %v1946_v0, %v1946_v0  ;;  %v953_v16 = vcombine.high %v945_v61, %v945_v61 }
  0x70   :  { %v663_v40 = vadd.f32 %v662_v26, %v661_v31  ;;  %v326_v26 = vcombine.high %v318_v3, %v318_v3  ;;  %v1355_v31 = vsel %vm560_vm0, %v919_v15, 0.0  ;;  %v684_v54 = vsel %vm560_vm0, %v325_v21, 0.0 }
  0x71   :  { %v1354_v34 = vadd.f32 %v1353_v25, %v1352_v10  ;;  %v952_v15 = vrot.slane %v938_v60, %v1667_v5 }
  0x72   :  { %v665_v47 = vadd.f32 %v664_v37, %v663_v40  ;;  %v335_v37 = vrot.slane %v1946_v0, %v1667_v5  ;;  %v327_v40 = vcombine.high %v325_v21, %v325_v21  ;;  %v682_v42 = vsel %vm560_vm0, %v326_v26, 0.0 }
  0x73   :  { %v1356_v43 = vadd.f32 %v1355_v31, %v1354_v34  ;;  %v1369_v26 = vsel %vm560_vm0, %v945_v61, 0.0  ;;  %v954_v29 = vcombine.high %v952_v15, %v952_v15  ;;  %v962_v31 = vrot.slane %v763_v14, %v1667_v5 }
  0x74   :  { %v667_v18 = vadd.f32 %v666_v41, %v665_v47  ;;  %v1359_v47 = vsel %vm560_vm0, %v920_v28, 0.0  ;;  %v686_v57 = vsel %vm560_vm0, %v327_v40, 0.0  ;;  %v688_v8 = vsel %vm560_vm0, %v335_v37, 0.0 }
  0x75   :  { %v1358_v51 = vadd.f32 %v1357_v39, %v1356_v43  ;;  %v1373_v40 = vsel %vm560_vm0, %v952_v15, 0.0  ;;  %v972_v61 = vcombine.high %v764_v45, %v764_v45  ;;  %v765_v15 = vmul.f32 %v1836_v52, %v1836_v52 }
  0x76   :  { %v669_v63 = vadd.f32 %v668_v53, %v667_v18  ;;  %v342_v53 = vrot.slane %v328_v35, %v1667_v5  ;;  %v1968_v18 = vld [vmem:[%s2346_s0 + $0x88] sm:$0xff] }
  0x77   :  { %v1360_v58 = vadd.f32 %v1359_v47, %v1358_v51  ;;  %v345_v3 = vcombine.high %v1968_v18, %v1968_v18  ;;  %v970_v47 = vcombine.high %v962_v31, %v962_v31 }
  0x78   :  { %v671_v6 = vadd.f32 %v670_v56, %v669_v63  ;;  %v343_v56 = vcombine.high %v335_v37, %v335_v37  ;;  %v1363_v63 = vsel %vm560_vm0, %v936_v46, 0.0  ;;  %v692_v25 = vsel %vm560_vm0, %v342_v53, 0.0 }
  0x79   :  { %v1362_v2 = vadd.f32 %v1361_v55, %v1360_v58  ;;  %v969_v46 = vrot.slane %v955_v30, %v1667_v5 }
  0x7a   :  { %v673_v17 = vadd.f32 %v672_v7, %v671_v6  ;;  %v352_v7 = vrot.slane %v1968_v18, %v1667_v5  ;;  %v344_v6 = vcombine.high %v342_v53, %v342_v53  ;;  %v690_v12 = vsel %vm560_vm0, %v343_v56, 0.0 }
  0x7b   :  { %v1364_v13 = vadd.f32 %v1363_v63, %v1362_v2  ;;  %v1377_v56 = vsel %vm560_vm0, %v962_v31, 0.0  ;;  %v971_v60 = vcombine.high %v969_v46, %v969_v46  ;;  %v979_v63 = vrot.slane %v764_v45, %v1667_v5 }
  0x7c   :  { %v675_v33 = vadd.f32 %v674_v11, %v673_v17  ;;  %v1367_v17 = vsel %vm560_vm0, %v937_v59, 0.0  ;;  %v694_v10 = vsel %vm560_vm0, %v344_v6, 0.0  ;;  %v696_v39 = vsel %vm560_vm0, %v352_v7, 0.0 }
  0x7d   :  { %v1366_v21 = vadd.f32 %v1365_v9, %v1364_v13  ;;  %v1381_v6 = vsel %vm560_vm0, %v969_v46, 0.0  ;;  %v989_v31 = vcombine.high %v765_v15, %v765_v15  ;;  %v766_v46 = vmul.f32 %v1859_v36, %v1859_v36 }
  0x7e   :  { %v677_v32 = vadd.f32 %v676_v23, %v675_v33  ;;  %v359_v23 = vrot.slane %v345_v3, %v1667_v5  ;;  %v1990_v33 = vld [vmem:[%s2346_s0 + $0x90] sm:$0xff] }
  0x7f   :  { %v1368_v28 = vadd.f32 %v1367_v17, %v1366_v21  ;;  %v362_v37 = vcombine.high %v1990_v33, %v1990_v33  ;;  %v987_v17 = vcombine.high %v979_v63, %v979_v63 }
  0x80   :  { %v679_v41 = vadd.f32 %v678_v27, %v677_v32  ;;  %v360_v27 = vcombine.high %v352_v7, %v352_v7  ;;  %v1371_v32 = vsel %vm560_vm0, %v953_v16, 0.0  ;;  %v700_v55 = vsel %vm560_vm0, %v359_v23, 0.0 }
  0x81   :  { %v1370_v35 = vadd.f32 %v1369_v26, %v1368_v28  ;;  %v986_v16 = vrot.slane %v972_v61, %v1667_v5 }
  0x82   :  { %v681_v49 = vadd.f32 %v680_v38, %v679_v41  ;;  %v369_v38 = vrot.slane %v1990_v33, %v1667_v5  ;;  %v361_v41 = vcombine.high %v359_v23, %v359_v23  ;;  %v698_v43 = vsel %vm560_vm0, %v360_v27, 0.0 }
  0x83   :  { %v1372_v44 = vadd.f32 %v1371_v32, %v1370_v35  ;;  %v1385_v27 = vsel %vm560_vm0, %v979_v63, 0.0  ;;  %v988_v30 = vcombine.high %v986_v16, %v986_v16  ;;  %v996_v32 = vrot.slane %v765_v15, %v1667_v5 }
  0x84   :  { %v683_v48 = vadd.f32 %v682_v42, %v681_v49  ;;  %v1375_v49 = vsel %vm560_vm0, %v954_v29, 0.0  ;;  %v702_v58 = vsel %vm560_vm0, %v361_v41, 0.0  ;;  %v704_v9 = vsel %vm560_vm0, %v369_v38, 0.0 }
  0x85   :  { %v1374_v53 = vadd.f32 %v1373_v40, %v1372_v44  ;;  %v1389_v41 = vsel %vm560_vm0, %v986_v16, 0.0  ;;  %v1006_v63 = vcombine.high %v766_v46, %v766_v46 }
  0x86   :  { %v685_v1 = vadd.f32 %v684_v54, %v683_v48  ;;  %v376_v54 = vrot.slane %v362_v37, %v1667_v5  ;;  %v2012_v48 = vld [vmem:[%s2346_s0 + $0x98] sm:$0xff] }
  0x87   :  { %v1376_v59 = vadd.f32 %v1375_v49, %v1374_v53  ;;  %v379_v7 = vcombine.high %v2012_v48, %v2012_v48  ;;  %v1004_v49 = vcombine.high %v996_v32, %v996_v32 }
  0x88   :  { %v687_v11 = vadd.f32 %v686_v57, %v685_v1  ;;  %v377_v57 = vcombine.high %v369_v38, %v369_v38  ;;  %v1379_v1 = vsel %vm560_vm0, %v970_v47, 0.0  ;;  %v708_v26 = vsel %vm560_vm0, %v376_v54, 0.0 }
  0x89   :  { %v1378_v3 = vadd.f32 %v1377_v56, %v1376_v59  ;;  %v1003_v47 = vrot.slane %v989_v31, %v1667_v5 }
  0x8a   :  { %v689_v19 = vadd.f32 %v688_v8, %v687_v11  ;;  %v386_v8 = vrot.slane %v2012_v48, %v1667_v5  ;;  %v378_v11 = vcombine.high %v376_v54, %v376_v54  ;;  %v706_v13 = vsel %vm560_vm0, %v377_v57, 0.0 }
  0x8b   :  { %v1380_v14 = vadd.f32 %v1379_v1, %v1378_v3  ;;  %v1393_v57 = vsel %vm560_vm0, %v996_v32, 0.0  ;;  %v1005_v61 = vcombine.high %v1003_v47, %v1003_v47  ;;  %v1013_v1 = vrot.slane %v766_v46, %v1667_v5 }
  0x8c   :  { %v691_v62 = vadd.f32 %v690_v12, %v689_v19  ;;  %v1383_v19 = vsel %vm560_vm0, %v971_v60, 0.0  ;;  %v710_v28 = vsel %vm560_vm0, %v378_v11, 0.0  ;;  %v712_v40 = vsel %vm560_vm0, %v386_v8, 0.0 }
  0x8d   :  { %v1382_v23 = vadd.f32 %v1381_v6, %v1380_v14  ;;  %v1397_v11 = vsel %vm560_vm0, %v1003_v47, 0.0  ;;  %v767_v14 = vmul.f32 %v1880_v22, %v1880_v22  ;;  %v768_v46 = vmul.f32 %v1902_v24, %v1902_v24 }
  0x8e   :  { %v693_v34 = vadd.f32 %v692_v25, %v691_v62  ;;  %v393_v25 = vrot.slane %v379_v7, %v1667_v5  ;;  %v2034_v62 = vld [vmem:[%s2346_s0 + $0xa0] sm:$0xff] }
  0x8f   :  { %v1384_v29 = vadd.f32 %v1383_v19, %v1382_v23  ;;  %v396_v38 = vcombine.high %v2034_v62, %v2034_v62  ;;  %v1021_v19 = vcombine.high %v1013_v1, %v1013_v1 }
  0x90   :  { %v695_v42 = vadd.f32 %v694_v10, %v693_v34  ;;  %v394_v10 = vcombine.high %v386_v8, %v386_v8  ;;  %v1387_v34 = vsel %vm560_vm0, %v987_v17, 0.0  ;;  %v716_v56 = vsel %vm560_vm0, %v393_v25, 0.0 }
  0x91   :  { %v1386_v37 = vadd.f32 %v1385_v27, %v1384_v29  ;;  %v1020_v17 = vrot.slane %v1006_v63, %v1667_v5 }
  0x92   :  { %v697_v51 = vadd.f32 %v696_v39, %v695_v42  ;;  %v403_v39 = vrot.slane %v2034_v62, %v1667_v5  ;;  %v395_v42 = vcombine.high %v393_v25, %v393_v25  ;;  %v714_v44 = vsel %vm560_vm0, %v394_v10, 0.0 }
  0x93   :  { %v1388_v45 = vadd.f32 %v1387_v34, %v1386_v37  ;;  %v1401_v10 = vsel %vm560_vm0, %v1013_v1, 0.0  ;;  %v1022_v32 = vcombine.high %v1020_v17, %v1020_v17  ;;  %v1023_v34 = vcombine.high %v767_v14, %v767_v14 }
  0x94   :  { %v699_v20 = vadd.f32 %v698_v43, %v697_v51  ;;  %v1391_v51 = vsel %vm560_vm0, %v988_v30, 0.0  ;;  %v718_v59 = vsel %vm560_vm0, %v395_v42, 0.0  ;;  %v720_v6 = vsel %vm560_vm0, %v403_v39, 0.0 }
  0x95   :  { %v1390_v54 = vadd.f32 %v1389_v41, %v1388_v45  ;;  %v1403_v37 = vsel %vm560_vm0, %v1021_v19, 0.0 }
  0x96   :  { %v701_v2 = vadd.f32 %v700_v55, %v699_v20  ;;  %v410_v55 = vrot.slane %v396_v38, %v1667_v5  ;;  %v2056_v20 = vld [vmem:[%s2346_s0 + $0xa8] sm:$0xff] }
  0x97   :  { %v1392_v60 = vadd.f32 %v1391_v51, %v1390_v54  ;;  %v413_v8 = vcombine.high %v2056_v20, %v2056_v20  ;;  %v1037_v51 = vrot.slane %v1023_v34, %v1667_v5  ;;  %v1407_v54 = vsel %vm560_vm0, %v1022_v32, 0.0 }
  0x98   :  { %v703_v12 = vadd.f32 %v702_v58, %v701_v2  ;;  %v411_v58 = vcombine.high %v403_v39, %v403_v39  ;;  %v1395_v2 = vsel %vm560_vm0, %v1004_v49, 0.0  ;;  %v724_v27 = vsel %vm560_vm0, %v410_v55, 0.0 }
  0x99   :  { %v1394_v7 = vadd.f32 %v1393_v57, %v1392_v60 }
  0x9a   :  { %v705_v21 = vadd.f32 %v704_v9, %v703_v12  ;;  %v420_v9 = vrot.slane %v2056_v20, %v1667_v5  ;;  %v412_v12 = vcombine.high %v410_v55, %v410_v55  ;;  %v722_v16 = vsel %vm560_vm0, %v411_v58, 0.0 }
  0x9b   :  { %v1396_v15 = vadd.f32 %v1395_v2, %v1394_v7  ;;  %v1039_v2 = vcombine.high %v1037_v51, %v1037_v51  ;;  %v1047_v7 = vrot.slane %v768_v46, %v1667_v5 }
  0x9c   :  { %v707_v52 = vadd.f32 %v706_v13, %v705_v21  ;;  %v1399_v21 = vsel %vm560_vm0, %v1005_v61, 0.0  ;;  %v726_v30 = vsel %vm560_vm0, %v412_v12, 0.0  ;;  %v728_v42 = vsel %vm560_vm0, %v420_v9, 0.0 }
  0x9d   :  { %v1398_v25 = vadd.f32 %v1397_v11, %v1396_v15 }
  0x9e   :  { %v709_v35 = vadd.f32 %v708_v26, %v707_v52  ;;  %v427_v26 = vrot.slane %v413_v8, %v1667_v5  ;;  %v2078_v52 = vld [vmem:[%s2346_s0 + $0xb0] sm:$0xff] }
  0x9f   :  { %v1400_v31 = vadd.f32 %v1399_v21, %v1398_v25  ;;  %v437_v41 = vrot.slane %v2078_v52, %v1667_v5  ;;  %v1055_v25 = vcombine.high %v1047_v7, %v1047_v7 }
  0xa0   :  { %v711_v43 = vadd.f32 %v710_v28, %v709_v35  ;;  %v428_v28 = vcombine.high %v420_v9, %v420_v9  ;;  %v1030_v35 = vrot.slane %v767_v14, %v1667_v5  ;;  %v732_v58 = vsel %vm560_vm0, %v427_v26, 0.0 }
  0xa1   :  { %v1402_v39 = vadd.f32 %v1401_v10, %v1400_v31  ;;  %v445_v60 = vcombine.high %v437_v41, %v437_v41  ;;  %v1413_v14 = vsel %vm560_vm0, %v1037_v51, 0.0 }
  0xa2   :  { %v713_v53 = vadd.f32 %v712_v40, %v711_v43  ;;  %v430_v40 = vcombine.high %v2078_v52, %v2078_v52  ;;  %v1405_v43 = vsel %vm560_vm0, %v1020_v17, 0.0  ;;  %v730_v49 = vsel %vm560_vm0, %v428_v28, 0.0 }
  0xa3   :  { %v1404_v47 = vadd.f32 %v1403_v37, %v1402_v39  ;;  %v769_v17 = vmul.f32 %v1924_v50, %v1924_v50  ;;  %v738_v21 = vsel %vm560_vm0, %v445_v60, 0.0 }
  0xa4   :  { %v715_v36 = vadd.f32 %v714_v44, %v713_v53  ;;  %v429_v44 = vcombine.high %v427_v26, %v427_v26  ;;  %v1038_v53 = vcombine.high %v1030_v35, %v1030_v35  ;;  %v444_v57 = vrot.slane %v430_v40, %v1667_v5 }
  0xa5   :  { %v1415_v26 = vsel %vm560_vm0, %v1039_v2, 0.0  ;;  %v1064_v39 = vrot.slane %v769_v17, %v1667_v5  ;;  %v1419_v40 = vsel %vm560_vm0, %v1055_v25, 0.0 }
  0xa6   :  { %v717_v3 = vadd.f32 %v716_v56, %v715_v36  ;;  %v1406_v56 = vadd.f32 %v1405_v43, %v1404_v47  ;;  %v1409_v36 = vsel %vm560_vm0, %v1030_v35, 0.0  ;;  %v734_v63 = vsel %vm560_vm0, %v429_v44, 0.0 }
  0xa7   :  { %v1411_v8 = vsel %vm560_vm0, %v1038_v53, 0.0  ;;  %v446_v15 = vcombine.high %v444_v57, %v444_v57  ;;  %v770_v47 = vmul.f32 %v1946_v0, %v1946_v0 }
  0xa8   :  { %v719_v13 = vadd.f32 %v718_v59, %v717_v3  ;;  %v2100_v59 = vld [vmem:[%s2346_s0 + $0xb8] sm:$0xff]  ;;  %v1408_v1 = vadd.f32 %v1407_v54, %v1406_v56  ;;  %v1040_v3 = vcombine.high %v768_v46, %v768_v46  ;;  %v1072_v54 = vcombine.high %v1064_v39, %v1064_v39 }
  0xa9   :  { %v447_v11 = vcombine.high %v2100_v59, %v2100_v59  ;;  %v454_v12 = vrot.slane %v2100_v59, %v1667_v5  ;;  %v742_v34 = vsel %vm560_vm0, %v446_v15, 0.0 }
  0xaa   :  { %v721_v23 = vadd.f32 %v720_v6, %v719_v13  ;;  %v1410_v6 = vadd.f32 %v1409_v36, %v1408_v1  ;;  %v736_v13 = vsel %vm560_vm0, %v437_v41, 0.0  ;;  %v1425_v36 = vsel %vm560_vm0, %v1064_v39, 0.0 }
  0xab   :  { %v461_v28 = vrot.slane %v447_v11, %v1667_v5  ;;  %v462_v31 = vcombine.high %v454_v12, %v454_v12  ;;  %v744_v43 = vsel %vm560_vm0, %v454_v12, 0.0 }
  0xac   :  { %v723_v29 = vadd.f32 %v722_v16, %v721_v23  ;;  %v1412_v19 = vadd.f32 %v1411_v8, %v1410_v6  ;;  %v1054_v23 = vrot.slane %v1040_v3, %v1667_v5  ;;  %v1081_v3 = vrot.slane %v770_v47, %v1667_v5 }
  0xad   :  { %v746_v51 = vsel %vm560_vm0, %v462_v31, 0.0 }
  0xae   :  { %v725_v38 = vadd.f32 %v724_v27, %v723_v29  ;;  %v1414_v10 = vadd.f32 %v1413_v14, %v1412_v19  ;;  %v740_v29 = vsel %vm560_vm0, %v444_v57, 0.0  ;;  %v1056_v37 = vcombine.high %v1054_v23, %v1054_v23 }
  0xaf   :  { %v1421_v44 = vsel %vm560_vm0, %v1054_v23, 0.0  ;;  %v1089_v15 = vcombine.high %v1081_v3, %v1081_v3  ;;  %v1433_v19 = vsel %vm560_vm0, %v1081_v3, 0.0 }
  0xb0   :  { %v727_v45 = vadd.f32 %v726_v30, %v725_v38  ;;  %v1417_v30 = vsel %vm560_vm0, %v1047_v7, 0.0  ;;  %v1416_v35 = vadd.f32 %v1415_v26, %v1414_v10  ;;  %v1057_v38 = vcombine.high %v769_v17, %v769_v17 }
  0xb1   :  { %v1427_v7 = vsel %vm560_vm0, %v1072_v54, 0.0 }
  0xb2   :  { %v729_v55 = vadd.f32 %v728_v42, %v727_v45  ;;  %v1418_v42 = vadd.f32 %v1417_v30, %v1416_v35  ;;  %v463_v45 = vcombine.high %v461_v28, %v461_v28  ;;  %v1071_v53 = vrot.slane %v1057_v38, %v1667_v5 }
  0xb3   :  { %v772_v30 = vmul.f32 %v1990_v33, %v1990_v33 }
  0xb4   :  { %v731_v61 = vadd.f32 %v730_v49, %v729_v55  ;;  %v1420_v49 = vadd.f32 %v1419_v40, %v1418_v42  ;;  %v1423_v55 = vsel %vm560_vm0, %v1056_v37, 0.0  ;;  %v750_v1 = vsel %vm560_vm0, %v463_v45, 0.0 }
  0xb5   :  { %v1073_v2 = vcombine.high %v1071_v53, %v1071_v53  ;;  %v1429_v6 = vsel %vm560_vm0, %v1071_v53, 0.0  ;;  %v1108_v40 = vcombine.high %v772_v30, %v772_v30 }
  0xb6   :  { %v733_v9 = vadd.f32 %v732_v58, %v731_v61  ;;  %v1422_v57 = vadd.f32 %v1421_v44, %v1420_v49  ;;  %v748_v58 = vsel %vm560_vm0, %v461_v28, 0.0  ;;  %v1074_v61 = vcombine.high %v770_v47, %v770_v47 }
  0xb7   :  { %v1122_v47 = vrot.slane %v1108_v40, %v1667_v5 }
  0xb8   :  { %v735_v16 = vadd.f32 %v734_v63, %v733_v9  ;;  %v1424_v63 = vadd.f32 %v1423_v55, %v1422_v57  ;;  %v1088_v14 = vrot.slane %v1074_v61, %v1667_v5 }
  0xb9   :  { %v1453_v61 = vsel %vm560_vm0, %v1122_v47, 0.0 }
  0xba   :  { %v737_v27 = vadd.f32 %v736_v13, %v735_v16  ;;  %v1426_v9 = vadd.f32 %v1425_v36, %v1424_v63  ;;  %v771_v13 = vmul.f32 %v1968_v18, %v1968_v18  ;;  %v1431_v16 = vsel %vm560_vm0, %v1073_v2, 0.0 }
  0xbb   :  { %v1090_v23 = vcombine.high %v1088_v14, %v1088_v14  ;;  %v1437_v28 = vsel %vm560_vm0, %v1088_v14, 0.0 }
  0xbc   :  { %v739_v32 = vadd.f32 %v738_v21, %v737_v27  ;;  %v1428_v12 = vadd.f32 %v1427_v7, %v1426_v9  ;;  %v1091_v25 = vcombine.high %v771_v13, %v771_v13  ;;  %v1098_v26 = vrot.slane %v771_v13, %v1667_v5 }
  0xbd   :  { %v1435_v27 = vsel %vm560_vm0, %v1089_v15, 0.0 }
  0xbe   :  { %v741_v41 = vadd.f32 %v740_v29, %v739_v32  ;;  %v1430_v17 = vadd.f32 %v1429_v6, %v1428_v12  ;;  %v1105_v31 = vrot.slane %v1091_v25, %v1667_v5  ;;  %v1106_v32 = vcombine.high %v1098_v26, %v1098_v26 }
  0xbf   :  { %v1441_v37 = vsel %vm560_vm0, %v1098_v26, 0.0 }
  0xc0   :  { %v743_v46 = vadd.f32 %v742_v34, %v741_v41  ;;  %v1432_v21 = vadd.f32 %v1431_v16, %v1430_v17  ;;  %v1439_v34 = vsel %vm560_vm0, %v1090_v23, 0.0  ;;  %v1107_v39 = vcombine.high %v1105_v31, %v1105_v31 }
  0xc1   :  { %v1115_v41 = vrot.slane %v772_v30, %v1667_v5  ;;  %v1443_v42 = vsel %vm560_vm0, %v1106_v32, 0.0  ;;  %v1445_v44 = vsel %vm560_vm0, %v1105_v31, 0.0 }
  0xc2   :  { %v745_v56 = vadd.f32 %v744_v43, %v743_v46  ;;  %v1434_v10 = vadd.f32 %v1433_v19, %v1432_v21  ;;  %v773_v46 = vmul.f32 %v2012_v48, %v2012_v48  ;;  %v775_v19 = vmul.f32 %v2056_v20, %v2056_v20 }
  0xc3   :  { %v1123_v49 = vcombine.high %v1115_v41, %v1115_v41  ;;  %v1449_v54 = vsel %vm560_vm0, %v1115_v41, 0.0 }
  0xc4   :  { %v747_v60 = vadd.f32 %v746_v51, %v745_v56  ;;  %v1436_v29 = vadd.f32 %v1435_v27, %v1434_v10  ;;  %v1447_v51 = vsel %vm560_vm0, %v1107_v39, 0.0  ;;  %v1124_v56 = vcombine.high %v1122_v47, %v1122_v47 }
  0xc5   :  { %v1125_v57 = vcombine.high %v773_v46, %v773_v46  ;;  %v1451_v36 = vsel %vm560_vm0, %v1123_v49, 0.0  ;;  %v1166_v30 = vrot.slane %v775_v19, %v1667_v5 }
  0xc6   :  { %v749_v8 = vadd.f32 %v748_v58, %v747_v60  ;;  %v1438_v35 = vadd.f32 %v1437_v28, %v1436_v29  ;;  %v1132_v58 = vrot.slane %v773_v46, %v1667_v5  ;;  %v1455_v7 = vsel %vm560_vm0, %v1124_v56, 0.0 }
  0xc7   :  { %v1139_v2 = vrot.slane %v1125_v57, %v1667_v5  ;;  %v1159_v29 = vcombine.high %v775_v19, %v775_v19  ;;  %v1174_v39 = vcombine.high %v1166_v30, %v1166_v30 }
  0xc8   :  { %v751_v11 = vadd.f32 %v750_v1, %v749_v8  ;;  %v1440_v38 = vadd.f32 %v1439_v34, %v1438_v35  ;;  %v774_v1 = vmul.f32 %v2034_v62, %v2034_v62  ;;  %v1140_v3 = vcombine.high %v1132_v58, %v1132_v58 }
  0xc9   :  { %v1457_v9 = vsel %vm560_vm0, %v1132_v58, 0.0  ;;  %v1461_v16 = vsel %vm560_vm0, %v1139_v2, 0.0  ;;  %v1475_v47 = vsel %vm560_vm0, %v1174_v39, 0.0 }
  0xca   :  { %752 = vadd.xlane.f32.xlu0 %v751_v11  ;;  %v1442_v43 = vadd.f32 %v1441_v37, %v1440_v38  ;;  %v1141_v11 = vcombine.high %v1139_v2, %v1139_v2  ;;  %v1142_v12 = vcombine.high %v774_v1, %v774_v1  ;;  %v1149_v13 = vrot.slane %v774_v1, %v1667_v5 }
  0xcb   :  { %v1459_v14 = vsel %vm560_vm0, %v1140_v3, 0.0  ;;  %v776_v37 = vmul.f32 %v2078_v52, %v2078_v52  ;;  %v1173_v38 = vrot.slane %v1159_v29, %v1667_v5 }
  0xcc   :  { %v1444_v45 = vadd.f32 %v1443_v42, %v1442_v43  ;;  %v1156_v21 = vrot.slane %v1142_v12, %v1667_v5  ;;  %v1157_v23 = vcombine.high %v1149_v13, %v1149_v13  ;;  %v1463_v25 = vsel %vm560_vm0, %v1141_v11, 0.0 }
  0xcd   :  { %v1465_v27 = vsel %vm560_vm0, %v1149_v13, 0.0  ;;  %v1473_v42 = vsel %vm560_vm0, %v1166_v30, 0.0  ;;  %v1183_v46 = vrot.slane %v776_v37, %v1667_v5 }
  0xce   :  { %v1446_v53 = vadd.f32 %v1445_v44, %v1444_v45  ;;  %v1158_v28 = vcombine.high %v1156_v21, %v1156_v21  ;;  %v1467_v31 = vsel %vm560_vm0, %v1157_v23, 0.0  ;;  %v1469_v34 = vsel %vm560_vm0, %v1156_v21, 0.0 }
  0xcf   :  { %v1175_v44 = vcombine.high %v1173_v38, %v1173_v38  ;;  %v1176_v45 = vcombine.high %v776_v37, %v776_v37  ;;  %v1191_v56 = vcombine.high %v1183_v46, %v1183_v46 }
  0xd0   :  { %v1448_v55 = vadd.f32 %v1447_v51, %v1446_v53  ;;  %v1471_v40 = vsel %vm560_vm0, %v1158_v28, 0.0  ;;  %v1477_v51 = vsel %vm560_vm0, %v1173_v38, 0.0 }
  0xd1   :  { %v1479_v57 = vsel %vm560_vm0, %v1175_v44, 0.0  ;;  %v1483_v2 = vsel %vm560_vm0, %v1191_v56, 0.0 }
  0xd2   :  { %v1450_v60 = vadd.f32 %v1449_v54, %v1448_v55  ;;  %v777_v54 = vmul.f32 %v2100_v59, %v2100_v59  ;;  %v1190_v55 = vrot.slane %v1176_v45, %v1667_v5 }
  0xd4   :  { %v1452_v63 = vadd.f32 %v1451_v36, %v1450_v60  ;;  %v1481_v36 = vsel %vm560_vm0, %v1183_v46, 0.0  ;;  %v1200_v1 = vrot.slane %v777_v54, %v1667_v5 }
  0xd6   :  { %v1454_v8 = vadd.f32 %v1453_v61, %v1452_v63  ;;  %v1192_v61 = vcombine.high %v1190_v55, %v1190_v55  ;;  %v1193_v63 = vcombine.high %v777_v54, %v777_v54  ;;  %v1489_v13 = vsel %vm560_vm0, %v1200_v1, 0.0 }
  0xd8   :  { %v1456_v6 = vadd.f32 %v1455_v7, %v1454_v8  ;;  %v1485_v7 = vsel %vm560_vm0, %v1190_v55, 0.0  ;;  %v1487_v11 = vsel %vm560_vm0, %v1192_v61, 0.0  ;;  %v1642_v55 = vld [vmem:[%s2346_s0 + $0x18] sm:$0xff]  ;;  %v1645_v61 = vld [vmem:[%s2346_s0 + $0x30] sm:$0xff] }
  0xda   :  { %v1458_v15 = vadd.f32 %v1457_v9, %v1456_v6  ;;  %v1207_v9 = vrot.slane %v1193_v63, %v1667_v5  ;;  %v1208_v6 = vcombine.high %v1200_v1, %v1200_v1  ;;  %v1646_v1 = vld [vmem:[%s2346_s0 + $0x38] sm:$0xff] }
  0xdc   :  { %v1460_v17 = vadd.f32 %v1459_v14, %v1458_v15  ;;  %v1209_v15 = vcombine.high %v1207_v9, %v1207_v9  ;;  %v1493_v19 = vsel %vm560_vm0, %v1207_v9, 0.0 }
  0xde   :  { %v1462_v26 = vadd.f32 %v1461_v16, %v1460_v17  ;;  %v1491_v16 = vsel %vm560_vm0, %v1208_v6, 0.0  ;;  %v1495_v23 = vsel %vm560_vm0, %v1209_v15, 0.0  ;;  %v1649_v6 = vld [vmem:[%s2346_s0 + $0x50] sm:$0xff] }
  0xe0   :  { %v1464_v10 = vadd.f32 %v1463_v25, %v1462_v26 }
  0xe2   :  { %v1466_v32 = vadd.f32 %v1465_v27, %v1464_v10 }
  0xe4   :  { %v1468_v35 = vadd.f32 %v1467_v31, %v1466_v32 }
  0xe6   :  { %v1470_v41 = vadd.f32 %v1469_v34, %v1468_v35  ;;  %v1653_v34 = vmov 269488144  }
  0xe7   :  { %v1516_v35 = vunpack.c.l.s4 %v1653_v34 }
  0xe8   :  { %v1472_v43 = vadd.f32 %v1471_v40, %v1470_v41 }
  0xe9   :  { %v1517_v39 = vunpack.c.0.s8 %v1516_v35 }
  0xea   :  { %v1474_v49 = vadd.f32 %v1473_v42, %v1472_v43 }
  0xeb   :  { %v1520_v44 = vsub.s32 %v1517_v39, %v1664_v4  ;;  %v1641_v4 = vld [vmem:[%s2346_s0 + $0x10] sm:$0xff] }
  0xec   :  { %v1476_v53 = vadd.f32 %v1475_v47, %v1474_v49  ;;  %v1639_v47 = vld [vmem:[%s2346_s0] sm:$0xff] }
  0xee   :  { %v1478_v58 = vadd.f32 %v1477_v51, %v1476_v53  ;;  %v1640_v51 = vld [vmem:[%s2346_s0 + $0x8] sm:$0xff] }
  0xf0   :  { %v1480_v60 = vadd.f32 %v1479_v57, %v1478_v58  ;;  %v1643_v57 = vld [vmem:[%s2346_s0 + $0x20] sm:$0xff] }
  0xf2   :  { %v1482_v3 = vadd.f32 %v1481_v36, %v1480_v60  ;;  %v1644_v36 = vld [vmem:[%s2346_s0 + $0x28] sm:$0xff] }
  0xf4   :  { %v1484_v8 = vadd.f32 %v1483_v2, %v1482_v3  ;;  %v1647_v3 = vld [vmem:[%s2346_s0 + $0x40] sm:$0xff] }
  0xf6   :  { %v1486_v12 = vadd.f32 %v1485_v7, %v1484_v8  ;;  %v1648_v8 = vld [vmem:[%s2346_s0 + $0x48] sm:$0xff] }
  0xf8   :  { %v1488_v14 = vadd.f32 %v1487_v11, %v1486_v12  ;;  %v1650_v12 = vld [vmem:[%s2346_s0 + $0x58] sm:$0xff] }
  0xfa   :  { %v1490_v17 = vadd.f32 %v1489_v13, %v1488_v14  ;;  %v1651_v14 = vld [vmem:[%s2346_s0 + $0x60] sm:$0xff] }
  0xfc   :  { %v1492_v21 = vadd.f32 %v1491_v16, %v1490_v17 }
  0xfe   :  { %v1494_v25 = vadd.f32 %v1493_v19, %v1492_v21 }
 0x100   :  { %v1496_v26 = vadd.f32 %v1495_v23, %v1494_v25 }
 0x102   :  { %1497 = vadd.xlane.f32.xlu0 %v1496_v26 }
 0x157   :  { %v753_v5 = vpop.xlane.xlu0 %752 }
 0x158   :  { %v1499_v27 = vmul.f32 8.138021e-05, %v753_v5 }
 0x15a   :  { %v1500_v10 = vmul.f32 12288.0, %v1499_v27  ;;  %v2198_v46 = vrot.slane %v1499_v27, %v1520_v44 }
 0x15c   :  { %v1501_v28 = vmul.f32 %v1500_v10, %v1499_v27  ;;  %v1523_v49 = vsub.f32 %v1639_v47, %v2198_v46  ;;  %v1524_v53 = vsub.f32 %v1640_v51, %v2198_v46  ;;  %v1525_v54 = vsub.f32 %v1641_v4, %v2198_v46 }
 0x15d   :  { %v1526_v56 = vsub.f32 %v1642_v55, %v2198_v46  ;;  %v1527_v58 = vsub.f32 %v1643_v57, %v2198_v46  ;;  %v1528_v60 = vsub.f32 %v1644_v36, %v2198_v46  ;;  %v1529_v63 = vsub.f32 %v1645_v61, %v2198_v46 }
 0x15e   :  { %v1530_v2 = vsub.f32 %v1646_v1, %v2198_v46  ;;  %v1531_v7 = vsub.f32 %v1647_v3, %v2198_v46  ;;  %v1532_v9 = vsub.f32 %v1648_v8, %v2198_v46  ;;  %v1533_v11 = vsub.f32 %v1649_v6, %v2198_v46 }
 0x15f   :  { %v1534_v13 = vsub.f32 %v1650_v12, %v2198_v46  ;;  %v1535_v15 = vsub.f32 %v1651_v14, %v2198_v46  ;;  %v1536_v16 = vsub.f32 %v1880_v22, %v2198_v46  ;;  %v1537_v17 = vsub.f32 %v1902_v24, %v2198_v46 }
 0x160   :  { %v1538_v19 = vsub.f32 %v1924_v50, %v2198_v46  ;;  %v1539_v21 = vsub.f32 %v1946_v0, %v2198_v46  ;;  %v1540_v23 = vsub.f32 %v1968_v18, %v2198_v46  ;;  %v1541_v25 = vsub.f32 %v1990_v33, %v2198_v46 }
 0x161   :  { %v1542_v26 = vsub.f32 %v2012_v48, %v2198_v46  ;;  %v1543_v22 = vsub.f32 %v2034_v62, %v2198_v46  ;;  %v1544_v24 = vsub.f32 %v2056_v20, %v2198_v46  ;;  %v1545_v50 = vsub.f32 %v2078_v52, %v2198_v46 }
 0x162   :  { %v1546_v0 = vsub.f32 %v2100_v59, %v2198_v46 }
 0x18f   :  { %v1498_v29 = vpop.xlane.xlu0 %1497 }
 0x190   :  { %v1502_v30 = vsub.f32 %v1498_v29, %v1501_v28 }
 0x192   :  { %v1504_v31 = vmul.f32 8.138683e-05, %v1502_v30 }
 0x194   :  { %v1505_v32 = vmax.f32 %v1504_v31, 0.0 }
 0x196   :  { %1635 = vrsqrt.f32 %v1505_v32  ;;  %vm1508_vm1 = vcmp.eq.f32.partialorder %v1505_v32, inf  ;;  %v1511_v40 = vand.u32 2147483648, %v1505_v32  ;;  %vm1510_vm2 = vcmp.eq.f32.partialorder %v1505_v32, 0.0 }
 0x1a0   :  { %v1636_v37 = vpop.eup %1635 }
 0x1a1   :  { %v1507_v38 = vmul.f32 %v1636_v37, %v1505_v32 }
 0x1a3   :  { %v1509_v41 = vsel %vm1508_vm1, %v1505_v32, %v1507_v38 }
 0x1a4   :  { %v1512_v42 = vsel %vm1510_vm2, %v1511_v40, %v1509_v41 }
 0x1a5   :  { %v1513_v43 = vadd.f32 1e-07, %v1512_v42 }
 0x1a7   :  { %v1554_v45 = vrot.slane %v1513_v43, %v1520_v44 }
 0x1a9   :  { %1637 = vrcp.f32 %v1554_v45 }
 0x1b3   :  { %v1638_v5 = vpop.eup %1637 }
 0x1b4   :  { %v1557_v18 = vmul.f32 %v1638_v5, %v1523_v49  ;;  %v1558_v27 = vmul.f32 %v1638_v5, %v1524_v53  ;;  %v1559_v10 = vmul.f32 %v1638_v5, %v1525_v54  ;;  %v1560_v33 = vmul.f32 %v1638_v5, %v1526_v56 }
 0x1b5   :  { %v1561_v28 = vmul.f32 %v1638_v5, %v1527_v58  ;;  %v1562_v29 = vmul.f32 %v1638_v5, %v1528_v60  ;;  %v1563_v48 = vmul.f32 %v1638_v5, %v1529_v63  ;;  %v1564_v30 = vmul.f32 %v1638_v5, %v1530_v2 }
 0x1b6   :  { %v1565_v31 = vmul.f32 %v1638_v5, %v1531_v7  ;;  %v1566_v32 = vmul.f32 %v1638_v5, %v1532_v9  ;;  %v1567_v62 = vmul.f32 %v1638_v5, %v1533_v11  ;;  %v1568_v34 = vmul.f32 %v1638_v5, %v1534_v13  ;;  %1581 = vst [vmem:[%s2347_s1] sm:$0xff] %v1557_v18 }
 0x1b7   :  { %1582 = vst [vmem:[%s2347_s1 + $0x8] sm:$0xff] %v1558_v27  ;;  %1583 = vst [vmem:[%s2347_s1 + $0x10] sm:$0xff] %v1559_v10  ;;  %v1569_v20 = vmul.f32 %v1638_v5, %v1535_v15  ;;  %v1570_v52 = vmul.f32 %v1638_v5, %v1536_v16  ;;  %v1571_v59 = vmul.f32 %v1638_v5, %v1537_v17 }
 0x1b8   :  { %1584 = vst [vmem:[%s2347_s1 + $0x18] sm:$0xff] %v1560_v33  ;;  %v1572_v35 = vmul.f32 %v1638_v5, %v1538_v19  ;;  %1585 = vst [vmem:[%s2347_s1 + $0x20] sm:$0xff] %v1561_v28  ;;  %v1573_v37 = vmul.f32 %v1638_v5, %v1539_v21  ;;  %v1574_v38 = vmul.f32 %v1638_v5, %v1540_v23 }
 0x1b9   :  { %1586 = vst [vmem:[%s2347_s1 + $0x28] sm:$0xff] %v1562_v29  ;;  %1587 = vst [vmem:[%s2347_s1 + $0x30] sm:$0xff] %v1563_v48  ;;  %v1575_v39 = vmul.f32 %v1638_v5, %v1541_v25  ;;  %v1576_v40 = vmul.f32 %v1638_v5, %v1542_v26  ;;  %v1577_v41 = vmul.f32 %v1638_v5, %v1543_v22 }
 0x1ba   :  { %1588 = vst [vmem:[%s2347_s1 + $0x38] sm:$0xff] %v1564_v30  ;;  %1589 = vst [vmem:[%s2347_s1 + $0x40] sm:$0xff] %v1565_v31  ;;  %v1578_v42 = vmul.f32 %v1638_v5, %v1544_v24  ;;  %v1579_v43 = vmul.f32 %v1638_v5, %v1545_v50  ;;  %v1580_v44 = vmul.f32 %v1638_v5, %v1546_v0 }
 0x1bb   :  { %1590 = vst [vmem:[%s2347_s1 + $0x48] sm:$0xff] %v1566_v32  ;;  %1591 = vst [vmem:[%s2347_s1 + $0x50] sm:$0xff] %v1567_v62 }
 0x1bc   :  { %1592 = vst [vmem:[%s2347_s1 + $0x58] sm:$0xff] %v1568_v34  ;;  %1593 = vst [vmem:[%s2347_s1 + $0x60] sm:$0xff] %v1569_v20 }
 0x1bd   :  { %1594 = vst [vmem:[%s2347_s1 + $0x68] sm:$0xff] %v1570_v52  ;;  %1595 = vst [vmem:[%s2347_s1 + $0x70] sm:$0xff] %v1571_v59 }
 0x1be   :  { %1596 = vst [vmem:[%s2347_s1 + $0x78] sm:$0xff] %v1572_v35  ;;  %1597 = vst [vmem:[%s2347_s1 + $0x80] sm:$0xff] %v1573_v37 }
 0x1bf   :  { %1598 = vst [vmem:[%s2347_s1 + $0x88] sm:$0xff] %v1574_v38  ;;  %1599 = vst [vmem:[%s2347_s1 + $0x90] sm:$0xff] %v1575_v39 }
 0x1c0   :  { %1600 = vst [vmem:[%s2347_s1 + $0x98] sm:$0xff] %v1576_v40  ;;  %1601 = vst [vmem:[%s2347_s1 + $0xa0] sm:$0xff] %v1577_v41 }
 0x1c1   :  { %1602 = vst [vmem:[%s2347_s1 + $0xa8] sm:$0xff] %v1578_v42  ;;  %1603 = vst [vmem:[%s2347_s1 + $0xb0] sm:$0xff] %v1579_v43 }
 0x1c2   :  { %1604 = vst [vmem:[%s2347_s1 + $0xb8] sm:$0xff] %v1580_v44 }

// kernel: forward.8
= control target key start
LH: loop header
LB: loop body
LE: loop exit
PB: predicated region body
PF: predicated region fallthrough
CT: control target
= control target key end

     0   :  { %s1240_s12 = smov 0   ;;  %s1518_s0 = inlined_call_operand.vmem [shape: bf16[2048,128], index: 0, kind: input, shape index: {}]   ;;  %s1519_s1 = inlined_call_operand.vmem [shape: bf16[128,16], index: 1, kind: input, shape index: {}]   ;;  %s1520_s2 = inlined_call_operand.vmem [shape: f32[1,16], index: 2, kind: input, shape index: {}]   ;;  %s1521_s3 = inlined_call_operand.vmem [shape: f32[2048,16], index: 3, kind: output, shape index: {}]  }
   0x1 LB: > { %s976_s13 = sadd.s32 4294967295, %s1218_s12   ;;  %p980_p0 = scmp.ge.s32.totalorder %s1218_s12, 1  ;;  %s1218_s12 = sphi %s1240_s12, %s13_s12  }
   0x2   : > { %p138_p1 = scmp.lt.s32.totalorder %s1218_s12, 5 }
   0x4   : > { %p139_p2 = pnand %p980_p0, %p138_p1 }
   0x5   : > { %v1172_v0 = vld [vmem:[%s1519_s1] sm:$0xff] (!%p139_p2)   ;;  %s981_s16 = sshll.u32 (!%p139_p2), %s976_s13, 6  ;;  %v1173_v1 = vld [vmem:[%s1519_s1 + $0x8] sm:$0xff] (!%p139_p2)   ;;  %v1174_v2 = vld [vmem:[%s1519_s1 + $0x10] sm:$0xff] (!%p139_p2)   ;;  %vm855_vm0 = vcmask (!%p139_p2), 130048  }
   0x6   : > { %142 = sbr.rel (%p139_p2) target bundleno = 314 (0x13a), region = 32  ;;  %p163_p3 = scmp.lt.s32.totalorder (!%p139_p2), %s981_s16, 255  ;;  %1068 = vmatprep.subr.bf16.mxu0 (!%p139_p2), %v1172_v0  ;;  %1148 = vmatprep.subr.bf16.mxu1 (!%p139_p2), %v1172_v0  ;;  %v1175_v3 = vld [vmem:[%s1519_s1 + $0x18] sm:$0xff] (!%p139_p2)   ;;  %v1176_v6 = vld [vmem:[%s1519_s1 + $0x20] sm:$0xff] (!%p139_p2)   ;;  %v1177_v7 = vld [vmem:[%s1519_s1 + $0x28] sm:$0xff] (!%p139_p2)  }
   0x7   : > { %1069 = vmatpush3.bf16.msra.mxu0 (!%p139_p2), %v1172_v0  ;;  %1156 = vmatpush3.bf16.msra.mxu1 (!%p139_p2), %v1172_v0  ;;  %v1178_v8 = vld [vmem:[%s1519_s1 + $0x30] sm:$0xff] (!%p139_p2)   ;;  %v1179_v9 = vld [vmem:[%s1519_s1 + $0x38] sm:$0xff] (!%p139_p2)   ;;  %v1315_v40 = vld [vmem:[%s1520_s2] ss:$0 sm:$0xff] (!%p139_p2) }
   0x8   : > { %1070 = vmatprep.subr.bf16.mxu0 (!%p139_p2), %v1173_v1  ;;  %1149 = vmatprep.subr.bf16.mxu1 (!%p139_p2), %v1173_v1 }
   0xb   : > { %1071 = vmatpush3.bf16.msra.mxu0 (!%p139_p2), %v1173_v1  ;;  %1157 = vmatpush3.bf16.msra.mxu1 (!%p139_p2), %v1173_v1 }
   0xc   : > { %1072 = vmatprep.subr.bf16.mxu0 (!%p139_p2), %v1174_v2  ;;  %1150 = vmatprep.subr.bf16.mxu1 (!%p139_p2), %v1174_v2 }
   0xd   : > { %s1523_s16 = smov (!%p163_p3, %s981_s16), 255 }
   0xe   : > { %s982_s21 = sshll.u32 %s1523_s16, 2  ;;  %s984_s10 = sshll.u32 %s1523_s16, 3 }
   0xf   : > { %s1263_s24 = scalar_lea.vmem %s1518_s0, %s982_s21  ;;  %1073 = vmatpush3.bf16.msra.mxu0 %v1174_v2  ;;  %1158 = vmatpush3.bf16.msra.mxu1 %v1174_v2  ;;  %s1323_s14 = scalar_lea.vmem %s1521_s3, %s984_s10 }
  0x10   : > { %v1180_v4 = vld [vmem:[%s1263_s24] sm:$0xff]   ;;  %1074 = vmatprep.subr.bf16.mxu0 %v1175_v3  ;;  %1151 = vmatprep.subr.bf16.mxu1 %v1175_v3  ;;  %v1182_v10 = vld [vmem:[%s1263_s24 + $0x8] sm:$0xff]   ;;  %v1184_v12 = vld [vmem:[%s1263_s24 + $0x10] sm:$0xff]  }
  0x11   : > { %v1181_v5 = vld [vmem:[%s1263_s24 + $0x80] sm:$0xff]   ;;  %1084 = vmatprep.mubr.bf16.mxu0 %v1180_v4  ;;  %v1183_v11 = vld [vmem:[%s1263_s24 + $0x88] sm:$0xff]   ;;  %v1185_v13 = vld [vmem:[%s1263_s24 + $0x90] sm:$0xff]  }
  0x12   : > { %1116 = vmatprep.mubr.bf16.mxu1 %v1181_v5  ;;  %v1186_v14 = vld [vmem:[%s1263_s24 + $0x18] sm:$0xff]   ;;  %v1188_v16 = vld [vmem:[%s1263_s24 + $0x20] sm:$0xff]   ;;  %v1190_v18 = vld [vmem:[%s1263_s24 + $0x28] sm:$0xff]  }
  0x13   : > { %1075 = vmatpush3.bf16.msra.mxu0 %v1175_v3  ;;  %1159 = vmatpush3.bf16.msra.mxu1 %v1175_v3  ;;  %v1187_v15 = vld [vmem:[%s1263_s24 + $0x98] sm:$0xff]   ;;  %v1189_v17 = vld [vmem:[%s1263_s24 + $0xa0] sm:$0xff]   ;;  %v1191_v19 = vld [vmem:[%s1263_s24 + $0xa8] sm:$0xff]  }
  0x14   : > { %1076 = vmatprep.subr.bf16.mxu0 %v1176_v6  ;;  %1152 = vmatprep.subr.bf16.mxu1 %v1176_v6  ;;  %v1192_v20 = vld [vmem:[%s1263_s24 + $0x30] sm:$0xff]   ;;  %v1194_v22 = vld [vmem:[%s1263_s24 + $0x38] sm:$0xff]   ;;  %v1196_v24 = vld [vmem:[%s1263_s24 + $0x40] sm:$0xff]  }
  0x15   : > { %v1193_v21 = vld [vmem:[%s1263_s24 + $0xb0] sm:$0xff]   ;;  %v1195_v23 = vld [vmem:[%s1263_s24 + $0xb8] sm:$0xff]   ;;  %v1197_v25 = vld [vmem:[%s1263_s24 + $0xc0] sm:$0xff]  }
  0x16   : > { %v1198_v26 = vld [vmem:[%s1263_s24 + $0x48] sm:$0xff]   ;;  %v1200_v28 = vld [vmem:[%s1263_s24 + $0x50] sm:$0xff]   ;;  %v1202_v30 = vld [vmem:[%s1263_s24 + $0x58] sm:$0xff]  }
  0x17   : > { %1077 = vmatpush3.bf16.msra.mxu0 %v1176_v6  ;;  %1160 = vmatpush3.bf16.msra.mxu1 %v1176_v6  ;;  %v1199_v27 = vld [vmem:[%s1263_s24 + $0xc8] sm:$0xff]   ;;  %v1201_v29 = vld [vmem:[%s1263_s24 + $0xd0] sm:$0xff]   ;;  %v1203_v31 = vld [vmem:[%s1263_s24 + $0xd8] sm:$0xff]  }
  0x18   : > { %1078 = vmatprep.subr.bf16.mxu0 %v1177_v7  ;;  %1153 = vmatprep.subr.bf16.mxu1 %v1177_v7  ;;  %v1204_v32 = vld [vmem:[%s1263_s24 + $0x60] sm:$0xff]   ;;  %v1206_v34 = vld [vmem:[%s1263_s24 + $0x68] sm:$0xff]   ;;  %v1208_v36 = vld [vmem:[%s1263_s24 + $0x70] sm:$0xff]  }
  0x19   : > { %v1205_v33 = vld [vmem:[%s1263_s24 + $0xe0] sm:$0xff]   ;;  %v1207_v35 = vld [vmem:[%s1263_s24 + $0xe8] sm:$0xff]   ;;  %v1209_v37 = vld [vmem:[%s1263_s24 + $0xf0] sm:$0xff]  }
  0x1a   : > { %v1210_v38 = vld [vmem:[%s1263_s24 + $0x78] sm:$0xff]  }
  0x1b   : > { %1079 = vmatpush3.bf16.msra.mxu0 %v1177_v7  ;;  %1161 = vmatpush3.bf16.msra.mxu1 %v1177_v7  ;;  %v1211_v39 = vld [vmem:[%s1263_s24 + $0xf8] sm:$0xff]  }
  0x1c   : > { %1080 = vmatprep.subr.bf16.mxu0 %v1178_v8  ;;  %1154 = vmatprep.subr.bf16.mxu1 %v1178_v8 }
  0x1f   : > { %1081 = vmatpush3.bf16.msra.mxu0 %v1178_v8  ;;  %1162 = vmatpush3.bf16.msra.mxu1 %v1178_v8 }
  0x20   : > { %1082 = vmatprep.subr.bf16.mxu0 %v1179_v9  ;;  %1155 = vmatprep.subr.bf16.mxu1 %v1179_v9 }
  0x23   : > { %1083 = vmatpush3.bf16.msra.mxu0 %v1179_v9  ;;  %1163 = vmatpush3.bf16.msra.mxu1 %v1179_v9 }
  0x26   : > { %1085 = vmatmul.mubr.bf16.vlgmr.msra.gmra.mrb[0].mxu0 %v1182_v10  ;;  %1117 = vmatmul.mubr.bf16.vlgmr.msra.gmra.mrb[0].mxu1 %v1183_v11 }
  0x27   : > { %1088 = vmatprep.mubr.bf16.mxu0 %v1184_v12  ;;  %1120 = vmatprep.mubr.bf16.mxu1 %v1185_v13 }
  0x2e   : > { %1089 = vmatmul.mubr.bf16.gmra.mrb[4].mxu0 %v1186_v14  ;;  %1121 = vmatmul.mubr.bf16.gmra.mrb[4].mxu1 %v1187_v15 }
  0x2f   : > { %1092 = vmatprep.mubr.bf16.mxu0 %v1188_v16  ;;  %1124 = vmatprep.mubr.bf16.mxu1 %v1189_v17 }
  0x36   : > { %1093 = vmatmul.mubr.bf16.gmra.mrb[8].mxu0 %v1190_v18  ;;  %1125 = vmatmul.mubr.bf16.gmra.mrb[8].mxu1 %v1191_v19 }
  0x37   : > { %1096 = vmatprep.mubr.bf16.mxu0 %v1192_v20  ;;  %1128 = vmatprep.mubr.bf16.mxu1 %v1193_v21 }
  0x3e   : > { %1097 = vmatmul.mubr.bf16.gmra.mrb[12].mxu0 %v1194_v22  ;;  %1129 = vmatmul.mubr.bf16.gmra.mrb[12].mxu1 %v1195_v23 }
  0x3f   : > { %1100 = vmatprep.mubr.bf16.mxu0 %v1196_v24  ;;  %1132 = vmatprep.mubr.bf16.mxu1 %v1197_v25 }
  0x46   : > { %1101 = vmatmul.mubr.bf16.gmra.mrb[16].mxu0 %v1198_v26  ;;  %1133 = vmatmul.mubr.bf16.gmra.mrb[16].mxu1 %v1199_v27 }
  0x47   : > { %1104 = vmatprep.mubr.bf16.mxu0 %v1200_v28  ;;  %1136 = vmatprep.mubr.bf16.mxu1 %v1201_v29 }
  0x4e   : > { %1105 = vmatmul.mubr.bf16.gmra.mrb[20].mxu0 %v1202_v30  ;;  %1137 = vmatmul.mubr.bf16.gmra.mrb[20].mxu1 %v1203_v31 }
  0x4f   : > { %1108 = vmatprep.mubr.bf16.mxu0 %v1204_v32  ;;  %1140 = vmatprep.mubr.bf16.mxu1 %v1205_v33 }
  0x56   : > { %1109 = vmatmul.mubr.bf16.gmra.mrb[24].mxu0 %v1206_v34  ;;  %1141 = vmatmul.mubr.bf16.gmra.mrb[24].mxu1 %v1207_v35 }
  0x57   : > { %1112 = vmatprep.mubr.bf16.mxu0 %v1208_v36  ;;  %1144 = vmatprep.mubr.bf16.mxu1 %v1209_v37 }
  0x5e   : > { %1113 = vmatmul.mubr.bf16.gmra.mrb[28].mxu0 %v1210_v38  ;;  %1145 = vmatmul.mubr.bf16.gmra.mrb[28].mxu1 %v1211_v39 }
  0xf9   : > { %v1086_v41 = vpop.f32.mrb[0].mxu0  ;;  %v1118_v42 = vpop.f32.mrb[0].mxu1 }
  0xfa   : > { %v545_v43 = vadd.f32 %v1086_v41, %v1315_v40  ;;  %v673_v44 = vadd.f32 %v1118_v42, %v1315_v40  ;;  %v536_v45 = vpop.f32.mrb[1].mxu0  ;;  %v664_v46 = vpop.f32.mrb[1].mxu1 }
  0xfb   : > { %v537_v47 = vadd.f32 %v1315_v40, %v536_v45  ;;  %v665_v48 = vadd.f32 %v1315_v40, %v664_v46  ;;  %v1087_v49 = vpop.f32.mrb[2].mxu0  ;;  %v1119_v50 = vpop.f32.mrb[2].mxu1 }
  0xfc   : > { %v793_v51 = vmax.f32 %v545_v43, 0.0  ;;  %v825_v52 = vmax.f32 %v673_v44, 0.0  ;;  %v548_v53 = vadd.f32 %v1087_v49, %v1315_v40  ;;  %v676_v54 = vadd.f32 %v1119_v50, %v1315_v40  ;;  %v539_v55 = vpop.f32.mrb[3].mxu0  ;;  %v667_v56 = vpop.f32.mrb[3].mxu1 }
  0xfd   : > { %v791_v57 = vmax.f32 %v537_v47, 0.0  ;;  %v823_v58 = vmax.f32 %v665_v48, 0.0  ;;  %v540_v59 = vadd.f32 %v1315_v40, %v539_v55  ;;  %v668_v60 = vadd.f32 %v1315_v40, %v667_v56 }
  0xfe   : > { %858 = vst.msk [vmem:[%s1323_s14 + $0x10] sm:$0xff] %vm855_vm0, %v793_v51  ;;  %890 = vst.msk [vmem:[%s1323_s14 + $0x110] sm:$0xff] %vm855_vm0, %v825_v52  ;;  %v794_v61 = vmax.f32 %v548_v53, 0.0  ;;  %v826_v62 = vmax.f32 %v676_v54, 0.0 }
  0xff   : > { %856 = vst.msk [vmem:[%s1323_s14] sm:$0xff] %vm855_vm0, %v791_v57  ;;  %888 = vst.msk [vmem:[%s1323_s14 + $0x100] sm:$0xff] %vm855_vm0, %v823_v58  ;;  %v792_v63 = vmax.f32 %v540_v59, 0.0  ;;  %v824_v0 = vmax.f32 %v668_v60, 0.0 }
 0x100   : > { %859 = vst.msk [vmem:[%s1323_s14 + $0x18] sm:$0xff] %vm855_vm0, %v794_v61  ;;  %891 = vst.msk [vmem:[%s1323_s14 + $0x118] sm:$0xff] %vm855_vm0, %v826_v62 }
 0x101   : > { %857 = vst.msk [vmem:[%s1323_s14 + $0x8] sm:$0xff] %vm855_vm0, %v792_v63  ;;  %889 = vst.msk [vmem:[%s1323_s14 + $0x108] sm:$0xff] %vm855_vm0, %v824_v0  ;;  %v1090_v1 = vpop.f32.mrb[4].mxu0  ;;  %v1122_v2 = vpop.f32.mrb[4].mxu1 }
 0x102   : > { %v561_v3 = vadd.f32 %v1090_v1, %v1315_v40  ;;  %v689_v4 = vadd.f32 %v1122_v2, %v1315_v40  ;;  %v552_v5 = vpop.f32.mrb[5].mxu0  ;;  %v680_v6 = vpop.f32.mrb[5].mxu1 }
 0x103   : > { %v553_v7 = vadd.f32 %v1315_v40, %v552_v5  ;;  %v681_v8 = vadd.f32 %v1315_v40, %v680_v6  ;;  %v1091_v9 = vpop.f32.mrb[6].mxu0  ;;  %v1123_v10 = vpop.f32.mrb[6].mxu1 }
 0x104   : > { %v797_v11 = vmax.f32 %v561_v3, 0.0  ;;  %v829_v12 = vmax.f32 %v689_v4, 0.0  ;;  %v564_v13 = vadd.f32 %v1091_v9, %v1315_v40  ;;  %v692_v14 = vadd.f32 %v1123_v10, %v1315_v40  ;;  %v555_v15 = vpop.f32.mrb[7].mxu0  ;;  %v683_v16 = vpop.f32.mrb[7].mxu1 }
 0x105   : > { %v795_v17 = vmax.f32 %v553_v7, 0.0  ;;  %v827_v18 = vmax.f32 %v681_v8, 0.0  ;;  %v556_v19 = vadd.f32 %v1315_v40, %v555_v15  ;;  %v684_v20 = vadd.f32 %v1315_v40, %v683_v16 }
 0x106   : > { %862 = vst.msk [vmem:[%s1323_s14 + $0x30] sm:$0xff] %vm855_vm0, %v797_v11  ;;  %894 = vst.msk [vmem:[%s1323_s14 + $0x130] sm:$0xff] %vm855_vm0, %v829_v12  ;;  %v798_v21 = vmax.f32 %v564_v13, 0.0  ;;  %v830_v22 = vmax.f32 %v692_v14, 0.0 }
 0x107   : > { %860 = vst.msk [vmem:[%s1323_s14 + $0x20] sm:$0xff] %vm855_vm0, %v795_v17  ;;  %892 = vst.msk [vmem:[%s1323_s14 + $0x120] sm:$0xff] %vm855_vm0, %v827_v18  ;;  %v796_v23 = vmax.f32 %v556_v19, 0.0  ;;  %v828_v24 = vmax.f32 %v684_v20, 0.0 }
 0x108   : > { %863 = vst.msk [vmem:[%s1323_s14 + $0x38] sm:$0xff] %vm855_vm0, %v798_v21  ;;  %895 = vst.msk [vmem:[%s1323_s14 + $0x138] sm:$0xff] %vm855_vm0, %v830_v22 }
 0x109   : > { %861 = vst.msk [vmem:[%s1323_s14 + $0x28] sm:$0xff] %vm855_vm0, %v796_v23  ;;  %893 = vst.msk [vmem:[%s1323_s14 + $0x128] sm:$0xff] %vm855_vm0, %v828_v24  ;;  %v1094_v25 = vpop.f32.mrb[8].mxu0  ;;  %v1126_v26 = vpop.f32.mrb[8].mxu1 }
 0x10a   : > { %v577_v27 = vadd.f32 %v1094_v25, %v1315_v40  ;;  %v705_v28 = vadd.f32 %v1126_v26, %v1315_v40  ;;  %v568_v29 = vpop.f32.mrb[9].mxu0  ;;  %v696_v30 = vpop.f32.mrb[9].mxu1 }
 0x10b   : > { %v569_v31 = vadd.f32 %v1315_v40, %v568_v29  ;;  %v697_v32 = vadd.f32 %v1315_v40, %v696_v30  ;;  %v1095_v33 = vpop.f32.mrb[10].mxu0  ;;  %v1127_v34 = vpop.f32.mrb[10].mxu1 }
 0x10c   : > { %v801_v35 = vmax.f32 %v577_v27, 0.0  ;;  %v833_v36 = vmax.f32 %v705_v28, 0.0  ;;  %v580_v37 = vadd.f32 %v1095_v33, %v1315_v40  ;;  %v708_v38 = vadd.f32 %v1127_v34, %v1315_v40  ;;  %v571_v39 = vpop.f32.mrb[11].mxu0  ;;  %v699_v41 = vpop.f32.mrb[11].mxu1 }
 0x10d   : > { %v799_v42 = vmax.f32 %v569_v31, 0.0  ;;  %v831_v43 = vmax.f32 %v697_v32, 0.0  ;;  %v572_v44 = vadd.f32 %v1315_v40, %v571_v39  ;;  %v700_v45 = vadd.f32 %v1315_v40, %v699_v41 }
 0x10e   : > { %866 = vst.msk [vmem:[%s1323_s14 + $0x50] sm:$0xff] %vm855_vm0, %v801_v35  ;;  %898 = vst.msk [vmem:[%s1323_s14 + $0x150] sm:$0xff] %vm855_vm0, %v833_v36  ;;  %v802_v46 = vmax.f32 %v580_v37, 0.0  ;;  %v834_v47 = vmax.f32 %v708_v38, 0.0 }
 0x10f   : > { %864 = vst.msk [vmem:[%s1323_s14 + $0x40] sm:$0xff] %vm855_vm0, %v799_v42  ;;  %896 = vst.msk [vmem:[%s1323_s14 + $0x140] sm:$0xff] %vm855_vm0, %v831_v43  ;;  %v800_v48 = vmax.f32 %v572_v44, 0.0  ;;  %v832_v49 = vmax.f32 %v700_v45, 0.0 }
 0x110   : > { %867 = vst.msk [vmem:[%s1323_s14 + $0x58] sm:$0xff] %vm855_vm0, %v802_v46  ;;  %899 = vst.msk [vmem:[%s1323_s14 + $0x158] sm:$0xff] %vm855_vm0, %v834_v47 }
 0x111   : > { %865 = vst.msk [vmem:[%s1323_s14 + $0x48] sm:$0xff] %vm855_vm0, %v800_v48  ;;  %897 = vst.msk [vmem:[%s1323_s14 + $0x148] sm:$0xff] %vm855_vm0, %v832_v49  ;;  %v1098_v50 = vpop.f32.mrb[12].mxu0  ;;  %v1130_v51 = vpop.f32.mrb[12].mxu1 }
 0x112   : > { %v593_v52 = vadd.f32 %v1098_v50, %v1315_v40  ;;  %v721_v53 = vadd.f32 %v1130_v51, %v1315_v40  ;;  %v584_v54 = vpop.f32.mrb[13].mxu0  ;;  %v712_v55 = vpop.f32.mrb[13].mxu1 }
 0x113   : > { %v585_v56 = vadd.f32 %v1315_v40, %v584_v54  ;;  %v713_v57 = vadd.f32 %v1315_v40, %v712_v55  ;;  %v1099_v58 = vpop.f32.mrb[14].mxu0  ;;  %v1131_v59 = vpop.f32.mrb[14].mxu1 }
 0x114   : > { %v805_v60 = vmax.f32 %v593_v52, 0.0  ;;  %v837_v61 = vmax.f32 %v721_v53, 0.0  ;;  %v596_v62 = vadd.f32 %v1099_v58, %v1315_v40  ;;  %v724_v63 = vadd.f32 %v1131_v59, %v1315_v40  ;;  %v587_v0 = vpop.f32.mrb[15].mxu0  ;;  %v715_v1 = vpop.f32.mrb[15].mxu1 }
 0x115   : > { %v803_v2 = vmax.f32 %v585_v56, 0.0  ;;  %v835_v3 = vmax.f32 %v713_v57, 0.0  ;;  %v588_v4 = vadd.f32 %v1315_v40, %v587_v0  ;;  %v716_v5 = vadd.f32 %v1315_v40, %v715_v1 }
 0x116   : > { %870 = vst.msk [vmem:[%s1323_s14 + $0x70] sm:$0xff] %vm855_vm0, %v805_v60  ;;  %902 = vst.msk [vmem:[%s1323_s14 + $0x170] sm:$0xff] %vm855_vm0, %v837_v61  ;;  %v806_v6 = vmax.f32 %v596_v62, 0.0  ;;  %v838_v7 = vmax.f32 %v724_v63, 0.0 }
 0x117   : > { %868 = vst.msk [vmem:[%s1323_s14 + $0x60] sm:$0xff] %vm855_vm0, %v803_v2  ;;  %900 = vst.msk [vmem:[%s1323_s14 + $0x160] sm:$0xff] %vm855_vm0, %v835_v3  ;;  %v804_v8 = vmax.f32 %v588_v4, 0.0  ;;  %v836_v9 = vmax.f32 %v716_v5, 0.0 }
 0x118   : > { %871 = vst.msk [vmem:[%s1323_s14 + $0x78] sm:$0xff] %vm855_vm0, %v806_v6  ;;  %903 = vst.msk [vmem:[%s1323_s14 + $0x178] sm:$0xff] %vm855_vm0, %v838_v7 }
 0x119   : > { %869 = vst.msk [vmem:[%s1323_s14 + $0x68] sm:$0xff] %vm855_vm0, %v804_v8  ;;  %901 = vst.msk [vmem:[%s1323_s14 + $0x168] sm:$0xff] %vm855_vm0, %v836_v9  ;;  %v1102_v10 = vpop.f32.mrb[16].mxu0  ;;  %v1134_v11 = vpop.f32.mrb[16].mxu1 }
 0x11a   : > { %v609_v12 = vadd.f32 %v1102_v10, %v1315_v40  ;;  %v737_v13 = vadd.f32 %v1134_v11, %v1315_v40  ;;  %v600_v14 = vpop.f32.mrb[17].mxu0  ;;  %v728_v15 = vpop.f32.mrb[17].mxu1 }
 0x11b   : > { %v601_v16 = vadd.f32 %v1315_v40, %v600_v14  ;;  %v729_v17 = vadd.f32 %v1315_v40, %v728_v15  ;;  %v1103_v18 = vpop.f32.mrb[18].mxu0  ;;  %v1135_v19 = vpop.f32.mrb[18].mxu1 }
 0x11c   : > { %v809_v20 = vmax.f32 %v609_v12, 0.0  ;;  %v841_v21 = vmax.f32 %v737_v13, 0.0  ;;  %v612_v22 = vadd.f32 %v1103_v18, %v1315_v40  ;;  %v740_v23 = vadd.f32 %v1135_v19, %v1315_v40  ;;  %v603_v24 = vpop.f32.mrb[19].mxu0  ;;  %v731_v25 = vpop.f32.mrb[19].mxu1 }
 0x11d   : > { %v807_v26 = vmax.f32 %v601_v16, 0.0  ;;  %v839_v27 = vmax.f32 %v729_v17, 0.0  ;;  %v604_v28 = vadd.f32 %v1315_v40, %v603_v24  ;;  %v732_v29 = vadd.f32 %v1315_v40, %v731_v25 }
 0x11e   : > { %874 = vst.msk [vmem:[%s1323_s14 + $0x90] sm:$0xff] %vm855_vm0, %v809_v20  ;;  %906 = vst.msk [vmem:[%s1323_s14 + $0x190] sm:$0xff] %vm855_vm0, %v841_v21  ;;  %v810_v30 = vmax.f32 %v612_v22, 0.0  ;;  %v842_v31 = vmax.f32 %v740_v23, 0.0 }
 0x11f   : > { %872 = vst.msk [vmem:[%s1323_s14 + $0x80] sm:$0xff] %vm855_vm0, %v807_v26  ;;  %904 = vst.msk [vmem:[%s1323_s14 + $0x180] sm:$0xff] %vm855_vm0, %v839_v27  ;;  %v808_v32 = vmax.f32 %v604_v28, 0.0  ;;  %v840_v33 = vmax.f32 %v732_v29, 0.0 }
 0x120   : > { %875 = vst.msk [vmem:[%s1323_s14 + $0x98] sm:$0xff] %vm855_vm0, %v810_v30  ;;  %907 = vst.msk [vmem:[%s1323_s14 + $0x198] sm:$0xff] %vm855_vm0, %v842_v31 }
 0x121   : > { %873 = vst.msk [vmem:[%s1323_s14 + $0x88] sm:$0xff] %vm855_vm0, %v808_v32  ;;  %905 = vst.msk [vmem:[%s1323_s14 + $0x188] sm:$0xff] %vm855_vm0, %v840_v33  ;;  %v1106_v34 = vpop.f32.mrb[20].mxu0  ;;  %v1138_v35 = vpop.f32.mrb[20].mxu1 }
 0x122   : > { %v625_v36 = vadd.f32 %v1106_v34, %v1315_v40  ;;  %v753_v37 = vadd.f32 %v1138_v35, %v1315_v40  ;;  %v616_v38 = vpop.f32.mrb[21].mxu0  ;;  %v744_v39 = vpop.f32.mrb[21].mxu1 }
 0x123   : > { %v617_v41 = vadd.f32 %v1315_v40, %v616_v38  ;;  %v745_v42 = vadd.f32 %v1315_v40, %v744_v39  ;;  %v1107_v43 = vpop.f32.mrb[22].mxu0  ;;  %v1139_v44 = vpop.f32.mrb[22].mxu1 }
 0x124   : > { %v813_v45 = vmax.f32 %v625_v36, 0.0  ;;  %v845_v46 = vmax.f32 %v753_v37, 0.0  ;;  %v628_v47 = vadd.f32 %v1107_v43, %v1315_v40  ;;  %v756_v48 = vadd.f32 %v1139_v44, %v1315_v40  ;;  %v619_v49 = vpop.f32.mrb[23].mxu0  ;;  %v747_v50 = vpop.f32.mrb[23].mxu1 }
 0x125   : > { %v811_v51 = vmax.f32 %v617_v41, 0.0  ;;  %v843_v52 = vmax.f32 %v745_v42, 0.0  ;;  %v620_v53 = vadd.f32 %v1315_v40, %v619_v49  ;;  %v748_v54 = vadd.f32 %v1315_v40, %v747_v50 }
 0x126   : > { %878 = vst.msk [vmem:[%s1323_s14 + $0xb0] sm:$0xff] %vm855_vm0, %v813_v45  ;;  %910 = vst.msk [vmem:[%s1323_s14 + $0x1b0] sm:$0xff] %vm855_vm0, %v845_v46  ;;  %v814_v55 = vmax.f32 %v628_v47, 0.0  ;;  %v846_v56 = vmax.f32 %v756_v48, 0.0 }
 0x127   : > { %876 = vst.msk [vmem:[%s1323_s14 + $0xa0] sm:$0xff] %vm855_vm0, %v811_v51  ;;  %908 = vst.msk [vmem:[%s1323_s14 + $0x1a0] sm:$0xff] %vm855_vm0, %v843_v52  ;;  %v812_v57 = vmax.f32 %v620_v53, 0.0  ;;  %v844_v58 = vmax.f32 %v748_v54, 0.0 }
 0x128   : > { %879 = vst.msk [vmem:[%s1323_s14 + $0xb8] sm:$0xff] %vm855_vm0, %v814_v55  ;;  %911 = vst.msk [vmem:[%s1323_s14 + $0x1b8] sm:$0xff] %vm855_vm0, %v846_v56 }
 0x129   : > { %877 = vst.msk [vmem:[%s1323_s14 + $0xa8] sm:$0xff] %vm855_vm0, %v812_v57  ;;  %909 = vst.msk [vmem:[%s1323_s14 + $0x1a8] sm:$0xff] %vm855_vm0, %v844_v58  ;;  %v1110_v59 = vpop.f32.mrb[24].mxu0  ;;  %v1142_v60 = vpop.f32.mrb[24].mxu1 }
 0x12a   : > { %v641_v61 = vadd.f32 %v1110_v59, %v1315_v40  ;;  %v769_v62 = vadd.f32 %v1142_v60, %v1315_v40  ;;  %v632_v63 = vpop.f32.mrb[25].mxu0  ;;  %v760_v0 = vpop.f32.mrb[25].mxu1 }
 0x12b   : > { %v633_v1 = vadd.f32 %v1315_v40, %v632_v63  ;;  %v761_v2 = vadd.f32 %v1315_v40, %v760_v0  ;;  %v1111_v3 = vpop.f32.mrb[26].mxu0  ;;  %v1143_v4 = vpop.f32.mrb[26].mxu1 }
 0x12c   : > { %v817_v5 = vmax.f32 %v641_v61, 0.0  ;;  %v849_v6 = vmax.f32 %v769_v62, 0.0  ;;  %v644_v7 = vadd.f32 %v1111_v3, %v1315_v40  ;;  %v772_v8 = vadd.f32 %v1143_v4, %v1315_v40  ;;  %v635_v9 = vpop.f32.mrb[27].mxu0  ;;  %v763_v10 = vpop.f32.mrb[27].mxu1 }
 0x12d   : > { %v815_v11 = vmax.f32 %v633_v1, 0.0  ;;  %v847_v12 = vmax.f32 %v761_v2, 0.0  ;;  %v636_v13 = vadd.f32 %v1315_v40, %v635_v9  ;;  %v764_v14 = vadd.f32 %v1315_v40, %v763_v10 }
 0x12e   : > { %882 = vst.msk [vmem:[%s1323_s14 + $0xd0] sm:$0xff] %vm855_vm0, %v817_v5  ;;  %914 = vst.msk [vmem:[%s1323_s14 + $0x1d0] sm:$0xff] %vm855_vm0, %v849_v6  ;;  %v818_v15 = vmax.f32 %v644_v7, 0.0  ;;  %v850_v16 = vmax.f32 %v772_v8, 0.0 }
 0x12f   : > { %880 = vst.msk [vmem:[%s1323_s14 + $0xc0] sm:$0xff] %vm855_vm0, %v815_v11  ;;  %912 = vst.msk [vmem:[%s1323_s14 + $0x1c0] sm:$0xff] %vm855_vm0, %v847_v12  ;;  %v816_v17 = vmax.f32 %v636_v13, 0.0  ;;  %v848_v18 = vmax.f32 %v764_v14, 0.0 }
 0x130   : > { %883 = vst.msk [vmem:[%s1323_s14 + $0xd8] sm:$0xff] %vm855_vm0, %v818_v15  ;;  %915 = vst.msk [vmem:[%s1323_s14 + $0x1d8] sm:$0xff] %vm855_vm0, %v850_v16 }
 0x131   : > { %881 = vst.msk [vmem:[%s1323_s14 + $0xc8] sm:$0xff] %vm855_vm0, %v816_v17  ;;  %913 = vst.msk [vmem:[%s1323_s14 + $0x1c8] sm:$0xff] %vm855_vm0, %v848_v18  ;;  %v1114_v19 = vpop.f32.mrb[28].mxu0  ;;  %v1146_v20 = vpop.f32.mrb[28].mxu1 }
 0x132   : > { %v657_v21 = vadd.f32 %v1114_v19, %v1315_v40  ;;  %v785_v22 = vadd.f32 %v1146_v20, %v1315_v40  ;;  %v648_v23 = vpop.f32.mrb[29].mxu0  ;;  %v776_v24 = vpop.f32.mrb[29].mxu1 }
 0x133   : > { %v649_v25 = vadd.f32 %v1315_v40, %v648_v23  ;;  %v777_v26 = vadd.f32 %v1315_v40, %v776_v24  ;;  %v1115_v27 = vpop.f32.mrb[30].mxu0  ;;  %v1147_v28 = vpop.f32.mrb[30].mxu1 }
 0x134   : > { %v821_v29 = vmax.f32 %v657_v21, 0.0  ;;  %v853_v30 = vmax.f32 %v785_v22, 0.0  ;;  %v660_v31 = vadd.f32 %v1115_v27, %v1315_v40  ;;  %v788_v32 = vadd.f32 %v1147_v28, %v1315_v40  ;;  %v651_v33 = vpop.f32.mrb[31].mxu0  ;;  %v779_v34 = vpop.f32.mrb[31].mxu1 }
 0x135   : > { %v819_v35 = vmax.f32 %v649_v25, 0.0  ;;  %v851_v36 = vmax.f32 %v777_v26, 0.0  ;;  %v652_v37 = vadd.f32 %v1315_v40, %v651_v33  ;;  %v780_v38 = vadd.f32 %v1315_v40, %v779_v34 }
 0x136   : > { %886 = vst.msk [vmem:[%s1323_s14 + $0xf0] sm:$0xff] %vm855_vm0, %v821_v29  ;;  %918 = vst.msk [vmem:[%s1323_s14 + $0x1f0] sm:$0xff] %vm855_vm0, %v853_v30  ;;  %v822_v39 = vmax.f32 %v660_v31, 0.0  ;;  %v854_v41 = vmax.f32 %v788_v32, 0.0 }
 0x137   : > { %884 = vst.msk [vmem:[%s1323_s14 + $0xe0] sm:$0xff] %vm855_vm0, %v819_v35  ;;  %916 = vst.msk [vmem:[%s1323_s14 + $0x1e0] sm:$0xff] %vm855_vm0, %v851_v36  ;;  %v820_v42 = vmax.f32 %v652_v37, 0.0  ;;  %v852_v43 = vmax.f32 %v780_v38, 0.0 }
 0x138   : > { %887 = vst.msk [vmem:[%s1323_s14 + $0xf8] sm:$0xff] %vm855_vm0, %v822_v39  ;;  %919 = vst.msk [vmem:[%s1323_s14 + $0x1f8] sm:$0xff] %vm855_vm0, %v854_v41 }
 0x139   : > { %885 = vst.msk [vmem:[%s1323_s14 + $0xe8] sm:$0xff] %vm855_vm0, %v820_v42  ;;  %917 = vst.msk [vmem:[%s1323_s14 + $0x1e8] sm:$0xff] %vm855_vm0, %v852_v43 }
 0x13a PF: > { %s13_s12 = sadd.s32 1, %s1218_s12  }
 0x13b   : > { %p10_p4 = scmp.ge.s32.totalorder %s13_s12, 6  }
 0x13d   :  { %12 = sbr.rel (!%p10_p4) target bundleno = 1 (0x1), region = 62 }

// kernel: forward.9
= control target key start
LH: loop header
LB: loop body
LE: loop exit
PB: predicated region body
PF: predicated region fallthrough
CT: control target
= control target key end

     0   :  { %v1087_v0 = vmov 0   ;;  %vm815_vm0 = vcmask 261120   ;;  %s1649_s1 = inlined_call_operand.vmem [shape: bf16[256,32], index: 1, kind: input, shape index: {}]   ;;  %s1650_s0 = inlined_call_operand.vmem [shape: bf16[456,256], index: 0, kind: input, shape index: {}]   ;;  %s1651_s2 = inlined_call_operand.vmem [shape: f32[1,32], index: 2, kind: input, shape index: {}]   ;;  %s1652_s3 = inlined_call_operand.vmem [shape: f32[456,32], index: 3, kind: output, shape index: {}]  }
   0x1   :  { %494 = vmatprep.subr.bf16.mxu0 %v1087_v0  ;;  %v985_v1 = vld [vmem:[%s1649_s1] sm:$0xff]   ;;  %952 = vmatprep.subr.bf16.mxu1 %v1087_v0  ;;  %v986_v2 = vld [vmem:[%s1649_s1 + $0x8] sm:$0xff]   ;;  %v987_v3 = vld [vmem:[%s1649_s1 + $0x10] sm:$0xff]  }
   0x2   :  { %495 = vmatpush1.bf16.msra.mxu0 %v985_v1  ;;  %968 = vmatpush1.bf16.msra.mxu1 %v985_v1  ;;  %v988_v4 = vld [vmem:[%s1649_s1 + $0x18] sm:$0xff]   ;;  %v989_v5 = vld [vmem:[%s1649_s1 + $0x20] sm:$0xff]   ;;  %v990_v7 = vld [vmem:[%s1649_s1 + $0x28] sm:$0xff]  }
   0x3   :  { %496 = vmatprep.subr.bf16.mxu0 %v1087_v0  ;;  %953 = vmatprep.subr.bf16.mxu1 %v1087_v0  ;;  %v1003_v6 = vld [vmem:[%s1650_s0 + $0x4] ss:$8 sps:$4 sm:$0xff]   ;;  %v1006_v8 = vld [vmem:[%s1650_s0 + $0xf4] ss:$8 sps:$4 sm:$0xff]   ;;  %v1001_v19 = vld [vmem:[%s1650_s0] ss:$8 sps:$4 sm:$0xff]  }
   0x4   :  { %526 = vmatprep.mubr.bf16.mxu0 %v1003_v6  ;;  %646 = vmatprep.mubr.bf16.mxu1 %v1006_v8  ;;  %v991_v9 = vld [vmem:[%s1649_s1 + $0x30] sm:$0xff]   ;;  %v992_v10 = vld [vmem:[%s1649_s1 + $0x38] sm:$0xff]   ;;  %v993_v11 = vld [vmem:[%s1649_s1 + $0x40] sm:$0xff]  }
   0x5   :  { %v994_v12 = vld [vmem:[%s1649_s1 + $0x48] sm:$0xff]   ;;  %v995_v13 = vld [vmem:[%s1649_s1 + $0x50] sm:$0xff]   ;;  %v996_v14 = vld [vmem:[%s1649_s1 + $0x58] sm:$0xff]  }
   0x6   :  { %497 = vmatpush1.bf16.msra.mxu0 %v986_v2  ;;  %969 = vmatpush1.bf16.msra.mxu1 %v986_v2  ;;  %v997_v15 = vld [vmem:[%s1649_s1 + $0x60] sm:$0xff]   ;;  %v998_v16 = vld [vmem:[%s1649_s1 + $0x68] sm:$0xff]   ;;  %v999_v17 = vld [vmem:[%s1649_s1 + $0x70] sm:$0xff]  }
   0x7   :  { %498 = vmatprep.subr.bf16.mxu0 %v1087_v0  ;;  %954 = vmatprep.subr.bf16.mxu1 %v1087_v0  ;;  %v1000_v18 = vld [vmem:[%s1649_s1 + $0x78] sm:$0xff]   ;;  %v1010_v22 = vld [vmem:[%s1650_s0 + $0x104] ss:$8 sps:$4 sm:$0xff]   ;;  %v1014_v24 = vld [vmem:[%s1650_s0 + $0x100] ss:$8 sps:$4 sm:$0xff]  }
   0x8   :  { %v1004_v20 = vld [vmem:[%s1650_s0 + $0xf0] ss:$8 sps:$4 sm:$0xff]   ;;  %v1007_v21 = vld [vmem:[%s1650_s0 + $0x14] ss:$8 sps:$4 sm:$0xff]   ;;  %v1012_v25 = vld [vmem:[%s1650_s0 + $0x24] ss:$8 sps:$4 sm:$0xff]  }
   0x9   :  { %v1009_v23 = vld [vmem:[%s1650_s0 + $0x10] ss:$8 sps:$4 sm:$0xff]   ;;  %v1016_v26 = vld [vmem:[%s1650_s0 + $0x114] ss:$8 sps:$4 sm:$0xff]   ;;  %v1015_v27 = vld [vmem:[%s1650_s0 + $0x20] ss:$8 sps:$4 sm:$0xff]  }
   0xa   :  { %499 = vmatpush1.bf16.msra.mxu0 %v987_v3  ;;  %970 = vmatpush1.bf16.msra.mxu1 %v987_v3  ;;  %v1020_v28 = vld [vmem:[%s1650_s0 + $0x110] ss:$8 sps:$4 sm:$0xff]   ;;  %v1018_v29 = vld [vmem:[%s1650_s0 + $0x34] ss:$8 sps:$4 sm:$0xff]   ;;  %v1022_v30 = vld [vmem:[%s1650_s0 + $0x124] ss:$8 sps:$4 sm:$0xff]  }
   0xb   :  { %500 = vmatprep.subr.bf16.mxu0 %v1087_v0  ;;  %955 = vmatprep.subr.bf16.mxu1 %v1087_v0  ;;  %v1021_v31 = vld [vmem:[%s1650_s0 + $0x30] ss:$8 sps:$4 sm:$0xff]   ;;  %v1026_v32 = vld [vmem:[%s1650_s0 + $0x120] ss:$8 sps:$4 sm:$0xff]   ;;  %v1024_v33 = vld [vmem:[%s1650_s0 + $0x44] ss:$8 sps:$4 sm:$0xff]  }
   0xc   :  { %v1028_v34 = vld [vmem:[%s1650_s0 + $0x134] ss:$8 sps:$4 sm:$0xff]   ;;  %v1027_v35 = vld [vmem:[%s1650_s0 + $0x40] ss:$8 sps:$4 sm:$0xff]   ;;  %v1032_v36 = vld [vmem:[%s1650_s0 + $0x130] ss:$8 sps:$4 sm:$0xff]  }
   0xd   :  { %v1030_v37 = vld [vmem:[%s1650_s0 + $0x54] ss:$8 sps:$4 sm:$0xff]   ;;  %v1034_v38 = vld [vmem:[%s1650_s0 + $0x144] ss:$8 sps:$4 sm:$0xff]   ;;  %v1033_v39 = vld [vmem:[%s1650_s0 + $0x50] ss:$8 sps:$4 sm:$0xff]  }
   0xe   :  { %501 = vmatpush1.bf16.msra.mxu0 %v988_v4  ;;  %971 = vmatpush1.bf16.msra.mxu1 %v988_v4  ;;  %v1038_v40 = vld [vmem:[%s1650_s0 + $0x140] ss:$8 sps:$4 sm:$0xff]   ;;  %v1036_v41 = vld [vmem:[%s1650_s0 + $0x64] ss:$8 sps:$4 sm:$0xff]   ;;  %v1040_v42 = vld [vmem:[%s1650_s0 + $0x154] ss:$8 sps:$4 sm:$0xff]  }
   0xf   :  { %502 = vmatprep.subr.bf16.mxu0 %v1087_v0  ;;  %956 = vmatprep.subr.bf16.mxu1 %v1087_v0  ;;  %v1039_v43 = vld [vmem:[%s1650_s0 + $0x60] ss:$8 sps:$4 sm:$0xff]   ;;  %v1044_v44 = vld [vmem:[%s1650_s0 + $0x150] ss:$8 sps:$4 sm:$0xff]   ;;  %v1042_v45 = vld [vmem:[%s1650_s0 + $0x74] ss:$8 sps:$4 sm:$0xff]  }
  0x10   :  { %v1046_v46 = vld [vmem:[%s1650_s0 + $0x164] ss:$8 sps:$4 sm:$0xff]   ;;  %v1045_v47 = vld [vmem:[%s1650_s0 + $0x70] ss:$8 sps:$4 sm:$0xff]   ;;  %v1050_v48 = vld [vmem:[%s1650_s0 + $0x160] ss:$8 sps:$4 sm:$0xff]  }
  0x11   :  { %v1048_v49 = vld [vmem:[%s1650_s0 + $0x84] ss:$8 sps:$4 sm:$0xff]   ;;  %v1052_v50 = vld [vmem:[%s1650_s0 + $0x174] ss:$8 sps:$4 sm:$0xff]   ;;  %v1051_v51 = vld [vmem:[%s1650_s0 + $0x80] ss:$8 sps:$4 sm:$0xff]  }
  0x12   :  { %503 = vmatpush1.bf16.msra.mxu0 %v989_v5  ;;  %972 = vmatpush1.bf16.msra.mxu1 %v989_v5  ;;  %v1056_v52 = vld [vmem:[%s1650_s0 + $0x170] ss:$8 sps:$4 sm:$0xff]   ;;  %v1054_v53 = vld [vmem:[%s1650_s0 + $0x94] ss:$8 sps:$4 sm:$0xff]   ;;  %v1058_v54 = vld [vmem:[%s1650_s0 + $0x184] ss:$8 sps:$4 sm:$0xff]  }
  0x13   :  { %504 = vmatprep.subr.bf16.mxu0 %v1087_v0  ;;  %957 = vmatprep.subr.bf16.mxu1 %v1087_v0  ;;  %v1057_v55 = vld [vmem:[%s1650_s0 + $0x90] ss:$8 sps:$4 sm:$0xff]   ;;  %v1062_v56 = vld [vmem:[%s1650_s0 + $0x180] ss:$8 sps:$4 sm:$0xff]   ;;  %v1060_v57 = vld [vmem:[%s1650_s0 + $0xa4] ss:$8 sps:$4 sm:$0xff]  }
  0x14   :  { %v1064_v58 = vld [vmem:[%s1650_s0 + $0x194] ss:$8 sps:$4 sm:$0xff]   ;;  %v1063_v59 = vld [vmem:[%s1650_s0 + $0xa0] ss:$8 sps:$4 sm:$0xff]   ;;  %v1068_v60 = vld [vmem:[%s1650_s0 + $0x190] ss:$8 sps:$4 sm:$0xff]  }
  0x15   :  { %v1066_v61 = vld [vmem:[%s1650_s0 + $0xb4] ss:$8 sps:$4 sm:$0xff]   ;;  %v1070_v62 = vld [vmem:[%s1650_s0 + $0x1a4] ss:$8 sps:$4 sm:$0xff]   ;;  %v1069_v63 = vld [vmem:[%s1650_s0 + $0xb0] ss:$8 sps:$4 sm:$0xff]  }
  0x16   :  { %505 = vmatpush1.bf16.msra.mxu0 %v990_v7  ;;  %973 = vmatpush1.bf16.msra.mxu1 %v990_v7  ;;  %v1072_v1 = vld [vmem:[%s1650_s0 + $0xc4] ss:$8 sps:$4 sm:$0xff]   ;;  %v1076_v2 = vld [vmem:[%s1650_s0 + $0x1b4] ss:$8 sps:$4 sm:$0xff]   ;;  %v1075_v4 = vld [vmem:[%s1650_s0 + $0xc0] ss:$8 sps:$4 sm:$0xff]  }
  0x17   :  { %506 = vmatprep.subr.bf16.mxu0 %v1087_v0  ;;  %958 = vmatprep.subr.bf16.mxu1 %v1087_v0  ;;  %v71_v3 = vld [vmem:[%s1650_s0 + $0x1c0] sm:$0xff]  ;;  %v1080_v5 = vld [vmem:[%s1650_s0 + $0x1b0] ss:$8 sps:$4 sm:$0xff]   ;;  %v1078_v6 = vld [vmem:[%s1650_s0 + $0xd4] ss:$8 sps:$4 sm:$0xff]  }
  0x18   :  { %v935_v7 = vcombine.high %v71_v3, %v71_v3  ;;  %v1081_v8 = vld [vmem:[%s1650_s0 + $0xd0] ss:$8 sps:$4 sm:$0xff]  }
  0x1a   :  { %507 = vmatpush1.bf16.msra.mxu0 %v991_v9  ;;  %974 = vmatpush1.bf16.msra.mxu1 %v991_v9  ;;  %v934_v9 = vcombine.low %v71_v3, %v71_v3 }
  0x1b   :  { %508 = vmatprep.subr.bf16.mxu0 %v1087_v0  ;;  %959 = vmatprep.subr.bf16.mxu1 %v1087_v0 }
  0x1e   :  { %509 = vmatpush1.bf16.msra.mxu0 %v992_v10  ;;  %975 = vmatpush1.bf16.msra.mxu1 %v992_v10  ;;  %v1083_v10 = vld [vmem:[%s1650_s0 + $0xe4] ss:$8 sps:$4 sm:$0xff]  }
  0x1f   :  { %510 = vmatprep.subr.bf16.mxu0 %v1087_v0  ;;  %960 = vmatprep.subr.bf16.mxu1 %v1087_v0 }
  0x22   :  { %511 = vmatpush1.bf16.msra.mxu0 %v993_v11  ;;  %976 = vmatpush1.bf16.msra.mxu1 %v993_v11  ;;  %v1086_v11 = vld [vmem:[%s1650_s0 + $0xe0] ss:$8 sps:$4 sm:$0xff]  }
  0x23   :  { %512 = vmatprep.subr.bf16.mxu0 %v1087_v0  ;;  %961 = vmatprep.subr.bf16.mxu1 %v1087_v0 }
  0x26   :  { %513 = vmatpush1.bf16.msra.mxu0 %v994_v12  ;;  %977 = vmatpush1.bf16.msra.mxu1 %v994_v12  ;;  %v1362_v12 = vld [vmem:[%s1651_s2] ss:$0 sm:$0xff] }
  0x27   :  { %514 = vmatprep.subr.bf16.mxu0 %v1087_v0  ;;  %962 = vmatprep.subr.bf16.mxu1 %v1087_v0 }
  0x2a   :  { %515 = vmatpush1.bf16.msra.mxu0 %v995_v13  ;;  %978 = vmatpush1.bf16.msra.mxu1 %v995_v13 }
  0x2b   :  { %516 = vmatprep.subr.bf16.mxu0 %v1087_v0  ;;  %963 = vmatprep.subr.bf16.mxu1 %v1087_v0 }
  0x2e   :  { %517 = vmatpush1.bf16.msra.mxu0 %v996_v14  ;;  %979 = vmatpush1.bf16.msra.mxu1 %v996_v14 }
  0x2f   :  { %518 = vmatprep.subr.bf16.mxu0 %v1087_v0  ;;  %964 = vmatprep.subr.bf16.mxu1 %v1087_v0 }
  0x32   :  { %519 = vmatpush1.bf16.msra.mxu0 %v997_v15  ;;  %980 = vmatpush1.bf16.msra.mxu1 %v997_v15 }
  0x33   :  { %520 = vmatprep.subr.bf16.mxu0 %v1087_v0  ;;  %965 = vmatprep.subr.bf16.mxu1 %v1087_v0 }
  0x36   :  { %521 = vmatpush1.bf16.msra.mxu0 %v998_v16  ;;  %981 = vmatpush1.bf16.msra.mxu1 %v998_v16 }
  0x37   :  { %522 = vmatprep.subr.bf16.mxu0 %v1087_v0  ;;  %966 = vmatprep.subr.bf16.mxu1 %v1087_v0 }
  0x3a   :  { %523 = vmatpush1.bf16.msra.mxu0 %v999_v17  ;;  %982 = vmatpush1.bf16.msra.mxu1 %v999_v17 }
  0x3b   :  { %524 = vmatprep.subr.bf16.mxu0 %v1087_v0  ;;  %967 = vmatprep.subr.bf16.mxu1 %v1087_v0  ;;  %v1074_v0 = vld [vmem:[%s1650_s0 + $0x1a0] ss:$8 sps:$4 sm:$0xff]  }
  0x3e   :  { %525 = vmatpush1.bf16.msra.mxu0 %v1000_v18  ;;  %983 = vmatpush1.bf16.msra.mxu1 %v1000_v18 }
  0x41   :  { %527 = vmatmul.mubr.bf16.vlgmr.msra.gmra.mrb[0].mxu0 %v1001_v19  ;;  %647 = vmatmul.mubr.bf16.vlgmr.msra.gmra.mrb[0].mxu1 %v1004_v20 }
  0x42   :  { %534 = vmatprep.mubr.bf16.mxu0 %v1007_v21  ;;  %654 = vmatprep.mubr.bf16.mxu1 %v1010_v22 }
  0x49   :  { %535 = vmatmul.mubr.bf16.gmra.mrb[4].mxu0 %v1009_v23  ;;  %655 = vmatmul.mubr.bf16.gmra.mrb[4].mxu1 %v1014_v24 }
  0x4a   :  { %542 = vmatprep.mubr.bf16.mxu0 %v1012_v25  ;;  %662 = vmatprep.mubr.bf16.mxu1 %v1016_v26 }
  0x51   :  { %543 = vmatmul.mubr.bf16.gmra.mrb[8].mxu0 %v1015_v27  ;;  %663 = vmatmul.mubr.bf16.gmra.mrb[8].mxu1 %v1020_v28 }
  0x52   :  { %550 = vmatprep.mubr.bf16.mxu0 %v1018_v29  ;;  %670 = vmatprep.mubr.bf16.mxu1 %v1022_v30 }
  0x59   :  { %551 = vmatmul.mubr.bf16.gmra.mrb[12].mxu0 %v1021_v31  ;;  %671 = vmatmul.mubr.bf16.gmra.mrb[12].mxu1 %v1026_v32 }
  0x5a   :  { %558 = vmatprep.mubr.bf16.mxu0 %v1024_v33  ;;  %678 = vmatprep.mubr.bf16.mxu1 %v1028_v34 }
  0x61   :  { %559 = vmatmul.mubr.bf16.gmra.mrb[16].mxu0 %v1027_v35  ;;  %679 = vmatmul.mubr.bf16.gmra.mrb[16].mxu1 %v1032_v36 }
  0x62   :  { %566 = vmatprep.mubr.bf16.mxu0 %v1030_v37  ;;  %686 = vmatprep.mubr.bf16.mxu1 %v1034_v38 }
  0x69   :  { %567 = vmatmul.mubr.bf16.gmra.mrb[20].mxu0 %v1033_v39  ;;  %687 = vmatmul.mubr.bf16.gmra.mrb[20].mxu1 %v1038_v40 }
  0x6a   :  { %574 = vmatprep.mubr.bf16.mxu0 %v1036_v41  ;;  %694 = vmatprep.mubr.bf16.mxu1 %v1040_v42 }
  0x71   :  { %575 = vmatmul.mubr.bf16.gmra.mrb[24].mxu0 %v1039_v43  ;;  %695 = vmatmul.mubr.bf16.gmra.mrb[24].mxu1 %v1044_v44 }
  0x72   :  { %582 = vmatprep.mubr.bf16.mxu0 %v1042_v45  ;;  %702 = vmatprep.mubr.bf16.mxu1 %v1046_v46 }
  0x79   :  { %583 = vmatmul.mubr.bf16.gmra.mrb[28].mxu0 %v1045_v47  ;;  %703 = vmatmul.mubr.bf16.gmra.mrb[28].mxu1 %v1050_v48 }
  0x7a   :  { %590 = vmatprep.mubr.bf16.mxu0 %v1048_v49  ;;  %710 = vmatprep.mubr.bf16.mxu1 %v1052_v50 }
  0x81   :  { %591 = vmatmul.mubr.bf16.gmra.mrb[32].mxu0 %v1051_v51  ;;  %711 = vmatmul.mubr.bf16.gmra.mrb[32].mxu1 %v1056_v52 }
  0x82   :  { %598 = vmatprep.mubr.bf16.mxu0 %v1054_v53  ;;  %718 = vmatprep.mubr.bf16.mxu1 %v1058_v54 }
  0x89   :  { %599 = vmatmul.mubr.bf16.gmra.mrb[36].mxu0 %v1057_v55  ;;  %719 = vmatmul.mubr.bf16.gmra.mrb[36].mxu1 %v1062_v56 }
  0x8a   :  { %606 = vmatprep.mubr.bf16.mxu0 %v1060_v57  ;;  %726 = vmatprep.mubr.bf16.mxu1 %v1064_v58 }
  0x91   :  { %607 = vmatmul.mubr.bf16.gmra.mrb[40].mxu0 %v1063_v59  ;;  %727 = vmatmul.mubr.bf16.gmra.mrb[40].mxu1 %v1068_v60 }
  0x92   :  { %614 = vmatprep.mubr.bf16.mxu0 %v1066_v61  ;;  %734 = vmatprep.mubr.bf16.mxu1 %v1070_v62 }
  0x99   :  { %615 = vmatmul.mubr.bf16.gmra.mrb[44].mxu0 %v1069_v63  ;;  %735 = vmatmul.mubr.bf16.gmra.mrb[44].mxu1 %v1074_v0 }
  0x9a   :  { %622 = vmatprep.mubr.bf16.mxu0 %v1072_v1  ;;  %742 = vmatprep.mubr.bf16.mxu1 %v1076_v2 }
  0xa1   :  { %623 = vmatmul.mubr.bf16.gmra.mrb[48].mxu0 %v1075_v4  ;;  %743 = vmatmul.mubr.bf16.gmra.mrb[48].mxu1 %v1080_v5 }
  0xa2   :  { %630 = vmatprep.mubr.bf16.mxu0 %v1078_v6  ;;  %750 = vmatprep.mubr.bf16.mxu1 %v935_v7 }
  0xa9   :  { %631 = vmatmul.mubr.bf16.gmra.mrb[52].mxu0 %v1081_v8  ;;  %751 = vmatmul.mubr.bf16.gmra.mrb[52].mxu1 %v934_v9 }
  0xaa   :  { %638 = vmatprep.mubr.bf16.mxu0 %v1083_v10 }
  0xb1   :  { %639 = vmatmul.mubr.bf16.gmra.mrb[56].mxu0 %v1086_v11 }
 0x114   :  { %v528_v13 = vpop.f32.mrb[0].mxu0  ;;  %v648_v14 = vpop.f32.mrb[0].mxu1 }
 0x115   :  { %v529_v15 = vadd.f32 %v1362_v12, %v528_v13  ;;  %v530_v16 = vpop.f32.mrb[1].mxu0  ;;  %v649_v17 = vadd.f32 %v1362_v12, %v648_v14  ;;  %v650_v18 = vpop.f32.mrb[1].mxu1 }
 0x116   :  { %v531_v19 = vpop.f32.mrb[2].mxu0  ;;  %v651_v20 = vpop.f32.mrb[2].mxu1 }
 0x117   :  { %v758_v21 = vmax.f32 %v529_v15, 0.0  ;;  %v532_v22 = vadd.f32 %v1362_v12, %v531_v19  ;;  %v533_v23 = vpop.f32.mrb[3].mxu0  ;;  %v788_v24 = vmax.f32 %v649_v17, 0.0  ;;  %v652_v25 = vadd.f32 %v1362_v12, %v651_v20  ;;  %v653_v26 = vpop.f32.mrb[3].mxu1 }
 0x119   :  { %816 = vst.msk [vmem:[%s1652_s3] sm:$0xff] %vm815_vm0, %v758_v21  ;;  %v759_v27 = vmax.f32 %v532_v22, 0.0  ;;  %846 = vst.msk [vmem:[%s1652_s3 + $0xf0] sm:$0xff] %vm815_vm0, %v788_v24  ;;  %v789_v28 = vmax.f32 %v652_v25, 0.0 }
 0x11b   :  { %817 = vst.msk [vmem:[%s1652_s3 + $0x8] sm:$0xff] %vm815_vm0, %v759_v27  ;;  %847 = vst.msk [vmem:[%s1652_s3 + $0xf8] sm:$0xff] %vm815_vm0, %v789_v28 }
 0x11c   :  { %v536_v29 = vpop.f32.mrb[4].mxu0  ;;  %v656_v30 = vpop.f32.mrb[4].mxu1 }
 0x11d   :  { %v537_v31 = vadd.f32 %v1362_v12, %v536_v29  ;;  %v538_v32 = vpop.f32.mrb[5].mxu0  ;;  %v657_v33 = vadd.f32 %v1362_v12, %v656_v30  ;;  %v658_v34 = vpop.f32.mrb[5].mxu1 }
 0x11e   :  { %v539_v35 = vpop.f32.mrb[6].mxu0  ;;  %v659_v36 = vpop.f32.mrb[6].mxu1 }
 0x11f   :  { %v760_v37 = vmax.f32 %v537_v31, 0.0  ;;  %v540_v38 = vadd.f32 %v1362_v12, %v539_v35  ;;  %v541_v39 = vpop.f32.mrb[7].mxu0  ;;  %v790_v40 = vmax.f32 %v657_v33, 0.0  ;;  %v660_v41 = vadd.f32 %v1362_v12, %v659_v36  ;;  %v661_v42 = vpop.f32.mrb[7].mxu1 }
 0x121   :  { %818 = vst.msk [vmem:[%s1652_s3 + $0x10] sm:$0xff] %vm815_vm0, %v760_v37  ;;  %v761_v43 = vmax.f32 %v540_v38, 0.0  ;;  %848 = vst.msk [vmem:[%s1652_s3 + $0x100] sm:$0xff] %vm815_vm0, %v790_v40  ;;  %v791_v44 = vmax.f32 %v660_v41, 0.0 }
 0x123   :  { %819 = vst.msk [vmem:[%s1652_s3 + $0x18] sm:$0xff] %vm815_vm0, %v761_v43  ;;  %849 = vst.msk [vmem:[%s1652_s3 + $0x108] sm:$0xff] %vm815_vm0, %v791_v44 }
 0x124   :  { %v544_v45 = vpop.f32.mrb[8].mxu0  ;;  %v664_v46 = vpop.f32.mrb[8].mxu1 }
 0x125   :  { %v545_v47 = vadd.f32 %v1362_v12, %v544_v45  ;;  %v546_v48 = vpop.f32.mrb[9].mxu0  ;;  %v665_v49 = vadd.f32 %v1362_v12, %v664_v46  ;;  %v666_v50 = vpop.f32.mrb[9].mxu1 }
 0x126   :  { %v547_v51 = vpop.f32.mrb[10].mxu0  ;;  %v667_v52 = vpop.f32.mrb[10].mxu1 }
 0x127   :  { %v762_v53 = vmax.f32 %v545_v47, 0.0  ;;  %v548_v54 = vadd.f32 %v1362_v12, %v547_v51  ;;  %v549_v55 = vpop.f32.mrb[11].mxu0  ;;  %v792_v56 = vmax.f32 %v665_v49, 0.0  ;;  %v668_v57 = vadd.f32 %v1362_v12, %v667_v52  ;;  %v669_v58 = vpop.f32.mrb[11].mxu1 }
 0x129   :  { %820 = vst.msk [vmem:[%s1652_s3 + $0x20] sm:$0xff] %vm815_vm0, %v762_v53  ;;  %v763_v59 = vmax.f32 %v548_v54, 0.0  ;;  %850 = vst.msk [vmem:[%s1652_s3 + $0x110] sm:$0xff] %vm815_vm0, %v792_v56  ;;  %v793_v60 = vmax.f32 %v668_v57, 0.0 }
 0x12b   :  { %821 = vst.msk [vmem:[%s1652_s3 + $0x28] sm:$0xff] %vm815_vm0, %v763_v59  ;;  %851 = vst.msk [vmem:[%s1652_s3 + $0x118] sm:$0xff] %vm815_vm0, %v793_v60 }
 0x12c   :  { %v552_v61 = vpop.f32.mrb[12].mxu0  ;;  %v672_v62 = vpop.f32.mrb[12].mxu1 }
 0x12d   :  { %v553_v63 = vadd.f32 %v1362_v12, %v552_v61  ;;  %v554_v0 = vpop.f32.mrb[13].mxu0  ;;  %v673_v1 = vadd.f32 %v1362_v12, %v672_v62  ;;  %v674_v2 = vpop.f32.mrb[13].mxu1 }
 0x12e   :  { %v555_v3 = vpop.f32.mrb[14].mxu0  ;;  %v675_v4 = vpop.f32.mrb[14].mxu1 }
 0x12f   :  { %v764_v5 = vmax.f32 %v553_v63, 0.0  ;;  %v556_v6 = vadd.f32 %v1362_v12, %v555_v3  ;;  %v557_v7 = vpop.f32.mrb[15].mxu0  ;;  %v794_v8 = vmax.f32 %v673_v1, 0.0  ;;  %v676_v9 = vadd.f32 %v1362_v12, %v675_v4  ;;  %v677_v10 = vpop.f32.mrb[15].mxu1 }
 0x131   :  { %822 = vst.msk [vmem:[%s1652_s3 + $0x30] sm:$0xff] %vm815_vm0, %v764_v5  ;;  %v765_v11 = vmax.f32 %v556_v6, 0.0  ;;  %852 = vst.msk [vmem:[%s1652_s3 + $0x120] sm:$0xff] %vm815_vm0, %v794_v8  ;;  %v795_v13 = vmax.f32 %v676_v9, 0.0 }
 0x133   :  { %823 = vst.msk [vmem:[%s1652_s3 + $0x38] sm:$0xff] %vm815_vm0, %v765_v11  ;;  %853 = vst.msk [vmem:[%s1652_s3 + $0x128] sm:$0xff] %vm815_vm0, %v795_v13 }
 0x134   :  { %v560_v14 = vpop.f32.mrb[16].mxu0  ;;  %v680_v15 = vpop.f32.mrb[16].mxu1 }
 0x135   :  { %v561_v16 = vadd.f32 %v1362_v12, %v560_v14  ;;  %v562_v17 = vpop.f32.mrb[17].mxu0  ;;  %v681_v18 = vadd.f32 %v1362_v12, %v680_v15  ;;  %v682_v19 = vpop.f32.mrb[17].mxu1 }
 0x136   :  { %v563_v20 = vpop.f32.mrb[18].mxu0  ;;  %v683_v21 = vpop.f32.mrb[18].mxu1 }
 0x137   :  { %v766_v22 = vmax.f32 %v561_v16, 0.0  ;;  %v564_v23 = vadd.f32 %v1362_v12, %v563_v20  ;;  %v565_v24 = vpop.f32.mrb[19].mxu0  ;;  %v796_v25 = vmax.f32 %v681_v18, 0.0  ;;  %v684_v26 = vadd.f32 %v1362_v12, %v683_v21  ;;  %v685_v27 = vpop.f32.mrb[19].mxu1 }
 0x139   :  { %824 = vst.msk [vmem:[%s1652_s3 + $0x40] sm:$0xff] %vm815_vm0, %v766_v22  ;;  %v767_v28 = vmax.f32 %v564_v23, 0.0  ;;  %854 = vst.msk [vmem:[%s1652_s3 + $0x130] sm:$0xff] %vm815_vm0, %v796_v25  ;;  %v797_v29 = vmax.f32 %v684_v26, 0.0 }
 0x13b   :  { %825 = vst.msk [vmem:[%s1652_s3 + $0x48] sm:$0xff] %vm815_vm0, %v767_v28  ;;  %855 = vst.msk [vmem:[%s1652_s3 + $0x138] sm:$0xff] %vm815_vm0, %v797_v29 }
 0x13c   :  { %v568_v30 = vpop.f32.mrb[20].mxu0  ;;  %v688_v31 = vpop.f32.mrb[20].mxu1 }
 0x13d   :  { %v569_v32 = vadd.f32 %v1362_v12, %v568_v30  ;;  %v570_v33 = vpop.f32.mrb[21].mxu0  ;;  %v689_v34 = vadd.f32 %v1362_v12, %v688_v31  ;;  %v690_v35 = vpop.f32.mrb[21].mxu1 }
 0x13e   :  { %v571_v36 = vpop.f32.mrb[22].mxu0  ;;  %v691_v37 = vpop.f32.mrb[22].mxu1 }
 0x13f   :  { %v768_v38 = vmax.f32 %v569_v32, 0.0  ;;  %v572_v39 = vadd.f32 %v1362_v12, %v571_v36  ;;  %v573_v40 = vpop.f32.mrb[23].mxu0  ;;  %v798_v41 = vmax.f32 %v689_v34, 0.0  ;;  %v692_v42 = vadd.f32 %v1362_v12, %v691_v37  ;;  %v693_v43 = vpop.f32.mrb[23].mxu1 }
 0x141   :  { %826 = vst.msk [vmem:[%s1652_s3 + $0x50] sm:$0xff] %vm815_vm0, %v768_v38  ;;  %v769_v44 = vmax.f32 %v572_v39, 0.0  ;;  %856 = vst.msk [vmem:[%s1652_s3 + $0x140] sm:$0xff] %vm815_vm0, %v798_v41  ;;  %v799_v45 = vmax.f32 %v692_v42, 0.0 }
 0x143   :  { %827 = vst.msk [vmem:[%s1652_s3 + $0x58] sm:$0xff] %vm815_vm0, %v769_v44  ;;  %857 = vst.msk [vmem:[%s1652_s3 + $0x148] sm:$0xff] %vm815_vm0, %v799_v45 }
 0x144   :  { %v576_v46 = vpop.f32.mrb[24].mxu0  ;;  %v696_v47 = vpop.f32.mrb[24].mxu1 }
 0x145   :  { %v577_v48 = vadd.f32 %v1362_v12, %v576_v46  ;;  %v578_v49 = vpop.f32.mrb[25].mxu0  ;;  %v697_v50 = vadd.f32 %v1362_v12, %v696_v47  ;;  %v698_v51 = vpop.f32.mrb[25].mxu1 }
 0x146   :  { %v579_v52 = vpop.f32.mrb[26].mxu0  ;;  %v699_v53 = vpop.f32.mrb[26].mxu1 }
 0x147   :  { %v770_v54 = vmax.f32 %v577_v48, 0.0  ;;  %v580_v55 = vadd.f32 %v1362_v12, %v579_v52  ;;  %v581_v56 = vpop.f32.mrb[27].mxu0  ;;  %v800_v57 = vmax.f32 %v697_v50, 0.0  ;;  %v700_v58 = vadd.f32 %v1362_v12, %v699_v53  ;;  %v701_v59 = vpop.f32.mrb[27].mxu1 }
 0x149   :  { %828 = vst.msk [vmem:[%s1652_s3 + $0x60] sm:$0xff] %vm815_vm0, %v770_v54  ;;  %v771_v60 = vmax.f32 %v580_v55, 0.0  ;;  %858 = vst.msk [vmem:[%s1652_s3 + $0x150] sm:$0xff] %vm815_vm0, %v800_v57  ;;  %v801_v61 = vmax.f32 %v700_v58, 0.0 }
 0x14b   :  { %829 = vst.msk [vmem:[%s1652_s3 + $0x68] sm:$0xff] %vm815_vm0, %v771_v60  ;;  %859 = vst.msk [vmem:[%s1652_s3 + $0x158] sm:$0xff] %vm815_vm0, %v801_v61 }
 0x14c   :  { %v584_v62 = vpop.f32.mrb[28].mxu0  ;;  %v704_v63 = vpop.f32.mrb[28].mxu1 }
 0x14d   :  { %v585_v0 = vadd.f32 %v1362_v12, %v584_v62  ;;  %v586_v1 = vpop.f32.mrb[29].mxu0  ;;  %v705_v2 = vadd.f32 %v1362_v12, %v704_v63  ;;  %v706_v3 = vpop.f32.mrb[29].mxu1 }
 0x14e   :  { %v587_v4 = vpop.f32.mrb[30].mxu0  ;;  %v707_v5 = vpop.f32.mrb[30].mxu1 }
 0x14f   :  { %v772_v6 = vmax.f32 %v585_v0, 0.0  ;;  %v588_v7 = vadd.f32 %v1362_v12, %v587_v4  ;;  %v589_v8 = vpop.f32.mrb[31].mxu0  ;;  %v802_v9 = vmax.f32 %v705_v2, 0.0  ;;  %v708_v10 = vadd.f32 %v1362_v12, %v707_v5  ;;  %v709_v11 = vpop.f32.mrb[31].mxu1 }
 0x151   :  { %830 = vst.msk [vmem:[%s1652_s3 + $0x70] sm:$0xff] %vm815_vm0, %v772_v6  ;;  %v773_v13 = vmax.f32 %v588_v7, 0.0  ;;  %860 = vst.msk [vmem:[%s1652_s3 + $0x160] sm:$0xff] %vm815_vm0, %v802_v9  ;;  %v803_v14 = vmax.f32 %v708_v10, 0.0 }
 0x153   :  { %831 = vst.msk [vmem:[%s1652_s3 + $0x78] sm:$0xff] %vm815_vm0, %v773_v13  ;;  %861 = vst.msk [vmem:[%s1652_s3 + $0x168] sm:$0xff] %vm815_vm0, %v803_v14 }
 0x154   :  { %v592_v15 = vpop.f32.mrb[32].mxu0  ;;  %v712_v16 = vpop.f32.mrb[32].mxu1 }
 0x155   :  { %v593_v17 = vadd.f32 %v1362_v12, %v592_v15  ;;  %v594_v18 = vpop.f32.mrb[33].mxu0  ;;  %v713_v19 = vadd.f32 %v1362_v12, %v712_v16  ;;  %v714_v20 = vpop.f32.mrb[33].mxu1 }
 0x156   :  { %v595_v21 = vpop.f32.mrb[34].mxu0  ;;  %v715_v22 = vpop.f32.mrb[34].mxu1 }
 0x157   :  { %v774_v23 = vmax.f32 %v593_v17, 0.0  ;;  %v596_v24 = vadd.f32 %v1362_v12, %v595_v21  ;;  %v597_v25 = vpop.f32.mrb[35].mxu0  ;;  %v804_v26 = vmax.f32 %v713_v19, 0.0  ;;  %v716_v27 = vadd.f32 %v1362_v12, %v715_v22  ;;  %v717_v28 = vpop.f32.mrb[35].mxu1 }
 0x159   :  { %832 = vst.msk [vmem:[%s1652_s3 + $0x80] sm:$0xff] %vm815_vm0, %v774_v23  ;;  %v775_v29 = vmax.f32 %v596_v24, 0.0  ;;  %862 = vst.msk [vmem:[%s1652_s3 + $0x170] sm:$0xff] %vm815_vm0, %v804_v26  ;;  %v805_v30 = vmax.f32 %v716_v27, 0.0 }
 0x15b   :  { %833 = vst.msk [vmem:[%s1652_s3 + $0x88] sm:$0xff] %vm815_vm0, %v775_v29  ;;  %863 = vst.msk [vmem:[%s1652_s3 + $0x178] sm:$0xff] %vm815_vm0, %v805_v30 }
 0x15c   :  { %v600_v31 = vpop.f32.mrb[36].mxu0  ;;  %v720_v32 = vpop.f32.mrb[36].mxu1 }
 0x15d   :  { %v601_v33 = vadd.f32 %v1362_v12, %v600_v31  ;;  %v602_v34 = vpop.f32.mrb[37].mxu0  ;;  %v721_v35 = vadd.f32 %v1362_v12, %v720_v32  ;;  %v722_v36 = vpop.f32.mrb[37].mxu1 }
 0x15e   :  { %v603_v37 = vpop.f32.mrb[38].mxu0  ;;  %v723_v38 = vpop.f32.mrb[38].mxu1 }
 0x15f   :  { %v776_v39 = vmax.f32 %v601_v33, 0.0  ;;  %v604_v40 = vadd.f32 %v1362_v12, %v603_v37  ;;  %v605_v41 = vpop.f32.mrb[39].mxu0  ;;  %v806_v42 = vmax.f32 %v721_v35, 0.0  ;;  %v724_v43 = vadd.f32 %v1362_v12, %v723_v38  ;;  %v725_v44 = vpop.f32.mrb[39].mxu1 }
 0x161   :  { %834 = vst.msk [vmem:[%s1652_s3 + $0x90] sm:$0xff] %vm815_vm0, %v776_v39  ;;  %v777_v45 = vmax.f32 %v604_v40, 0.0  ;;  %864 = vst.msk [vmem:[%s1652_s3 + $0x180] sm:$0xff] %vm815_vm0, %v806_v42  ;;  %v807_v46 = vmax.f32 %v724_v43, 0.0 }
 0x163   :  { %835 = vst.msk [vmem:[%s1652_s3 + $0x98] sm:$0xff] %vm815_vm0, %v777_v45  ;;  %865 = vst.msk [vmem:[%s1652_s3 + $0x188] sm:$0xff] %vm815_vm0, %v807_v46 }
 0x164   :  { %v608_v47 = vpop.f32.mrb[40].mxu0  ;;  %v728_v48 = vpop.f32.mrb[40].mxu1 }
 0x165   :  { %v609_v49 = vadd.f32 %v1362_v12, %v608_v47  ;;  %v610_v50 = vpop.f32.mrb[41].mxu0  ;;  %v729_v51 = vadd.f32 %v1362_v12, %v728_v48  ;;  %v730_v52 = vpop.f32.mrb[41].mxu1 }
 0x166   :  { %v611_v53 = vpop.f32.mrb[42].mxu0  ;;  %v731_v54 = vpop.f32.mrb[42].mxu1 }
 0x167   :  { %v778_v55 = vmax.f32 %v609_v49, 0.0  ;;  %v612_v56 = vadd.f32 %v1362_v12, %v611_v53  ;;  %v613_v57 = vpop.f32.mrb[43].mxu0  ;;  %v808_v58 = vmax.f32 %v729_v51, 0.0  ;;  %v732_v59 = vadd.f32 %v1362_v12, %v731_v54  ;;  %v733_v60 = vpop.f32.mrb[43].mxu1 }
 0x169   :  { %836 = vst.msk [vmem:[%s1652_s3 + $0xa0] sm:$0xff] %vm815_vm0, %v778_v55  ;;  %v779_v61 = vmax.f32 %v612_v56, 0.0  ;;  %866 = vst.msk [vmem:[%s1652_s3 + $0x190] sm:$0xff] %vm815_vm0, %v808_v58  ;;  %v809_v62 = vmax.f32 %v732_v59, 0.0 }
 0x16b   :  { %837 = vst.msk [vmem:[%s1652_s3 + $0xa8] sm:$0xff] %vm815_vm0, %v779_v61  ;;  %867 = vst.msk [vmem:[%s1652_s3 + $0x198] sm:$0xff] %vm815_vm0, %v809_v62 }
 0x16c   :  { %v616_v63 = vpop.f32.mrb[44].mxu0  ;;  %v736_v0 = vpop.f32.mrb[44].mxu1 }
 0x16d   :  { %v617_v1 = vadd.f32 %v1362_v12, %v616_v63  ;;  %v618_v2 = vpop.f32.mrb[45].mxu0  ;;  %v737_v3 = vadd.f32 %v1362_v12, %v736_v0  ;;  %v738_v4 = vpop.f32.mrb[45].mxu1 }
 0x16e   :  { %v619_v5 = vpop.f32.mrb[46].mxu0  ;;  %v739_v6 = vpop.f32.mrb[46].mxu1 }
 0x16f   :  { %v780_v7 = vmax.f32 %v617_v1, 0.0  ;;  %v620_v8 = vadd.f32 %v1362_v12, %v619_v5  ;;  %v621_v9 = vpop.f32.mrb[47].mxu0  ;;  %v810_v10 = vmax.f32 %v737_v3, 0.0  ;;  %v740_v11 = vadd.f32 %v1362_v12, %v739_v6  ;;  %v741_v13 = vpop.f32.mrb[47].mxu1 }
 0x171   :  { %838 = vst.msk [vmem:[%s1652_s3 + $0xb0] sm:$0xff] %vm815_vm0, %v780_v7  ;;  %v781_v14 = vmax.f32 %v620_v8, 0.0  ;;  %868 = vst.msk [vmem:[%s1652_s3 + $0x1a0] sm:$0xff] %vm815_vm0, %v810_v10  ;;  %v811_v15 = vmax.f32 %v740_v11, 0.0 }
 0x173   :  { %839 = vst.msk [vmem:[%s1652_s3 + $0xb8] sm:$0xff] %vm815_vm0, %v781_v14  ;;  %869 = vst.msk [vmem:[%s1652_s3 + $0x1a8] sm:$0xff] %vm815_vm0, %v811_v15 }
 0x174   :  { %v624_v16 = vpop.f32.mrb[48].mxu0  ;;  %v744_v17 = vpop.f32.mrb[48].mxu1 }
 0x175   :  { %v625_v18 = vadd.f32 %v1362_v12, %v624_v16  ;;  %v626_v19 = vpop.f32.mrb[49].mxu0  ;;  %v745_v20 = vadd.f32 %v1362_v12, %v744_v17  ;;  %v746_v21 = vpop.f32.mrb[49].mxu1 }
 0x176   :  { %v627_v22 = vpop.f32.mrb[50].mxu0  ;;  %v747_v23 = vpop.f32.mrb[50].mxu1 }
 0x177   :  { %v782_v24 = vmax.f32 %v625_v18, 0.0  ;;  %v628_v25 = vadd.f32 %v1362_v12, %v627_v22  ;;  %v629_v26 = vpop.f32.mrb[51].mxu0  ;;  %v812_v27 = vmax.f32 %v745_v20, 0.0  ;;  %v748_v28 = vadd.f32 %v1362_v12, %v747_v23  ;;  %v749_v29 = vpop.f32.mrb[51].mxu1 }
 0x179   :  { %840 = vst.msk [vmem:[%s1652_s3 + $0xc0] sm:$0xff] %vm815_vm0, %v782_v24  ;;  %v783_v30 = vmax.f32 %v628_v25, 0.0  ;;  %870 = vst.msk [vmem:[%s1652_s3 + $0x1b0] sm:$0xff] %vm815_vm0, %v812_v27  ;;  %v813_v31 = vmax.f32 %v748_v28, 0.0 }
 0x17b   :  { %841 = vst.msk [vmem:[%s1652_s3 + $0xc8] sm:$0xff] %vm815_vm0, %v783_v30  ;;  %871 = vst.msk [vmem:[%s1652_s3 + $0x1b8] sm:$0xff] %vm815_vm0, %v813_v31 }
 0x17c   :  { %v632_v32 = vpop.f32.mrb[52].mxu0  ;;  %v752_v33 = vpop.f32.mrb[52].mxu1 }
 0x17d   :  { %v633_v34 = vadd.f32 %v1362_v12, %v632_v32  ;;  %v634_v35 = vpop.f32.mrb[53].mxu0  ;;  %v753_v36 = vadd.f32 %v1362_v12, %v752_v33  ;;  %v754_v37 = vpop.f32.mrb[53].mxu1 }
 0x17e   :  { %v635_v38 = vpop.f32.mrb[54].mxu0  ;;  %v755_v39 = vpop.f32.mrb[54].mxu1 }
 0x17f   :  { %v784_v40 = vmax.f32 %v633_v34, 0.0  ;;  %v636_v41 = vadd.f32 %v1362_v12, %v635_v38  ;;  %v637_v42 = vpop.f32.mrb[55].mxu0  ;;  %v814_v43 = vmax.f32 %v753_v36, 0.0  ;;  %v756_v44 = vpop.f32.mrb[55].mxu1 }
 0x181   :  { %842 = vst.msk [vmem:[%s1652_s3 + $0xd0] sm:$0xff] %vm815_vm0, %v784_v40  ;;  %v785_v45 = vmax.f32 %v636_v41, 0.0  ;;  %872 = vst.msk [vmem:[%s1652_s3 + $0x1c0] sm:$0xff] %vm815_vm0, %v814_v43 }
 0x183   :  { %843 = vst.msk [vmem:[%s1652_s3 + $0xd8] sm:$0xff] %vm815_vm0, %v785_v45 }
 0x184   :  { %v640_v46 = vpop.f32.mrb[56].mxu0 }
 0x185   :  { %v641_v47 = vadd.f32 %v1362_v12, %v640_v46  ;;  %v642_v48 = vpop.f32.mrb[57].mxu0 }
 0x186   :  { %v643_v49 = vpop.f32.mrb[58].mxu0 }
 0x187   :  { %v786_v50 = vmax.f32 %v641_v47, 0.0  ;;  %v644_v51 = vadd.f32 %v1362_v12, %v643_v49  ;;  %v645_v52 = vpop.f32.mrb[59].mxu0 }
 0x189   :  { %844 = vst.msk [vmem:[%s1652_s3 + $0xe0] sm:$0xff] %vm815_vm0, %v786_v50  ;;  %v787_v53 = vmax.f32 %v644_v51, 0.0 }
 0x18b   :  { %845 = vst.msk [vmem:[%s1652_s3 + $0xe8] sm:$0xff] %vm815_vm0, %v787_v53 }

// kernel: forward.10
= control target key start
LH: loop header
LB: loop body
LE: loop exit
PB: predicated region body
PF: predicated region fallthrough
CT: control target
= control target key end

     0   :  { %v770_v1 = vmov 0.0   ;;  %vm771_vm0 = vmmov 0   ;;  %vm536_vm1 = vcmask 523264   ;;  %s1016_s1 = inlined_call_operand.vmem [shape: bf16[384,64], index: 1, kind: input, shape index: {}]   ;;  %s1017_s0 = inlined_call_operand.vmem [shape: bf16[104,384], index: 0, kind: input, shape index: {}]   ;;  %s1018_s2 = inlined_call_operand.vmem [shape: f32[1,64], index: 2, kind: input, shape index: {}]   ;;  %s1019_s3 = inlined_call_operand.vmem [shape: f32[104,64], index: 3, kind: output, shape index: {}]  }
   0x1   :  { %v719_v0 = vld [vmem:[%s1016_s1 + $0x40] sm:$0xff]   ;;  %673 = vmatprep.subr.bf16.mxu1 %v770_v1  ;;  %689 = vmatprep.mubr.msk.bf16.mxu1 %vm771_vm0, %v770_v1  ;;  %v722_v4 = vld [vmem:[%s1016_s1 + $0x48] sm:$0xff]   ;;  %v725_v7 = vld [vmem:[%s1016_s1 + $0x50] sm:$0xff]  }
   0x2   :  { %v720_v2 = vld [vmem:[%s1016_s1] sm:$0xff]   ;;  %600 = vmatprep.subr.bf16.mxu0 %v719_v0  ;;  %v723_v5 = vld [vmem:[%s1016_s1 + $0x8] sm:$0xff]   ;;  %v726_v8 = vld [vmem:[%s1016_s1 + $0x10] sm:$0xff]  }
   0x3   :  { %v721_v3 = vld [vmem:[%s1016_s1 + $0x80] sm:$0xff]   ;;  %601 = vmatpush3.bf16.msra.mxu0 %v720_v2  ;;  %v724_v6 = vld [vmem:[%s1016_s1 + $0x88] sm:$0xff]   ;;  %v727_v9 = vld [vmem:[%s1016_s1 + $0x90] sm:$0xff]  }
   0x4   :  { %674 = vmatpush3.bf16.msra.mxu1 %v721_v3  ;;  %602 = vmatprep.subr.bf16.mxu0 %v722_v4  ;;  %v728_v10 = vld [vmem:[%s1016_s1 + $0x58] sm:$0xff]   ;;  %v731_v13 = vld [vmem:[%s1016_s1 + $0x60] sm:$0xff]   ;;  %v734_v16 = vld [vmem:[%s1016_s1 + $0x68] sm:$0xff]  }
   0x5   :  { %675 = vmatprep.subr.bf16.mxu1 %v770_v1  ;;  %v729_v11 = vld [vmem:[%s1016_s1 + $0x18] sm:$0xff]   ;;  %v732_v14 = vld [vmem:[%s1016_s1 + $0x20] sm:$0xff]   ;;  %v735_v17 = vld [vmem:[%s1016_s1 + $0x28] sm:$0xff]  }
   0x6   :  { %v730_v12 = vld [vmem:[%s1016_s1 + $0x98] sm:$0xff]   ;;  %v733_v15 = vld [vmem:[%s1016_s1 + $0xa0] sm:$0xff]   ;;  %v736_v18 = vld [vmem:[%s1016_s1 + $0xa8] sm:$0xff]  }
   0x7   :  { %603 = vmatpush3.bf16.msra.mxu0 %v723_v5  ;;  %v737_v19 = vld [vmem:[%s1016_s1 + $0x70] sm:$0xff]   ;;  %v740_v22 = vld [vmem:[%s1016_s1 + $0x78] sm:$0xff]   ;;  %v742_v26 = vld [vmem:[%s1017_s0] ss:$12 sps:$4 sm:$0xff]  }
   0x8   :  { %676 = vmatpush3.bf16.msra.mxu1 %v724_v6  ;;  %604 = vmatprep.subr.bf16.mxu0 %v725_v7  ;;  %v738_v20 = vld [vmem:[%s1016_s1 + $0x30] sm:$0xff]   ;;  %v741_v24 = vld [vmem:[%s1016_s1 + $0x38] sm:$0xff]   ;;  %v750_v30 = vld [vmem:[%s1017_s0 + $0x20] ss:$12 sps:$4 sm:$0xff]  }
   0x9   :  { %677 = vmatprep.subr.bf16.mxu1 %v770_v1  ;;  %v739_v21 = vld [vmem:[%s1016_s1 + $0xb0] sm:$0xff]   ;;  %v745_v25 = vld [vmem:[%s1016_s1 + $0xb8] sm:$0xff]   ;;  %v761_v38 = vld [vmem:[%s1017_s0 + $0x60] ss:$12 sps:$4 sm:$0xff]  }
   0xa   :  { %v744_v23 = vld [vmem:[%s1017_s0 + $0x4] ss:$12 sps:$4 sm:$0xff]   ;;  %v746_v27 = vld [vmem:[%s1017_s0 + $0x8] ss:$12 sps:$4 sm:$0xff]   ;;  %v755_v34 = vld [vmem:[%s1017_s0 + $0x4c] ss:$12 sps:$4 sm:$0xff]  }
   0xb   :  { %605 = vmatpush3.bf16.msra.mxu0 %v726_v8  ;;  %379 = vmatprep.mubr.bf16.mxu0 %v744_v23  ;;  %v747_v28 = vld [vmem:[%s1017_s0 + $0x1c] ss:$12 sps:$4 sm:$0xff]   ;;  %v749_v29 = vld [vmem:[%s1017_s0 + $0x18] ss:$12 sps:$4 sm:$0xff]   ;;  %v751_v31 = vld [vmem:[%s1017_s0 + $0x34] ss:$12 sps:$4 sm:$0xff]  }
   0xc   :  { %678 = vmatpush3.bf16.msra.mxu1 %v727_v9  ;;  %606 = vmatprep.subr.bf16.mxu0 %v728_v10  ;;  %v753_v32 = vld [vmem:[%s1017_s0 + $0x30] ss:$12 sps:$4 sm:$0xff]   ;;  %v754_v33 = vld [vmem:[%s1017_s0 + $0x38] ss:$12 sps:$4 sm:$0xff]   ;;  %v757_v35 = vld [vmem:[%s1017_s0 + $0x48] ss:$12 sps:$4 sm:$0xff]  }
   0xd   :  { %679 = vmatprep.subr.bf16.mxu1 %v770_v1  ;;  %v758_v36 = vld [vmem:[%s1017_s0 + $0x50] ss:$12 sps:$4 sm:$0xff]   ;;  %v762_v39 = vld [vmem:[%s1017_s0 + $0x68] ss:$12 sps:$4 sm:$0xff]   ;;  %v765_v42 = vld [vmem:[%s1017_s0 + $0x78] ss:$12 sps:$4 sm:$0xff]  }
   0xe   :  { %v759_v37 = vld [vmem:[%s1017_s0 + $0x64] ss:$12 sps:$4 sm:$0xff]   ;;  %v763_v40 = vld [vmem:[%s1017_s0 + $0x7c] ss:$12 sps:$4 sm:$0xff]   ;;  %v766_v43 = vld [vmem:[%s1017_s0 + $0x80] ss:$12 sps:$4 sm:$0xff]  }
   0xf   :  { %607 = vmatpush3.bf16.msra.mxu0 %v729_v11  ;;  %v39_v41 = vld [vmem:[%s1017_s0 + $0x90] sm:$0xff]  ;;  %v769_v46 = vld [vmem:[%s1017_s0 + $0x98] ss:$0 sps:$4 sm:$0xff]   ;;  %v949_v49 = vld [vmem:[%s1018_s2] ss:$0 sm:$0xff] }
  0x10   :  { %680 = vmatpush3.bf16.msra.mxu1 %v730_v12  ;;  %608 = vmatprep.subr.bf16.mxu0 %v731_v13  ;;  %v574_v44 = vcombine.high %v39_v41, %v39_v41  ;;  %v573_v45 = vcombine.low %v39_v41, %v39_v41 }
  0x11   :  { %681 = vmatprep.subr.bf16.mxu1 %v770_v1 }
  0x13   :  { %609 = vmatpush3.bf16.msra.mxu0 %v732_v14 }
  0x14   :  { %682 = vmatpush3.bf16.msra.mxu1 %v733_v15  ;;  %610 = vmatprep.subr.bf16.mxu0 %v734_v16 }
  0x15   :  { %683 = vmatprep.subr.bf16.mxu1 %v770_v1 }
  0x17   :  { %611 = vmatpush3.bf16.msra.mxu0 %v735_v17 }
  0x18   :  { %684 = vmatpush3.bf16.msra.mxu1 %v736_v18  ;;  %612 = vmatprep.subr.bf16.mxu0 %v737_v19 }
  0x19   :  { %685 = vmatprep.subr.bf16.mxu1 %v770_v1 }
  0x1b   :  { %613 = vmatpush3.bf16.msra.mxu0 %v738_v20 }
  0x1c   :  { %686 = vmatpush3.bf16.msra.mxu1 %v739_v21  ;;  %614 = vmatprep.subr.bf16.mxu0 %v740_v22 }
  0x1d   :  { %687 = vmatprep.subr.bf16.mxu1 %v770_v1 }
  0x1f   :  { %615 = vmatpush3.bf16.msra.mxu0 %v741_v24 }
  0x20   :  { %688 = vmatpush3.bf16.msra.mxu1 %v745_v25 }
  0x22   :  { %380 = vmatmul.mubr.bf16.vlgmr.msra.gmra.mrb[0].mxu0 %v742_v26 }
  0x23   :  { %690 = vmatmul.mubr.bf16.vlgmr.msra.gmra.mrb[0].mxu1 %v746_v27  ;;  %387 = vmatprep.mubr.bf16.mxu0 %v747_v28 }
  0x24   :  { %693 = vmatprep.mubr.msk.bf16.mxu1 %vm771_vm0, %v770_v1 }
  0x2a   :  { %388 = vmatmul.mubr.bf16.gmra.mrb[4].mxu0 %v749_v29 }
  0x2b   :  { %694 = vmatmul.mubr.bf16.gmra.mrb[4].mxu1 %v750_v30  ;;  %395 = vmatprep.mubr.bf16.mxu0 %v751_v31 }
  0x2c   :  { %697 = vmatprep.mubr.msk.bf16.mxu1 %vm771_vm0, %v770_v1 }
  0x32   :  { %396 = vmatmul.mubr.bf16.gmra.mrb[8].mxu0 %v753_v32 }
  0x33   :  { %698 = vmatmul.mubr.bf16.gmra.mrb[8].mxu1 %v754_v33  ;;  %403 = vmatprep.mubr.bf16.mxu0 %v755_v34 }
  0x34   :  { %701 = vmatprep.mubr.msk.bf16.mxu1 %vm771_vm0, %v770_v1 }
  0x3a   :  { %404 = vmatmul.mubr.bf16.gmra.mrb[12].mxu0 %v757_v35 }
  0x3b   :  { %702 = vmatmul.mubr.bf16.gmra.mrb[12].mxu1 %v758_v36  ;;  %411 = vmatprep.mubr.bf16.mxu0 %v759_v37 }
  0x3c   :  { %705 = vmatprep.mubr.msk.bf16.mxu1 %vm771_vm0, %v770_v1 }
  0x42   :  { %412 = vmatmul.mubr.bf16.gmra.mrb[16].mxu0 %v761_v38 }
  0x43   :  { %706 = vmatmul.mubr.bf16.gmra.mrb[16].mxu1 %v762_v39  ;;  %419 = vmatprep.mubr.bf16.mxu0 %v763_v40 }
  0x44   :  { %709 = vmatprep.mubr.msk.bf16.mxu1 %vm771_vm0, %v770_v1 }
  0x4a   :  { %420 = vmatmul.mubr.bf16.gmra.mrb[20].mxu0 %v765_v42 }
  0x4b   :  { %710 = vmatmul.mubr.bf16.gmra.mrb[20].mxu1 %v766_v43  ;;  %427 = vmatprep.mubr.bf16.mxu0 %v574_v44 }
  0x4c   :  { %713 = vmatprep.mubr.msk.bf16.mxu1 %vm771_vm0, %v770_v1 }
  0x52   :  { %428 = vmatmul.mubr.bf16.gmra.mrb[24].mxu0 %v573_v45 }
  0x53   :  { %714 = vmatmul.mubr.bf16.gmra.mrb[24].mxu1 %v769_v46 }
  0xf5   :  { %v616_v47 = vpop.f32.mrb[0].mxu0 }
  0xf6   :  { %v617_v48 = vpop.f32.mrb[1].mxu0  ;;  %v469_v50 = vpop.f32.mrb[0].mxu1 }
  0xf7   :  { %v618_v51 = vadd.f32 %v617_v48, %v616_v47  ;;  %v619_v52 = vpop.f32.mrb[2].mxu0  ;;  %v691_v53 = vpop.f32.mrb[1].mxu1 }
  0xf8   :  { %v620_v54 = vpop.f32.mrb[3].mxu0  ;;  %v472_v55 = vpop.f32.mrb[2].mxu1 }
  0xf9   :  { %v382_v56 = vadd.f32 %v618_v51, %v949_v49  ;;  %v621_v57 = vadd.f32 %v620_v54, %v619_v52  ;;  %v692_v58 = vpop.f32.mrb[3].mxu1 }
  0xfb   :  { %v470_v59 = vadd.f32 %v469_v50, %v382_v56  ;;  %v385_v60 = vadd.f32 %v621_v57, %v949_v49 }
  0xfd   :  { %v523_v61 = vmax.f32 %v470_v59, 0.0  ;;  %v473_v62 = vadd.f32 %v472_v55, %v385_v60  ;;  %v622_v63 = vpop.f32.mrb[4].mxu0 }
  0xfe   :  { %v623_v0 = vpop.f32.mrb[5].mxu0  ;;  %v477_v1 = vpop.f32.mrb[4].mxu1 }
  0xff   :  { %537 = vst.msk [vmem:[%s1019_s3] sm:$0xff] %vm536_vm1, %v523_v61  ;;  %v524_v2 = vmax.f32 %v473_v62, 0.0  ;;  %v624_v3 = vadd.f32 %v623_v0, %v622_v63  ;;  %v625_v4 = vpop.f32.mrb[6].mxu0  ;;  %v695_v5 = vpop.f32.mrb[5].mxu1 }
 0x100   :  { %v626_v6 = vpop.f32.mrb[7].mxu0  ;;  %v480_v7 = vpop.f32.mrb[6].mxu1 }
 0x101   :  { %538 = vst.msk [vmem:[%s1019_s3 + $0x8] sm:$0xff] %vm536_vm1, %v524_v2  ;;  %v390_v8 = vadd.f32 %v624_v3, %v949_v49  ;;  %v627_v9 = vadd.f32 %v626_v6, %v625_v4  ;;  %v696_v10 = vpop.f32.mrb[7].mxu1 }
 0x103   :  { %v478_v11 = vadd.f32 %v477_v1, %v390_v8  ;;  %v393_v12 = vadd.f32 %v627_v9, %v949_v49 }
 0x105   :  { %v525_v13 = vmax.f32 %v478_v11, 0.0  ;;  %v481_v14 = vadd.f32 %v480_v7, %v393_v12  ;;  %v628_v15 = vpop.f32.mrb[8].mxu0 }
 0x106   :  { %v629_v16 = vpop.f32.mrb[9].mxu0  ;;  %v485_v17 = vpop.f32.mrb[8].mxu1 }
 0x107   :  { %539 = vst.msk [vmem:[%s1019_s3 + $0x10] sm:$0xff] %vm536_vm1, %v525_v13  ;;  %v526_v18 = vmax.f32 %v481_v14, 0.0  ;;  %v630_v19 = vadd.f32 %v629_v16, %v628_v15  ;;  %v631_v20 = vpop.f32.mrb[10].mxu0  ;;  %v699_v21 = vpop.f32.mrb[9].mxu1 }
 0x108   :  { %v632_v22 = vpop.f32.mrb[11].mxu0  ;;  %v488_v23 = vpop.f32.mrb[10].mxu1 }
 0x109   :  { %540 = vst.msk [vmem:[%s1019_s3 + $0x18] sm:$0xff] %vm536_vm1, %v526_v18  ;;  %v398_v24 = vadd.f32 %v630_v19, %v949_v49  ;;  %v633_v25 = vadd.f32 %v632_v22, %v631_v20  ;;  %v700_v26 = vpop.f32.mrb[11].mxu1 }
 0x10b   :  { %v486_v27 = vadd.f32 %v485_v17, %v398_v24  ;;  %v401_v28 = vadd.f32 %v633_v25, %v949_v49 }
 0x10d   :  { %v527_v29 = vmax.f32 %v486_v27, 0.0  ;;  %v489_v30 = vadd.f32 %v488_v23, %v401_v28  ;;  %v634_v31 = vpop.f32.mrb[12].mxu0 }
 0x10e   :  { %v635_v32 = vpop.f32.mrb[13].mxu0  ;;  %v493_v33 = vpop.f32.mrb[12].mxu1 }
 0x10f   :  { %541 = vst.msk [vmem:[%s1019_s3 + $0x20] sm:$0xff] %vm536_vm1, %v527_v29  ;;  %v528_v34 = vmax.f32 %v489_v30, 0.0  ;;  %v636_v35 = vadd.f32 %v635_v32, %v634_v31  ;;  %v637_v36 = vpop.f32.mrb[14].mxu0  ;;  %v703_v37 = vpop.f32.mrb[13].mxu1 }
 0x110   :  { %v638_v38 = vpop.f32.mrb[15].mxu0  ;;  %v496_v39 = vpop.f32.mrb[14].mxu1 }
 0x111   :  { %542 = vst.msk [vmem:[%s1019_s3 + $0x28] sm:$0xff] %vm536_vm1, %v528_v34  ;;  %v406_v40 = vadd.f32 %v636_v35, %v949_v49  ;;  %v639_v41 = vadd.f32 %v638_v38, %v637_v36  ;;  %v704_v42 = vpop.f32.mrb[15].mxu1 }
 0x113   :  { %v494_v43 = vadd.f32 %v493_v33, %v406_v40  ;;  %v409_v44 = vadd.f32 %v639_v41, %v949_v49 }
 0x115   :  { %v529_v45 = vmax.f32 %v494_v43, 0.0  ;;  %v497_v46 = vadd.f32 %v496_v39, %v409_v44  ;;  %v640_v47 = vpop.f32.mrb[16].mxu0 }
 0x116   :  { %v641_v48 = vpop.f32.mrb[17].mxu0  ;;  %v501_v50 = vpop.f32.mrb[16].mxu1 }
 0x117   :  { %543 = vst.msk [vmem:[%s1019_s3 + $0x30] sm:$0xff] %vm536_vm1, %v529_v45  ;;  %v530_v51 = vmax.f32 %v497_v46, 0.0  ;;  %v642_v52 = vadd.f32 %v641_v48, %v640_v47  ;;  %v643_v53 = vpop.f32.mrb[18].mxu0  ;;  %v707_v54 = vpop.f32.mrb[17].mxu1 }
 0x118   :  { %v644_v55 = vpop.f32.mrb[19].mxu0  ;;  %v504_v56 = vpop.f32.mrb[18].mxu1 }
 0x119   :  { %544 = vst.msk [vmem:[%s1019_s3 + $0x38] sm:$0xff] %vm536_vm1, %v530_v51  ;;  %v414_v57 = vadd.f32 %v642_v52, %v949_v49  ;;  %v645_v58 = vadd.f32 %v644_v55, %v643_v53  ;;  %v708_v59 = vpop.f32.mrb[19].mxu1 }
 0x11b   :  { %v502_v60 = vadd.f32 %v501_v50, %v414_v57  ;;  %v417_v61 = vadd.f32 %v645_v58, %v949_v49 }
 0x11d   :  { %v531_v62 = vmax.f32 %v502_v60, 0.0  ;;  %v505_v63 = vadd.f32 %v504_v56, %v417_v61  ;;  %v646_v0 = vpop.f32.mrb[20].mxu0 }
 0x11e   :  { %v647_v1 = vpop.f32.mrb[21].mxu0  ;;  %v509_v2 = vpop.f32.mrb[20].mxu1 }
 0x11f   :  { %545 = vst.msk [vmem:[%s1019_s3 + $0x40] sm:$0xff] %vm536_vm1, %v531_v62  ;;  %v532_v3 = vmax.f32 %v505_v63, 0.0  ;;  %v648_v4 = vadd.f32 %v647_v1, %v646_v0  ;;  %v649_v5 = vpop.f32.mrb[22].mxu0  ;;  %v711_v6 = vpop.f32.mrb[21].mxu1 }
 0x120   :  { %v650_v7 = vpop.f32.mrb[23].mxu0  ;;  %v512_v8 = vpop.f32.mrb[22].mxu1 }
 0x121   :  { %546 = vst.msk [vmem:[%s1019_s3 + $0x48] sm:$0xff] %vm536_vm1, %v532_v3  ;;  %v422_v9 = vadd.f32 %v648_v4, %v949_v49  ;;  %v651_v10 = vadd.f32 %v650_v7, %v649_v5  ;;  %v712_v11 = vpop.f32.mrb[23].mxu1 }
 0x123   :  { %v510_v12 = vadd.f32 %v509_v2, %v422_v9  ;;  %v425_v13 = vadd.f32 %v651_v10, %v949_v49 }
 0x125   :  { %v533_v14 = vmax.f32 %v510_v12, 0.0  ;;  %v513_v15 = vadd.f32 %v512_v8, %v425_v13  ;;  %v652_v16 = vpop.f32.mrb[24].mxu0 }
 0x126   :  { %v653_v17 = vpop.f32.mrb[25].mxu0  ;;  %v517_v18 = vpop.f32.mrb[24].mxu1 }
 0x127   :  { %547 = vst.msk [vmem:[%s1019_s3 + $0x50] sm:$0xff] %vm536_vm1, %v533_v14  ;;  %v534_v19 = vmax.f32 %v513_v15, 0.0  ;;  %v654_v20 = vadd.f32 %v653_v17, %v652_v16  ;;  %v655_v21 = vpop.f32.mrb[26].mxu0  ;;  %v715_v22 = vpop.f32.mrb[25].mxu1 }
 0x128   :  { %v656_v23 = vpop.f32.mrb[27].mxu0  ;;  %v520_v24 = vpop.f32.mrb[26].mxu1 }
 0x129   :  { %548 = vst.msk [vmem:[%s1019_s3 + $0x58] sm:$0xff] %vm536_vm1, %v534_v19  ;;  %v430_v25 = vadd.f32 %v654_v20, %v949_v49  ;;  %v716_v26 = vpop.f32.mrb[27].mxu1 }
 0x12b   :  { %v518_v27 = vadd.f32 %v517_v18, %v430_v25 }
 0x12d   :  { %v535_v28 = vmax.f32 %v518_v27, 0.0 }
 0x12f   :  { %549 = vst.msk [vmem:[%s1019_s3 + $0x60] sm:$0xff] %vm536_vm1, %v535_v28 }

// kernel: forward.11
= control target key start
LH: loop header
LB: loop body
LE: loop exit
PB: predicated region body
PF: predicated region fallthrough
CT: control target
= control target key end

     0   :  { %s914_s1 = inlined_call_operand.vmem [shape: bf16[640,128], index: 1, kind: input, shape index: {}]   ;;  %s915_s0 = inlined_call_operand.vmem [shape: bf16[24,640], index: 0, kind: input, shape index: {}]   ;;  %s916_s2 = inlined_call_operand.vmem [shape: f32[1,128], index: 2, kind: input, shape index: {}]   ;;  %s917_s3 = inlined_call_operand.vmem [shape: f32[24,128], index: 3, kind: output, shape index: {}]  }
   0x1   :  { %v686_v0 = vld [vmem:[%s914_s1 + $0x40] sm:$0xff]   ;;  %v690_v4 = vld [vmem:[%s914_s1 + $0x48] sm:$0xff]   ;;  %v694_v8 = vld [vmem:[%s914_s1 + $0x50] sm:$0xff]  }
   0x2   :  { %v687_v1 = vld [vmem:[%s914_s1] sm:$0xff]   ;;  %600 = vmatprep.subr.bf16.mxu0 %v686_v0  ;;  %v691_v5 = vld [vmem:[%s914_s1 + $0x8] sm:$0xff]   ;;  %v695_v9 = vld [vmem:[%s914_s1 + $0x10] sm:$0xff]  }
   0x3   :  { %v688_v2 = vld [vmem:[%s914_s1 + $0xc0] sm:$0xff]   ;;  %601 = vmatpush3.bf16.msra.mxu0 %v687_v1  ;;  %v692_v6 = vld [vmem:[%s914_s1 + $0xc8] sm:$0xff]   ;;  %v696_v10 = vld [vmem:[%s914_s1 + $0xd0] sm:$0xff]  }
   0x4   :  { %v689_v3 = vld [vmem:[%s914_s1 + $0x80] sm:$0xff]   ;;  %628 = vmatprep.subr.bf16.mxu1 %v688_v2  ;;  %602 = vmatprep.subr.bf16.mxu0 %v690_v4  ;;  %v693_v7 = vld [vmem:[%s914_s1 + $0x88] sm:$0xff]   ;;  %v697_v11 = vld [vmem:[%s914_s1 + $0x90] sm:$0xff]  }
   0x5   :  { %629 = vmatpush3.bf16.msra.mxu1 %v689_v3  ;;  %v698_v12 = vld [vmem:[%s914_s1 + $0x58] sm:$0xff]   ;;  %v702_v16 = vld [vmem:[%s914_s1 + $0x60] sm:$0xff]   ;;  %v706_v20 = vld [vmem:[%s914_s1 + $0x68] sm:$0xff]  }
   0x6   :  { %630 = vmatprep.subr.bf16.mxu1 %v692_v6  ;;  %v699_v13 = vld [vmem:[%s914_s1 + $0x18] sm:$0xff]   ;;  %v703_v17 = vld [vmem:[%s914_s1 + $0x20] sm:$0xff]   ;;  %v707_v21 = vld [vmem:[%s914_s1 + $0x28] sm:$0xff]  }
   0x7   :  { %603 = vmatpush3.bf16.msra.mxu0 %v691_v5  ;;  %v700_v14 = vld [vmem:[%s914_s1 + $0xd8] sm:$0xff]   ;;  %v704_v18 = vld [vmem:[%s914_s1 + $0xe0] sm:$0xff]   ;;  %v708_v22 = vld [vmem:[%s914_s1 + $0xe8] sm:$0xff]  }
   0x8   :  { %604 = vmatprep.subr.bf16.mxu0 %v694_v8  ;;  %v701_v15 = vld [vmem:[%s914_s1 + $0x98] sm:$0xff]   ;;  %v705_v19 = vld [vmem:[%s914_s1 + $0xa0] sm:$0xff]   ;;  %v709_v23 = vld [vmem:[%s914_s1 + $0xa8] sm:$0xff]  }
   0x9   :  { %631 = vmatpush3.bf16.msra.mxu1 %v693_v7  ;;  %v710_v24 = vld [vmem:[%s914_s1 + $0x70] sm:$0xff]   ;;  %v714_v28 = vld [vmem:[%s914_s1 + $0x78] sm:$0xff]   ;;  %v721_v34 = vld [vmem:[%s914_s1 + $0x100] sm:$0xff]  }
   0xa   :  { %632 = vmatprep.subr.bf16.mxu1 %v696_v10  ;;  %v711_v25 = vld [vmem:[%s914_s1 + $0x30] sm:$0xff]   ;;  %v715_v29 = vld [vmem:[%s914_s1 + $0x38] sm:$0xff]   ;;  %v724_v36 = vld [vmem:[%s915_s0 + $0xc] ss:$20 sps:$4 sm:$0xff]  }
   0xb   :  { %605 = vmatpush3.bf16.msra.mxu0 %v695_v9  ;;  %v712_v26 = vld [vmem:[%s914_s1 + $0xf0] sm:$0xff]   ;;  %v716_v30 = vld [vmem:[%s914_s1 + $0xf8] sm:$0xff]   ;;  %v725_v37 = vld [vmem:[%s914_s1 + $0x108] sm:$0xff]   ;;  %475 = vmatprep.mubr.bf16.mxu1 %v724_v36 }
   0xc   :  { %606 = vmatprep.subr.bf16.mxu0 %v698_v12  ;;  %v713_v27 = vld [vmem:[%s914_s1 + $0xb0] sm:$0xff]   ;;  %v719_v32 = vld [vmem:[%s915_s0 + $0x4] ss:$20 sps:$4 sm:$0xff]   ;;  %v722_v35 = vld [vmem:[%s915_s0 + $0x8] ss:$20 sps:$4 sm:$0xff]  }
   0xd   :  { %633 = vmatpush3.bf16.msra.mxu1 %v697_v11  ;;  %v717_v31 = vld [vmem:[%s915_s0] ss:$20 sps:$4 sm:$0xff]   ;;  %v720_v33 = vld [vmem:[%s914_s1 + $0xb8] sm:$0xff]   ;;  %427 = vmatprep.mubr.bf16.mxu0 %v719_v32  ;;  %v21_v39 = vld [vmem:[%s915_s0 + $0x28] sm:$0xff] }
   0xe   :  { %634 = vmatprep.subr.bf16.mxu1 %v700_v14  ;;  %v726_v38 = vld [vmem:[%s914_s1 + $0x110] sm:$0xff]   ;;  %v556_v40 = vcombine.high %v21_v39, %v21_v39  ;;  %v555_v41 = vcombine.low %v21_v39, %v21_v39  ;;  %v727_v43 = vld [vmem:[%s914_s1 + $0x118] sm:$0xff]   ;;  %v728_v47 = vld [vmem:[%s914_s1 + $0x120] sm:$0xff]  }
   0xf   :  { %607 = vmatpush3.bf16.msra.mxu0 %v699_v13  ;;  %v22_v42 = vld [vmem:[%s915_s0 + $0x30] sm:$0xff]  ;;  %v730_v48 = vld [vmem:[%s914_s1 + $0x128] sm:$0xff]   ;;  %v735_v50 = vld [vmem:[%s914_s1 + $0x138] sm:$0xff]  }
  0x10   :  { %608 = vmatprep.subr.bf16.mxu0 %v702_v16  ;;  %v558_v44 = vcombine.high %v22_v42, %v22_v42  ;;  %v557_v45 = vcombine.low %v22_v42, %v22_v42  ;;  %v736_v46 = vld [vmem:[%s915_s0 + $0x10] ss:$20 sps:$4 sm:$0xff]   ;;  %v737_v51 = vld [vmem:[%s915_s0 + $0x38] ss:$0 sps:$4 sm:$0xff]   ;;  %v549_v53 = vld [vmem:[%s916_s2] ss:$0 sm:$0xff] }
  0x11   :  { %635 = vmatpush3.bf16.msra.mxu1 %v701_v15  ;;  %v733_v49 = vld [vmem:[%s914_s1 + $0x130] sm:$0xff]  }
  0x12   :  { %636 = vmatprep.subr.bf16.mxu1 %v704_v18 }
  0x13   :  { %609 = vmatpush3.bf16.msra.mxu0 %v703_v17 }
  0x14   :  { %610 = vmatprep.subr.bf16.mxu0 %v706_v20 }
  0x15   :  { %637 = vmatpush3.bf16.msra.mxu1 %v705_v19 }
  0x16   :  { %638 = vmatprep.subr.bf16.mxu1 %v708_v22 }
  0x17   :  { %611 = vmatpush3.bf16.msra.mxu0 %v707_v21 }
  0x18   :  { %612 = vmatprep.subr.bf16.mxu0 %v710_v24 }
  0x19   :  { %639 = vmatpush3.bf16.msra.mxu1 %v709_v23 }
  0x1a   :  { %640 = vmatprep.subr.bf16.mxu1 %v712_v26 }
  0x1b   :  { %613 = vmatpush3.bf16.msra.mxu0 %v711_v25 }
  0x1c   :  { %614 = vmatprep.subr.bf16.mxu0 %v714_v28 }
  0x1d   :  { %641 = vmatpush3.bf16.msra.mxu1 %v713_v27 }
  0x1e   :  { %642 = vmatprep.subr.bf16.mxu1 %v716_v30 }
  0x1f   :  { %615 = vmatpush3.bf16.msra.mxu0 %v715_v29 }
  0x20   :  { %666 = vmatprep.subr.bf16.mxu0 %v721_v34 }
  0x21   :  { %643 = vmatpush3.bf16.msra.mxu1 %v720_v33 }
  0x22   :  { %428 = vmatmul.mubr.bf16.vlgmr.msra.gmra.mrb[0].mxu0 %v717_v31 }
  0x23   :  { %667 = vmatpush3.bf16.msra.mxu0 %v721_v34  ;;  %435 = vmatprep.mubr.bf16.mxu0 %v556_v40 }
  0x24   :  { %476 = vmatmul.mubr.bf16.vlgmr.msra.gmra.mrb[0].mxu1 %v722_v35  ;;  %668 = vmatprep.subr.bf16.mxu0 %v725_v37 }
  0x25   :  { %483 = vmatprep.mubr.bf16.mxu1 %v558_v44 }
  0x27   :  { %669 = vmatpush3.bf16.msra.mxu0 %v725_v37 }
  0x28   :  { %670 = vmatprep.subr.bf16.mxu0 %v726_v38 }
  0x2a   :  { %436 = vmatmul.mubr.bf16.gmra.mrb[4].mxu0 %v555_v41 }
  0x2b   :  { %671 = vmatpush3.bf16.msra.mxu0 %v726_v38  ;;  %682 = vmatprep.mubr.bf16.mxu0 %v736_v46 }
  0x2c   :  { %672 = vmatprep.subr.bf16.mxu0 %v727_v43  ;;  %484 = vmatmul.mubr.bf16.gmra.mrb[4].mxu1 %v557_v45 }
  0x2f   :  { %673 = vmatpush3.bf16.msra.mxu0 %v727_v43 }
  0x30   :  { %674 = vmatprep.subr.bf16.mxu0 %v728_v47 }
  0x33   :  { %675 = vmatpush3.bf16.msra.mxu0 %v728_v47 }
  0x34   :  { %676 = vmatprep.subr.bf16.mxu0 %v730_v48 }
  0x37   :  { %677 = vmatpush3.bf16.msra.mxu0 %v730_v48 }
  0x38   :  { %678 = vmatprep.subr.bf16.mxu0 %v733_v49 }
  0x3b   :  { %679 = vmatpush3.bf16.msra.mxu0 %v733_v49 }
  0x3c   :  { %680 = vmatprep.subr.bf16.mxu0 %v735_v50 }
  0x3f   :  { %681 = vmatpush3.bf16.msra.mxu0 %v735_v50 }
  0x42   :  { %683 = vmatmul.mubr.bf16.vlgmr.msra.gmra.mrb[8].mxu0 %v737_v51 }
  0xf5   :  { %v616_v52 = vpop.f32.mrb[0].mxu0 }
  0xf6   :  { %v617_v54 = vpop.f32.mrb[1].mxu0 }
  0xf7   :  { %v618_v55 = vadd.f32 %v617_v54, %v616_v52  ;;  %v619_v56 = vpop.f32.mrb[2].mxu0  ;;  %v644_v57 = vpop.f32.mrb[0].mxu1 }
  0xf8   :  { %v620_v58 = vpop.f32.mrb[3].mxu0  ;;  %v645_v61 = vpop.f32.mrb[1].mxu1 }
  0xf9   :  { %v430_v59 = vadd.f32 %v618_v55, %v549_v53  ;;  %v621_v60 = vadd.f32 %v620_v58, %v619_v56  ;;  %v646_v62 = vadd.f32 %v645_v61, %v644_v57  ;;  %v647_v63 = vpop.f32.mrb[2].mxu1 }
  0xfa   :  { %v648_v1 = vpop.f32.mrb[3].mxu1 }
  0xfb   :  { %v433_v0 = vadd.f32 %v621_v60, %v549_v53  ;;  %v649_v2 = vadd.f32 %v648_v1, %v647_v63  ;;  %v478_v3 = vadd.f32 %v646_v62, %v430_v59 }
  0xfd   :  { %v622_v4 = vpop.f32.mrb[4].mxu0  ;;  %v481_v6 = vadd.f32 %v649_v2, %v433_v0 }
  0xfe   :  { %v623_v5 = vpop.f32.mrb[5].mxu0 }
  0xff   :  { %v624_v7 = vadd.f32 %v623_v5, %v622_v4  ;;  %v625_v8 = vpop.f32.mrb[6].mxu0  ;;  %v650_v10 = vpop.f32.mrb[4].mxu1 }
 0x100   :  { %v626_v9 = vpop.f32.mrb[7].mxu0  ;;  %v651_v12 = vpop.f32.mrb[5].mxu1 }
 0x101   :  { %v438_v11 = vadd.f32 %v624_v7, %v549_v53  ;;  %v652_v13 = vadd.f32 %v651_v12, %v650_v10  ;;  %v653_v14 = vpop.f32.mrb[6].mxu1 }
 0x102   :  { %v654_v15 = vpop.f32.mrb[7].mxu1 }
 0x103   :  { %v486_v16 = vadd.f32 %v652_v13, %v438_v11 }
 0x115   :  { %v684_v17 = vpop.f32.mrb[8].mxu0 }
 0x116   :  { %v534_v18 = vadd.f32 %v684_v17, %v486_v16  ;;  %v525_v19 = vpop.f32.mrb[9].mxu0 }
 0x117   :  { %v526_v20 = vadd.f32 %v525_v19, %v478_v3  ;;  %v685_v21 = vpop.f32.mrb[10].mxu0 }
 0x118   :  { %v541_v22 = vmax.f32 %v534_v18, 0.0  ;;  %v528_v23 = vpop.f32.mrb[11].mxu0 }
 0x119   :  { %v539_v24 = vmax.f32 %v526_v20, 0.0  ;;  %v529_v25 = vadd.f32 %v528_v23, %v481_v6 }
 0x11a   :  { %544 = vst [vmem:[%s917_s3 + $0x10] sm:$0xff] %v541_v22 }
 0x11b   :  { %542 = vst [vmem:[%s917_s3] sm:$0xff] %v539_v24  ;;  %v540_v26 = vmax.f32 %v529_v25, 0.0 }
 0x11d   :  { %543 = vst [vmem:[%s917_s3 + $0x8] sm:$0xff] %v540_v26 }

// kernel: forward.12
= control target key start
LH: loop header
LB: loop body
LE: loop exit
PB: predicated region body
PF: predicated region fallthrough
CT: control target
= control target key end

     0   :  { %vm1124_vm0 = vmmov 0   ;;  %s1382_s1 = inlined_call_operand.vmem [shape: bf16[1152,128], index: 1, kind: input, shape index: {}]   ;;  %s1383_s0 = inlined_call_operand.vmem [shape: bf16[8,1152], index: 0, kind: input, shape index: {}]   ;;  %s1384_s2 = inlined_call_operand.vmem [shape: f32[1,128], index: 2, kind: input, shape index: {}]   ;;  %s1385_s3 = inlined_call_operand.vmem [shape: f32[8,128], index: 3, kind: output, shape index: {}]  }
   0x1   :  { %v1042_v0 = vld [vmem:[%s1382_s1 + $0x40] sm:$0xff]   ;;  %v1046_v4 = vld [vmem:[%s1382_s1 + $0x48] sm:$0xff]   ;;  %v1050_v8 = vld [vmem:[%s1382_s1 + $0x50] sm:$0xff]  }
   0x2   :  { %v1043_v1 = vld [vmem:[%s1382_s1] sm:$0xff]   ;;  %923 = vmatprep.subr.bf16.mxu0 %v1042_v0  ;;  %v1047_v5 = vld [vmem:[%s1382_s1 + $0x8] sm:$0xff]   ;;  %v1051_v9 = vld [vmem:[%s1382_s1 + $0x10] sm:$0xff]  }
   0x3   :  { %v1044_v2 = vld [vmem:[%s1382_s1 + $0xc0] sm:$0xff]   ;;  %924 = vmatpush3.bf16.msra.mxu0 %v1043_v1  ;;  %v1048_v6 = vld [vmem:[%s1382_s1 + $0xc8] sm:$0xff]   ;;  %v1052_v10 = vld [vmem:[%s1382_s1 + $0xd0] sm:$0xff]  }
   0x4   :  { %v1045_v3 = vld [vmem:[%s1382_s1 + $0x80] sm:$0xff]   ;;  %945 = vmatprep.subr.bf16.mxu1 %v1044_v2  ;;  %925 = vmatprep.subr.bf16.mxu0 %v1046_v4  ;;  %v1049_v7 = vld [vmem:[%s1382_s1 + $0x88] sm:$0xff]   ;;  %v1053_v11 = vld [vmem:[%s1382_s1 + $0x90] sm:$0xff]  }
   0x5   :  { %946 = vmatpush3.bf16.msra.mxu1 %v1045_v3  ;;  %v1054_v12 = vld [vmem:[%s1382_s1 + $0x58] sm:$0xff]   ;;  %v1058_v16 = vld [vmem:[%s1382_s1 + $0x60] sm:$0xff]   ;;  %v1062_v20 = vld [vmem:[%s1382_s1 + $0x68] sm:$0xff]  }
   0x6   :  { %947 = vmatprep.subr.bf16.mxu1 %v1048_v6  ;;  %v1055_v13 = vld [vmem:[%s1382_s1 + $0x18] sm:$0xff]   ;;  %v1059_v17 = vld [vmem:[%s1382_s1 + $0x20] sm:$0xff]   ;;  %v1063_v21 = vld [vmem:[%s1382_s1 + $0x28] sm:$0xff]  }
   0x7   :  { %926 = vmatpush3.bf16.msra.mxu0 %v1047_v5  ;;  %v1056_v14 = vld [vmem:[%s1382_s1 + $0xd8] sm:$0xff]   ;;  %v1060_v18 = vld [vmem:[%s1382_s1 + $0xe0] sm:$0xff]   ;;  %v1064_v22 = vld [vmem:[%s1382_s1 + $0xe8] sm:$0xff]  }
   0x8   :  { %927 = vmatprep.subr.bf16.mxu0 %v1050_v8  ;;  %v1057_v15 = vld [vmem:[%s1382_s1 + $0x98] sm:$0xff]   ;;  %v1061_v19 = vld [vmem:[%s1382_s1 + $0xa0] sm:$0xff]   ;;  %v1065_v23 = vld [vmem:[%s1382_s1 + $0xa8] sm:$0xff]  }
   0x9   :  { %948 = vmatpush3.bf16.msra.mxu1 %v1049_v7  ;;  %v1066_v24 = vld [vmem:[%s1382_s1 + $0x70] sm:$0xff]   ;;  %v1070_v28 = vld [vmem:[%s1382_s1 + $0x78] sm:$0xff]   ;;  %v15_v31 = vld [vmem:[%s1383_s0] sm:$0xff] }
   0xa   :  { %949 = vmatprep.subr.bf16.mxu1 %v1052_v10  ;;  %v1067_v25 = vld [vmem:[%s1382_s1 + $0x30] sm:$0xff]   ;;  %v1071_v29 = vld [vmem:[%s1382_s1 + $0x38] sm:$0xff]   ;;  %v842_v32 = vcombine.low %v15_v31, %v15_v31  ;;  %v843_v33 = vcombine.high %v15_v31, %v15_v31  ;;  %v1076_v35 = vld [vmem:[%s1382_s1 + $0x140] sm:$0xff]  }
   0xb   :  { %928 = vmatpush3.bf16.msra.mxu0 %v1051_v9  ;;  %v1068_v26 = vld [vmem:[%s1382_s1 + $0xf0] sm:$0xff]   ;;  %v1072_v30 = vld [vmem:[%s1382_s1 + $0xf8] sm:$0xff]   ;;  %v16_v36 = vld [vmem:[%s1383_s0 + $0x8] sm:$0xff]  ;;  %v1123_v9 = vmov 0.0  }
   0xc   :  { %929 = vmatprep.subr.bf16.mxu0 %v1054_v12  ;;  %v1069_v27 = vld [vmem:[%s1382_s1 + $0xb0] sm:$0xff]   ;;  %v1075_v34 = vld [vmem:[%s1382_s1 + $0xb8] sm:$0xff]   ;;  %667 = vmatprep.mubr.bf16.mxu0 %v843_v33  ;;  %v844_v37 = vcombine.low %v16_v36, %v16_v36  ;;  %v845_v38 = vcombine.high %v16_v36, %v16_v36  ;;  %v1079_v39 = vld [vmem:[%s1382_s1 + $0x100] sm:$0xff]  }
   0xd   :  { %950 = vmatpush3.bf16.msra.mxu1 %v1053_v11  ;;  %v1080_v40 = vld [vmem:[%s1382_s1 + $0x1c0] sm:$0xff]   ;;  %v1082_v42 = vld [vmem:[%s1382_s1 + $0x148] sm:$0xff]   ;;  %v1086_v46 = vld [vmem:[%s1382_s1 + $0x150] sm:$0xff]  }
   0xe   :  { %951 = vmatprep.subr.bf16.mxu1 %v1056_v14  ;;  %707 = vmatprep.mubr.bf16.mxu1 %v845_v38  ;;  %v1081_v41 = vld [vmem:[%s1382_s1 + $0x180] sm:$0xff]   ;;  %v1083_v43 = vld [vmem:[%s1382_s1 + $0x108] sm:$0xff]   ;;  %v1087_v47 = vld [vmem:[%s1382_s1 + $0x110] sm:$0xff]  }
   0xf   :  { %930 = vmatpush3.bf16.msra.mxu0 %v1055_v13  ;;  %v1084_v44 = vld [vmem:[%s1382_s1 + $0x1c8] sm:$0xff]   ;;  %v1088_v48 = vld [vmem:[%s1382_s1 + $0x1d0] sm:$0xff]   ;;  %v1090_v50 = vld [vmem:[%s1382_s1 + $0x158] sm:$0xff]  }
  0x10   :  { %931 = vmatprep.subr.bf16.mxu0 %v1058_v16  ;;  %v1085_v45 = vld [vmem:[%s1382_s1 + $0x188] sm:$0xff]   ;;  %v1089_v49 = vld [vmem:[%s1382_s1 + $0x190] sm:$0xff]   ;;  %v1091_v51 = vld [vmem:[%s1382_s1 + $0x118] sm:$0xff]  }
  0x11   :  { %952 = vmatpush3.bf16.msra.mxu1 %v1057_v15  ;;  %v1092_v52 = vld [vmem:[%s1382_s1 + $0x1d8] sm:$0xff]   ;;  %v1094_v54 = vld [vmem:[%s1382_s1 + $0x160] sm:$0xff]   ;;  %v1098_v58 = vld [vmem:[%s1382_s1 + $0x168] sm:$0xff]  }
  0x12   :  { %953 = vmatprep.subr.bf16.mxu1 %v1060_v18  ;;  %v1093_v53 = vld [vmem:[%s1382_s1 + $0x198] sm:$0xff]   ;;  %v1095_v55 = vld [vmem:[%s1382_s1 + $0x120] sm:$0xff]   ;;  %v1099_v59 = vld [vmem:[%s1382_s1 + $0x128] sm:$0xff]  }
  0x13   :  { %932 = vmatpush3.bf16.msra.mxu0 %v1059_v17  ;;  %v1096_v56 = vld [vmem:[%s1382_s1 + $0x1e0] sm:$0xff]   ;;  %v1100_v60 = vld [vmem:[%s1382_s1 + $0x1e8] sm:$0xff]   ;;  %v1102_v62 = vld [vmem:[%s1382_s1 + $0x170] sm:$0xff]  }
  0x14   :  { %933 = vmatprep.subr.bf16.mxu0 %v1062_v20  ;;  %v1097_v57 = vld [vmem:[%s1382_s1 + $0x1a0] sm:$0xff]   ;;  %v1101_v61 = vld [vmem:[%s1382_s1 + $0x1a8] sm:$0xff]   ;;  %v1103_v63 = vld [vmem:[%s1382_s1 + $0x130] sm:$0xff]  }
  0x15   :  { %954 = vmatpush3.bf16.msra.mxu1 %v1061_v19  ;;  %v1104_v0 = vld [vmem:[%s1382_s1 + $0x1f0] sm:$0xff]   ;;  %v1106_v2 = vld [vmem:[%s1382_s1 + $0x178] sm:$0xff]   ;;  %v1114_v13 = vld [vmem:[%s1382_s1 + $0x200] sm:$0xff]  }
  0x16   :  { %955 = vmatprep.subr.bf16.mxu1 %v1064_v22  ;;  %v1105_v1 = vld [vmem:[%s1382_s1 + $0x1b0] sm:$0xff]   ;;  %v1107_v3 = vld [vmem:[%s1382_s1 + $0x138] sm:$0xff]   ;;  %v1115_v14 = vld [vmem:[%s1382_s1 + $0x208] sm:$0xff]  }
  0x17   :  { %934 = vmatpush3.bf16.msra.mxu0 %v1063_v21  ;;  %v1108_v4 = vld [vmem:[%s1382_s1 + $0x1f8] sm:$0xff]   ;;  %v17_v5 = vld [vmem:[%s1383_s0 + $0x10] sm:$0xff]  ;;  %v1118_v17 = vld [vmem:[%s1382_s1 + $0x220] sm:$0xff]  }
  0x18   :  { %935 = vmatprep.subr.bf16.mxu0 %v1066_v24  ;;  %v846_v6 = vcombine.low %v17_v5, %v17_v5  ;;  %v847_v7 = vcombine.high %v17_v5, %v17_v5  ;;  %v1111_v8 = vld [vmem:[%s1382_s1 + $0x1b8] sm:$0xff]   ;;  %v1116_v15 = vld [vmem:[%s1382_s1 + $0x210] sm:$0xff]   ;;  %v1119_v18 = vld [vmem:[%s1382_s1 + $0x228] sm:$0xff]  }
  0x19   :  { %956 = vmatpush3.bf16.msra.mxu1 %v1065_v23  ;;  %v18_v10 = vld [vmem:[%s1383_s0 + $0x18] sm:$0xff]  ;;  %v1120_v19 = vld [vmem:[%s1382_s1 + $0x230] sm:$0xff]   ;;  %v1122_v21 = vld [vmem:[%s1383_s0 + $0x20] ss:$0 sps:$4 sm:$0xff]  }
  0x1a   :  { %957 = vmatprep.subr.bf16.mxu1 %v1068_v26  ;;  %v848_v11 = vcombine.low %v18_v10, %v18_v10  ;;  %v849_v12 = vcombine.high %v18_v10, %v18_v10  ;;  %v1117_v16 = vld [vmem:[%s1382_s1 + $0x218] sm:$0xff]   ;;  %v841_v23 = vld [vmem:[%s1384_s2] ss:$0 sm:$0xff] }
  0x1b   :  { %936 = vmatpush3.bf16.msra.mxu0 %v1067_v25  ;;  %v1121_v20 = vld [vmem:[%s1382_s1 + $0x238] sm:$0xff]  }
  0x1c   :  { %937 = vmatprep.subr.bf16.mxu0 %v1070_v28 }
  0x1d   :  { %958 = vmatpush3.bf16.msra.mxu1 %v1069_v27 }
  0x1e   :  { %959 = vmatprep.subr.bf16.mxu1 %v1072_v30 }
  0x1f   :  { %938 = vmatpush3.bf16.msra.mxu0 %v1071_v29 }
  0x20   :  { %967 = vmatprep.subr.bf16.mxu0 %v1076_v35 }
  0x21   :  { %960 = vmatpush3.bf16.msra.mxu1 %v1075_v34 }
  0x22   :  { %668 = vmatmul.mubr.bf16.vlgmr.msra.gmra.mrb[0].mxu0 %v842_v32  ;;  %989 = vmatprep.subr.bf16.mxu1 %v1080_v40 }
  0x23   :  { %968 = vmatpush3.bf16.msra.mxu0 %v1079_v39  ;;  %747 = vmatprep.mubr.bf16.mxu0 %v847_v7 }
  0x24   :  { %708 = vmatmul.mubr.bf16.vlgmr.msra.gmra.mrb[0].mxu1 %v844_v37  ;;  %969 = vmatprep.subr.bf16.mxu0 %v1082_v42 }
  0x25   :  { %990 = vmatpush3.bf16.msra.mxu1 %v1081_v41  ;;  %787 = vmatprep.mubr.bf16.mxu1 %v849_v12 }
  0x26   :  { %991 = vmatprep.subr.bf16.mxu1 %v1084_v44 }
  0x27   :  { %970 = vmatpush3.bf16.msra.mxu0 %v1083_v43 }
  0x28   :  { %971 = vmatprep.subr.bf16.mxu0 %v1086_v46 }
  0x29   :  { %992 = vmatpush3.bf16.msra.mxu1 %v1085_v45 }
  0x2a   :  { %993 = vmatprep.subr.bf16.mxu1 %v1088_v48 }
  0x2b   :  { %972 = vmatpush3.bf16.msra.mxu0 %v1087_v47 }
  0x2c   :  { %973 = vmatprep.subr.bf16.mxu0 %v1090_v50 }
  0x2d   :  { %994 = vmatpush3.bf16.msra.mxu1 %v1089_v49 }
  0x2e   :  { %995 = vmatprep.subr.bf16.mxu1 %v1092_v52 }
  0x2f   :  { %974 = vmatpush3.bf16.msra.mxu0 %v1091_v51 }
  0x30   :  { %975 = vmatprep.subr.bf16.mxu0 %v1094_v54 }
  0x31   :  { %996 = vmatpush3.bf16.msra.mxu1 %v1093_v53 }
  0x32   :  { %997 = vmatprep.subr.bf16.mxu1 %v1096_v56 }
  0x33   :  { %976 = vmatpush3.bf16.msra.mxu0 %v1095_v55 }
  0x34   :  { %977 = vmatprep.subr.bf16.mxu0 %v1098_v58 }
  0x35   :  { %998 = vmatpush3.bf16.msra.mxu1 %v1097_v57 }
  0x36   :  { %999 = vmatprep.subr.bf16.mxu1 %v1100_v60 }
  0x37   :  { %978 = vmatpush3.bf16.msra.mxu0 %v1099_v59 }
  0x38   :  { %979 = vmatprep.subr.bf16.mxu0 %v1102_v62 }
  0x39   :  { %1000 = vmatpush3.bf16.msra.mxu1 %v1101_v61 }
  0x3a   :  { %1001 = vmatprep.subr.bf16.mxu1 %v1104_v0 }
  0x3b   :  { %980 = vmatpush3.bf16.msra.mxu0 %v1103_v63 }
  0x3c   :  { %981 = vmatprep.subr.bf16.mxu0 %v1106_v2 }
  0x3d   :  { %1002 = vmatpush3.bf16.msra.mxu1 %v1105_v1 }
  0x3e   :  { %1003 = vmatprep.subr.bf16.mxu1 %v1108_v4 }
  0x3f   :  { %982 = vmatpush3.bf16.msra.mxu0 %v1107_v3 }
  0x40   :  { %1020 = vmatprep.subr.bf16.mxu0 %v1123_v9 }
  0x41   :  { %1004 = vmatpush3.bf16.msra.mxu1 %v1111_v8 }
  0x42   :  { %748 = vmatmul.mubr.bf16.vlgmr.msra.gmra.mrb[4].mxu0 %v846_v6 }
  0x43   :  { %1021 = vmatpush3.bf16.msra.mxu0 %v1114_v13  ;;  %1036 = vmatprep.mubr.msk.bf16.mxu0 %vm1124_vm0, %v1123_v9 }
  0x44   :  { %788 = vmatmul.mubr.bf16.vlgmr.msra.gmra.mrb[4].mxu1 %v848_v11  ;;  %1022 = vmatprep.subr.bf16.mxu0 %v1123_v9 }
  0x47   :  { %1023 = vmatpush3.bf16.msra.mxu0 %v1115_v14 }
  0x48   :  { %1024 = vmatprep.subr.bf16.mxu0 %v1123_v9 }
  0x4b   :  { %1025 = vmatpush3.bf16.msra.mxu0 %v1116_v15 }
  0x4c   :  { %1026 = vmatprep.subr.bf16.mxu0 %v1123_v9 }
  0x4f   :  { %1027 = vmatpush3.bf16.msra.mxu0 %v1117_v16 }
  0x50   :  { %1028 = vmatprep.subr.bf16.mxu0 %v1123_v9 }
  0x53   :  { %1029 = vmatpush3.bf16.msra.mxu0 %v1118_v17 }
  0x54   :  { %1030 = vmatprep.subr.bf16.mxu0 %v1123_v9 }
  0x57   :  { %1031 = vmatpush3.bf16.msra.mxu0 %v1119_v18 }
  0x58   :  { %1032 = vmatprep.subr.bf16.mxu0 %v1123_v9 }
  0x5b   :  { %1033 = vmatpush3.bf16.msra.mxu0 %v1120_v19 }
  0x5c   :  { %1034 = vmatprep.subr.bf16.mxu0 %v1123_v9 }
  0x5f   :  { %1035 = vmatpush3.bf16.msra.mxu0 %v1121_v20 }
  0x62   :  { %1037 = vmatmul.mubr.bf16.vlgmr.msra.gmra.mrb[8].mxu0 %v1122_v21 }
  0xf5   :  { %v939_v22 = vpop.f32.mrb[0].mxu0 }
  0xf6   :  { %v940_v24 = vpop.f32.mrb[1].mxu0 }
  0xf7   :  { %v941_v25 = vadd.f32 %v940_v24, %v939_v22  ;;  %v942_v26 = vpop.f32.mrb[2].mxu0  ;;  %v961_v27 = vpop.f32.mrb[0].mxu1 }
  0xf8   :  { %v943_v28 = vpop.f32.mrb[3].mxu0  ;;  %v962_v29 = vpop.f32.mrb[1].mxu1 }
  0xf9   :  { %v670_v30 = vadd.f32 %v941_v25, %v841_v23  ;;  %v963_v31 = vadd.f32 %v962_v29, %v961_v27  ;;  %v964_v32 = vpop.f32.mrb[2].mxu1 }
  0xfa   :  { %v965_v33 = vpop.f32.mrb[3].mxu1 }
  0xfb   :  { %v710_v34 = vadd.f32 %v963_v31, %v670_v30 }
 0x115   :  { %v983_v35 = vpop.f32.mrb[4].mxu0 }
 0x116   :  { %v984_v36 = vpop.f32.mrb[5].mxu0 }
 0x117   :  { %v985_v37 = vadd.f32 %v984_v36, %v983_v35  ;;  %v986_v38 = vpop.f32.mrb[6].mxu0  ;;  %v1005_v39 = vpop.f32.mrb[4].mxu1 }
 0x118   :  { %v987_v40 = vpop.f32.mrb[7].mxu0  ;;  %v1006_v41 = vpop.f32.mrb[5].mxu1 }
 0x119   :  { %v750_v42 = vadd.f32 %v985_v37, %v710_v34  ;;  %v1007_v43 = vadd.f32 %v1006_v41, %v1005_v39  ;;  %v1008_v44 = vpop.f32.mrb[6].mxu1 }
 0x11a   :  { %v1009_v45 = vpop.f32.mrb[7].mxu1 }
 0x11b   :  { %v790_v46 = vadd.f32 %v1007_v43, %v750_v42 }
 0x135   :  { %v829_v47 = vpop.f32.mrb[8].mxu0 }
 0x136   :  { %v830_v48 = vadd.f32 %v829_v47, %v790_v46  ;;  %v1038_v49 = vpop.f32.mrb[9].mxu0 }
 0x137   :  { %v832_v50 = vpop.f32.mrb[10].mxu0 }
 0x138   :  { %v835_v51 = vmax.f32 %v830_v48, 0.0  ;;  %v1039_v52 = vpop.f32.mrb[11].mxu0 }
 0x13a   :  { %836 = vst [vmem:[%s1385_s3] sm:$0xff] %v835_v51 }

// kernel: forward.13
= control target key start
LH: loop header
LB: loop body
LE: loop exit
PB: predicated region body
PF: predicated region fallthrough
CT: control target
= control target key end

     0   :  { %v180_v0 = vmov 0.0   ;;  %vm181_vm0 = vmmov 0   ;;  %s235_s1 = inlined_call_operand.vmem [shape: bf16[128,128], index: 1, kind: input, shape index: {}]   ;;  %s236_s0 = inlined_call_operand.vmem [shape: bf16[8,128], index: 0, kind: input, shape index: {}]   ;;  %s237_s2 = inlined_call_operand.vmem [shape: f32[1,128], index: 2, kind: input, shape index: {}]   ;;  %s238_s3 = inlined_call_operand.vmem [shape: f32[8,128], index: 3, kind: output, shape index: {}]  }
   0x1   :  { %150 = vmatprep.subr.bf16.mxu0 %v180_v0  ;;  %v172_v1 = vld [vmem:[%s235_s1] sm:$0xff]   ;;  %166 = vmatprep.mubr.msk.bf16.mxu0 %vm181_vm0, %v180_v0  ;;  %v173_v2 = vld [vmem:[%s235_s1 + $0x8] sm:$0xff]   ;;  %v174_v3 = vld [vmem:[%s235_s1 + $0x10] sm:$0xff]  }
   0x2   :  { %151 = vmatpush3.bf16.msra.mxu0 %v172_v1  ;;  %v175_v4 = vld [vmem:[%s235_s1 + $0x18] sm:$0xff]   ;;  %v176_v5 = vld [vmem:[%s235_s1 + $0x20] sm:$0xff]   ;;  %v177_v6 = vld [vmem:[%s235_s1 + $0x28] sm:$0xff]  }
   0x3   :  { %152 = vmatprep.subr.bf16.mxu0 %v180_v0  ;;  %v178_v7 = vld [vmem:[%s235_s1 + $0x30] sm:$0xff]   ;;  %v179_v8 = vld [vmem:[%s235_s1 + $0x38] sm:$0xff]   ;;  %v15_v9 = vld [vmem:[%s236_s0] sm:$0xf] }
   0x4   :  { %v132_v10 = vld [vmem:[%s237_s2] ss:$0 sm:$0xff] }
   0x6   :  { %153 = vmatpush3.bf16.msra.mxu0 %v173_v2 }
   0x7   :  { %154 = vmatprep.subr.bf16.mxu0 %v180_v0 }
   0xa   :  { %155 = vmatpush3.bf16.msra.mxu0 %v174_v3 }
   0xb   :  { %156 = vmatprep.subr.bf16.mxu0 %v180_v0 }
   0xe   :  { %157 = vmatpush3.bf16.msra.mxu0 %v175_v4 }
   0xf   :  { %158 = vmatprep.subr.bf16.mxu0 %v180_v0 }
  0x12   :  { %159 = vmatpush3.bf16.msra.mxu0 %v176_v5 }
  0x13   :  { %160 = vmatprep.subr.bf16.mxu0 %v180_v0 }
  0x16   :  { %161 = vmatpush3.bf16.msra.mxu0 %v177_v6 }
  0x17   :  { %162 = vmatprep.subr.bf16.mxu0 %v180_v0 }
  0x1a   :  { %163 = vmatpush3.bf16.msra.mxu0 %v178_v7 }
  0x1b   :  { %164 = vmatprep.subr.bf16.mxu0 %v180_v0 }
  0x1e   :  { %165 = vmatpush3.bf16.msra.mxu0 %v179_v8 }
  0x21   :  { %167 = vmatmul.mubr.bf16.vlgmr.msra.gmra.mrb[0].mxu0 %v15_v9 }
  0xf4   :  { %v121_v11 = vpop.f32.mrb[0].mxu0 }
  0xf5   :  { %v122_v12 = vadd.f32 %v132_v10, %v121_v11  ;;  %v168_v13 = vpop.f32.mrb[1].mxu0 }
  0xf6   :  { %v124_v14 = vpop.f32.mrb[2].mxu0 }
  0xf7   :  { %127 = vst [vmem:[%s238_s3] sm:$0xff] %v122_v12  ;;  %v169_v15 = vpop.f32.mrb[3].mxu0 }

</bundles_post_ra>
